<compile_context>
chip_gen: v5e
topology: v5e:2x2
jax: 0.10.0
libtpu: 0.0.40
codegen_flags: <defaults>
</compile_context>

<pallas_src>
import jax
import jax.numpy as jnp
from jax.experimental import pallas as pl
from jax.experimental.pallas import tpu as pltpu


def _make_kernel(eps, m):
    inv_m = 1.0 / float(m)   # eps / m are static -> closed over, no SMEM operand

    def kernel(xa_ref, xb_ref, w_ref, gamma_ref, beta_ref, out_ref):
        # Elementwise add in f32 (VPU), then cast to bf16 for the MXU.
        x = (xa_ref[...] + xb_ref[...]).astype(jnp.bfloat16)       # [Cin, M]
        w = w_ref[...].astype(jnp.bfloat16)                        # [tn, Cin]

        # 1x1 conv == matmul: bf16 x bf16 -> f32 accumulate on the MXU.
        y = jnp.dot(w, x, preferred_element_type=jnp.float32)      # [tn, M]

        # One-pass batch statistics per output channel (reduce over all M).
        s1 = jnp.sum(y, axis=1, keepdims=True)                     # [tn, 1]
        s2 = jnp.sum(y * y, axis=1, keepdims=True)                 # [tn, 1]
        mean = s1 * inv_m
        var = s2 * inv_m - mean * mean                             # biased var
        inv_std = jax.lax.rsqrt(var + eps)

        # Fused per-channel affine: out = y * scale + shift.
        scale = gamma_ref[...] * inv_std                           # [tn, 1]
        shift = beta_ref[...] - mean * scale                       # [tn, 1]
        out_ref[...] = y * scale + shift

    return kernel


def _pick_cout_tile(cout, target=336):
    """Largest multiple-of-8 divisor of `cout` that is <= target."""
    best = None
    for t in range(8, min(cout, target) + 1, 8):
        if cout % t == 0:
            best = t
    return best if best is not None else cout


def fused_add_conv1x1_bn(x320, x305, weight, gamma, beta, eps=1e-3):
    """x320, x305: [N, Cin, H, W]; weight: [Cout, Cin, 1, 1] (PyTorch layout).
    Returns [N, Cout, H, W] (training-mode BatchNorm normalization)."""
    N, Cin, H, W = x320.shape
    Cout = weight.shape[0]
    M = N * H * W

    if N == 1:
        # Free views (no data movement).
        xa = x320.reshape(Cin, M).astype(jnp.float32)
        xb = x305.reshape(Cin, M).astype(jnp.float32)
    else:
        xa = jnp.transpose(x320, (1, 0, 2, 3)).reshape(Cin, M).astype(jnp.float32)
        xb = jnp.transpose(x305, (1, 0, 2, 3)).reshape(Cin, M).astype(jnp.float32)

    w = weight.reshape(Cout, Cin).astype(jnp.float32)   # free view of OIHW
    g = gamma.reshape(Cout, 1).astype(jnp.float32)
    b = beta.reshape(Cout, 1).astype(jnp.float32)

    tn = _pick_cout_tile(Cout)         # 336 for Cout=1344 -> grid of 4 tiles
    grid = (Cout // tn,)

    out_cm = pl.pallas_call(
        _make_kernel(float(eps), M),
        out_shape=jax.ShapeDtypeStruct((Cout, M), jnp.float32),
        grid=grid,
        in_specs=[
            pl.BlockSpec((Cin, M), lambda j: (0, 0)),    # x320 view (resident)
            pl.BlockSpec((Cin, M), lambda j: (0, 0)),    # x305 view (resident)
            pl.BlockSpec((tn, Cin), lambda j: (j, 0)),   # weight tile (pipelined)
            pl.BlockSpec((tn, 1), lambda j: (j, 0)),     # gamma tile
            pl.BlockSpec((tn, 1), lambda j: (j, 0)),     # beta tile
        ],
        out_specs=pl.BlockSpec((tn, M), lambda j: (j, 0)),
        compiler_params=pltpu.CompilerParams(
            dimension_semantics=("parallel",)),          # megacore-split on v7x
    )(xa, xb, w, g, b)

    if N == 1:
        return out_cm.reshape(1, Cout, H, W)             # free view back to NCHW
    return jnp.transpose(out_cm.reshape(Cout, N, H, W), (1, 0, 2, 3))


def _reference(x320, x305, weight, gamma, beta, eps=1e-3):
    x = (x320 + x305).astype(jnp.float32)
    Cout = weight.shape[0]
    w = weight.reshape(Cout, -1).astype(jnp.float32)
    y = jnp.einsum("nchw,oc->nohw", x, w, precision=jax.lax.Precision.HIGHEST)
    mean = jnp.mean(y, axis=(0, 2, 3), keepdims=True)
    var = jnp.mean((y - mean) ** 2, axis=(0, 2, 3), keepdims=True)   # biased
    return (y - mean) * jax.lax.rsqrt(var + eps) * gamma.reshape(1, Cout, 1, 1) \
        + beta.reshape(1, Cout, 1, 1)


if __name__ == "__main__":
    # Shapes implied by the module's forward: [1, 224, 14, 14] inputs.
    N, Cin, Cout, H, W = 1, 224, 1344, 14, 14

    key = jax.random.PRNGKey(0)
    k1, k2, k3, k4, k5 = jax.random.split(key, 5)
    x305 = jax.random.normal(k1, (N, Cin, H, W), dtype=jnp.float32)
    x320 = jax.random.normal(k2, (N, Cin, H, W), dtype=jnp.float32)

    # Conv2d(224, 1344, 1, bias=False) weight, deterministic init.
    weight = jax.random.normal(k3, (Cout, Cin, 1, 1), dtype=jnp.float32) * 0.05
    # BatchNorm2d affine params (perturbed from the default 1/0 to exercise them).
    gamma = 1.0 + 0.1 * jax.random.normal(k4, (Cout,), dtype=jnp.float32)
    beta = 0.1 * jax.random.normal(k5, (Cout,), dtype=jnp.float32)

    out = fused_add_conv1x1_bn(x320, x305, weight, gamma, beta, eps=1e-3)
    out = jax.block_until_ready(out)

    ref = _reference(x320, x305, weight, gamma, beta, eps=1e-3)
    assert out.shape == (N, Cout, H, W)
    # bf16 MXU operands with f32 accumulation -> compare at bf16-level tolerance.
    max_err = float(jnp.max(jnp.abs(out - ref)))
    assert jnp.allclose(out, ref, atol=2e-2, rtol=2e-2), \
        f"mismatch vs reference, max abs err={max_err}"

    print("KERNEL_OK")
</pallas_src>

<mosaic_0001>
module attributes {stable_mosaic.version = 11 : i64} {
  func.func @kernel(%arg0: i32, %arg1: memref<224x196xf32, #tpu.memory_space<vmem>>, %arg2: memref<224x196xf32, #tpu.memory_space<vmem>>, %arg3: memref<336x224xf32, #tpu.memory_space<vmem>>, %arg4: memref<336x1xf32, #tpu.memory_space<vmem>>, %arg5: memref<336x1xf32, #tpu.memory_space<vmem>>, %arg6: memref<336x196xf32, #tpu.memory_space<vmem>>) attributes {dimension_semantics = [#tpu.dimension_semantics<parallel>], iteration_bounds = array<i64: 4>, scalar_prefetch = 0 : i64, scratch_operands = 0 : i64, tpu.core_type = #tpu.core_type<tc>, window_params = [{pipeline_mode = #tpu.pipeline_mode<synchronous>, transform_indices = @transform_0, window_bounds = array<i64: 224, 196>}, {pipeline_mode = #tpu.pipeline_mode<synchronous>, transform_indices = @transform_1, window_bounds = array<i64: 224, 196>}, {transform_indices = @transform_2, window_bounds = array<i64: 336, 224>}, {transform_indices = @transform_3, window_bounds = array<i64: 336, 1>}, {transform_indices = @transform_4, window_bounds = array<i64: 336, 1>}, {transform_indices = @transform_5, window_bounds = array<i64: 336, 196>}]} {
    %c0 = arith.constant 0 : index
    %c0_0 = arith.constant 0 : index
    %0 = vector.load %arg1[%c0, %c0_0] : memref<224x196xf32, #tpu.memory_space<vmem>>, vector<224x196xf32>
    %c0_1 = arith.constant 0 : index
    %c0_2 = arith.constant 0 : index
    %1 = vector.load %arg2[%c0_1, %c0_2] : memref<224x196xf32, #tpu.memory_space<vmem>>, vector<224x196xf32>
    %2 = arith.addf %0, %1 : vector<224x196xf32>
    %3 = arith.truncf %2 : vector<224x196xf32> to vector<224x196xbf16>
    %c0_3 = arith.constant 0 : index
    %c0_4 = arith.constant 0 : index
    %4 = vector.load %arg3[%c0_3, %c0_4] : memref<336x224xf32, #tpu.memory_space<vmem>>, vector<336x224xf32>
    %5 = arith.truncf %4 : vector<336x224xf32> to vector<336x224xbf16>
    %cst = arith.constant dense<0.000000e+00> : vector<336x196xf32>
    %6 = tpu.matmul %5, %3, %cst {dimension_numbers = #tpu.dot_dimension_numbers<[1], [0], [0], [1], [0, 0, 1, 1], [], []>} : vector<336x224xbf16>, vector<224x196xbf16>, vector<336x196xf32> -> vector<336x196xf32>
    %cst_5 = arith.constant dense<0.000000e+00> : vector<336xf32>
    %7 = vector.multi_reduction <add>, %6, %cst_5 [1] : vector<336x196xf32> to vector<336xf32>
    %8 = vector.shape_cast %7 : vector<336xf32> to vector<336x1xf32>
    %9 = arith.mulf %6, %6 : vector<336x196xf32>
    %cst_6 = arith.constant dense<0.000000e+00> : vector<336xf32>
    %10 = vector.multi_reduction <add>, %9, %cst_6 [1] : vector<336x196xf32> to vector<336xf32>
    %11 = vector.shape_cast %10 : vector<336xf32> to vector<336x1xf32>
    %cst_7 = arith.constant 0.00510204071 : f32
    %12 = vector.broadcast %cst_7 : f32 to vector<336x1xf32>
    %13 = arith.mulf %8, %12 : vector<336x1xf32>
    %cst_8 = arith.constant 0.00510204071 : f32
    %14 = vector.broadcast %cst_8 : f32 to vector<336x1xf32>
    %15 = arith.mulf %11, %14 : vector<336x1xf32>
    %16 = arith.mulf %13, %13 : vector<336x1xf32>
    %17 = arith.subf %15, %16 : vector<336x1xf32>
    %cst_9 = arith.constant 1.000000e-03 : f32
    %18 = vector.broadcast %cst_9 : f32 to vector<336x1xf32>
    %19 = arith.addf %17, %18 : vector<336x1xf32>
    %20 = math.rsqrt %19 : vector<336x1xf32>
    %c0_10 = arith.constant 0 : index
    %c0_11 = arith.constant 0 : index
    %21 = vector.load %arg4[%c0_10, %c0_11] : memref<336x1xf32, #tpu.memory_space<vmem>>, vector<336x1xf32>
    %22 = arith.mulf %21, %20 : vector<336x1xf32>
    %c0_12 = arith.constant 0 : index
    %c0_13 = arith.constant 0 : index
    %23 = vector.load %arg5[%c0_12, %c0_13] : memref<336x1xf32, #tpu.memory_space<vmem>>, vector<336x1xf32>
    %24 = arith.mulf %13, %22 : vector<336x1xf32>
    %25 = arith.subf %23, %24 : vector<336x1xf32>
    %26 = vector.broadcast %22 : vector<336x1xf32> to vector<336x196xf32>
    %27 = arith.mulf %6, %26 : vector<336x196xf32>
    %28 = vector.broadcast %25 : vector<336x1xf32> to vector<336x196xf32>
    %29 = arith.addf %27, %28 : vector<336x196xf32>
    %c0_14 = arith.constant 0 : index
    %c0_15 = arith.constant 0 : index
    %30 = vector.load %arg6[%c0_14, %c0_15] : memref<336x196xf32, #tpu.memory_space<vmem>>, vector<336x196xf32>
    tpu.vector_store %arg6[%c0_14, %c0_15], %29 {strides = array<i32>} : memref<336x196xf32, #tpu.memory_space<vmem>>, vector<336x196xf32>,
    return
  }
  func.func @transform_0(%arg0: i32) -> (i32, i32) {
    %c0_i32 = arith.constant 0 : i32
    %c0_i32_0 = arith.constant 0 : i32
    %c0_i32_1 = arith.constant 0 : i32
    return %c0_i32, %c0_i32_0 : i32, i32
  }
  func.func @transform_1(%arg0: i32) -> (i32, i32) {
    %c0_i32 = arith.constant 0 : i32
    %c0_i32_0 = arith.constant 0 : i32
    %c0_i32_1 = arith.constant 0 : i32
    return %c0_i32, %c0_i32_0 : i32, i32
  }
  func.func @transform_2(%arg0: i32) -> (i32, i32) {
    %c0_i32 = arith.constant 0 : i32
    %c0_i32_0 = arith.constant 0 : i32
    return %arg0, %c0_i32 : i32, i32
  }
  func.func @transform_3(%arg0: i32) -> (i32, i32) {
    %c0_i32 = arith.constant 0 : i32
    %c0_i32_0 = arith.constant 0 : i32
    return %arg0, %c0_i32 : i32, i32
  }
  func.func @transform_4(%arg0: i32) -> (i32, i32) {
    %c0_i32 = arith.constant 0 : i32
    %c0_i32_0 = arith.constant 0 : i32
    return %arg0, %c0_i32 : i32, i32
  }
  func.func @transform_5(%arg0: i32) -> (i32, i32) {
    %c0_i32 = arith.constant 0 : i32
    %c0_i32_0 = arith.constant 0 : i32
    return %arg0, %c0_i32 : i32, i32
  }
}

</mosaic_0001>

<bundles_post_ra>
// kernel: tpu_custom_call.1
= control target key start
LH: loop header
LB: loop body
LE: loop exit
PB: predicated region body
PF: predicated region fallthrough
CT: control target
= control target key end

     0   :  { %s3327_s18 = smov 0   ;;  %s5250_s0 = inlined_call_operand.vmem [shape: f32[224,196], index: 0, kind: input, shape index: {}]   ;;  %s5251_s1 = inlined_call_operand.vmem [shape: f32[224,196], index: 1, kind: input, shape index: {}]   ;;  %s5252_s2 = inlined_call_operand.vmem [shape: f32[1344,224], index: 2, kind: input, shape index: {}]   ;;  %s5253_s3 = inlined_call_operand.vmem [shape: f32[1344,1], index: 3, kind: input, shape index: {}]   ;;  %s5254_s4 = inlined_call_operand.vmem [shape: f32[1344,1], index: 4, kind: input, shape index: {}]   ;;  %s5255_s5 = inlined_call_operand.vmem [shape: f32[1344,196], index: 5, kind: output, shape index: {}]  }
   0x1 LB: > { %s3135_s19 = sadd.s32 4294967295, %s3294_s18   ;;  %p3139_p0 = scmp.ge.s32.totalorder %s3294_s18, 1  ;;  %s3294_s18 = sphi %s3327_s18, %s15_s18  }
   0x2   : > { %p211_p1 = scmp.lt.s32.totalorder %s3294_s18, 5 }
   0x4   : > { %p212_p2 = pnand %p3139_p0, %p211_p1 }
   0x6   : > { %215 = sbr.rel (%p212_p2) target bundleno = 1582 (0x62e), region = 40 }
   0xb   : > { %v306_v0 = vld [vmem:[%s5250_s0 + $0xe0] sm:$0xff]  ;;  %v308_v1 = vld [vmem:[%s5250_s0 + $0xf0] sm:$0xff]  ;;  %v307_v5 = vld [vmem:[%s5250_s0 + $0xe8] sm:$0xff]  ;;  %s3454_s29 = smul.u32 42, %s3135_s19  ;;  %vm600_vm0 = vcmask 785408   ;;  %vm1120_vm1 = vcmask 556032  }
   0xc   : > { %v362_v2 = vld [vmem:[%s5251_s1 + $0xe0] sm:$0xff]  ;;  %v364_v3 = vld [vmem:[%s5251_s1 + $0xf0] sm:$0xff]  ;;  %v309_v6 = vld [vmem:[%s5250_s0 + $0xf8] sm:$0xff] }
   0xd   : > { %v418_v4 = vadd.f32 %v362_v2, %v306_v0  ;;  %v420_v7 = vadd.f32 %v364_v3, %v308_v1  ;;  %v363_v8 = vld [vmem:[%s5251_s1 + $0xe8] sm:$0xff]  ;;  %v365_v9 = vld [vmem:[%s5251_s1 + $0xf8] sm:$0xff]  ;;  %v302_v19 = vld [vmem:[%s5250_s0 + $0xc0] sm:$0xff]  ;;  %p252_p3 = scmp.lt.s32.totalorder %s3454_s29, 167 }
   0xe   : > { %v331_v10 = vld [vmem:[%s5250_s0 + $0x1a8] sm:$0xff]  ;;  %v419_v11 = vadd.f32 %v363_v8, %v307_v5  ;;  %v421_v12 = vadd.f32 %v365_v9, %v309_v6  ;;  %v333_v13 = vld [vmem:[%s5250_s0 + $0x1b8] sm:$0xff]  ;;  %v304_v20 = vld [vmem:[%s5250_s0 + $0xd0] sm:$0xff] }
   0xf   : > { %v387_v14 = vld [vmem:[%s5251_s1 + $0x1a8] sm:$0xff]  ;;  %v389_v15 = vld [vmem:[%s5251_s1 + $0x1b8] sm:$0xff]  ;;  %v460_v16 = vpack.c.bf16 %v420_v7, %v418_v4  ;;  %v358_v21 = vld [vmem:[%s5251_s1 + $0xc0] sm:$0xff]  ;;  %s5407_s29 = smov (!%p252_p3, %s3454_s29), 167 }
  0x10   : > { %v443_v17 = vadd.f32 %v387_v14, %v331_v10  ;;  %v445_v18 = vadd.f32 %v389_v15, %v333_v13  ;;  %v461_v22 = vpack.c.bf16 %v421_v12, %v419_v11  ;;  %v360_v23 = vld [vmem:[%s5251_s1 + $0xd0] sm:$0xff]  ;;  %v414_v24 = vadd.f32 %v358_v21, %v302_v19  ;;  %v303_v25 = vld [vmem:[%s5250_s0 + $0xc8] sm:$0xff]  ;;  %v305_v26 = vld [vmem:[%s5250_s0 + $0xd8] sm:$0xff]  ;;  %s3190_s8 = sshll.u32 %s5407_s29, 4  ;;  %s3142_s23 = sshll.u32 %s5407_s29, 3 }
  0x11   : > { %664 = vmatpush.bf16.msra.mxu0 %v460_v16  ;;  %v416_v28 = vadd.f32 %v360_v23, %v304_v20  ;;  %v359_v29 = vld [vmem:[%s5251_s1 + $0xc8] sm:$0xff]  ;;  %v361_v30 = vld [vmem:[%s5251_s1 + $0xd8] sm:$0xff]  ;;  %v330_v40 = vld [vmem:[%s5250_s0 + $0x1a0] sm:$0xff]  ;;  %s3603_s6 = scalar_lea.vmem %s5252_s2, %s3190_s8  ;;  %s4004_s26 = scalar_lea.vmem %s5253_s3, %s3142_s23 }
  0x12   : > { %v473_v27 = vpack.c.bf16 %v445_v18, %v443_v17  ;;  %v327_v31 = vld [vmem:[%s5250_s0 + $0x188] sm:$0xff]  ;;  %892 = vmatpush.bf16.msra.mxu2 %v461_v22  ;;  %v415_v32 = vadd.f32 %v359_v29, %v303_v25  ;;  %v417_v33 = vadd.f32 %v361_v30, %v305_v26  ;;  %v329_v34 = vld [vmem:[%s5250_s0 + $0x198] sm:$0xff]  ;;  %v332_v41 = vld [vmem:[%s5250_s0 + $0x1b0] sm:$0xff]  ;;  %s4012_s30 = scalar_lea.vmem %s5254_s4, %s3142_s23  ;;  %s4276_s10 = scalar_lea.vmem %s5255_s5, %s3190_s8 }
  0x13   : > { %v383_v35 = vld [vmem:[%s5251_s1 + $0x188] sm:$0xff]  ;;  %v385_v36 = vld [vmem:[%s5251_s1 + $0x198] sm:$0xff]  ;;  %v458_v37 = vpack.c.bf16 %v416_v28, %v414_v24  ;;  %v386_v42 = vld [vmem:[%s5251_s1 + $0x1a0] sm:$0xff] }
  0x14   : > { %1008 = vmatpush.bf16.msra.mxu3 %v473_v27  ;;  %v439_v38 = vadd.f32 %v383_v35, %v327_v31  ;;  %v441_v39 = vadd.f32 %v385_v36, %v329_v34  ;;  %v459_v43 = vpack.c.bf16 %v417_v33, %v415_v32  ;;  %v388_v44 = vld [vmem:[%s5251_s1 + $0x1b0] sm:$0xff]  ;;  %v442_v45 = vadd.f32 %v386_v42, %v330_v40  ;;  %v298_v46 = vld [vmem:[%s5250_s0 + $0xa0] sm:$0xff]  ;;  %v299_v52 = vld [vmem:[%s5250_s0 + $0xa8] sm:$0xff] }
  0x15   : > { %v300_v47 = vld [vmem:[%s5250_s0 + $0xb0] sm:$0xff]  ;;  %665 = vmatpush.bf16.msra.mxu0 %v458_v37  ;;  %v444_v49 = vadd.f32 %v388_v44, %v332_v41  ;;  %v354_v50 = vld [vmem:[%s5251_s1 + $0xa0] sm:$0xff]  ;;  %v301_v55 = vld [vmem:[%s5250_s0 + $0xb8] sm:$0xff] }
  0x16   : > { %v471_v48 = vpack.c.bf16 %v441_v39, %v439_v38  ;;  %v356_v51 = vld [vmem:[%s5251_s1 + $0xb0] sm:$0xff]  ;;  %893 = vmatpush.bf16.msra.mxu2 %v459_v43  ;;  %v410_v53 = vadd.f32 %v354_v50, %v298_v46  ;;  %v355_v56 = vld [vmem:[%s5251_s1 + $0xa8] sm:$0xff]  ;;  %v357_v57 = vld [vmem:[%s5251_s1 + $0xb8] sm:$0xff] }
  0x17   : > { %v412_v54 = vadd.f32 %v356_v51, %v300_v47  ;;  %v472_v58 = vpack.c.bf16 %v444_v49, %v442_v45  ;;  %v411_v59 = vadd.f32 %v355_v56, %v299_v52  ;;  %v413_v60 = vadd.f32 %v357_v57, %v301_v55  ;;  %v323_v61 = vld [vmem:[%s5250_s0 + $0x168] sm:$0xff]  ;;  %v325_v62 = vld [vmem:[%s5250_s0 + $0x178] sm:$0xff]  ;;  %v326_v3 = vld [vmem:[%s5250_s0 + $0x180] sm:$0xff] }
  0x18   : > { %1009 = vmatpush.bf16.msra.mxu3 %v471_v48  ;;  %v379_v63 = vld [vmem:[%s5251_s1 + $0x168] sm:$0xff]  ;;  %v381_v1 = vld [vmem:[%s5251_s1 + $0x178] sm:$0xff]  ;;  %v328_v4 = vld [vmem:[%s5250_s0 + $0x190] sm:$0xff] }
  0x19   : > { %v456_v0 = vpack.c.bf16 %v412_v54, %v410_v53  ;;  %v435_v2 = vadd.f32 %v379_v63, %v323_v61  ;;  %780 = vmatpush.bf16.msra.mxu1 %v472_v58  ;;  %v457_v5 = vpack.c.bf16 %v413_v60, %v411_v59  ;;  %v437_v6 = vadd.f32 %v381_v1, %v325_v62  ;;  %v382_v7 = vld [vmem:[%s5251_s1 + $0x180] sm:$0xff]  ;;  %v384_v8 = vld [vmem:[%s5251_s1 + $0x190] sm:$0xff]  ;;  %v295_v18 = vld [vmem:[%s5250_s0 + $0x88] sm:$0xff] }
  0x1a   : > { %v294_v9 = vld [vmem:[%s5250_s0 + $0x80] sm:$0xff]  ;;  %v438_v10 = vadd.f32 %v382_v7, %v326_v3  ;;  %v440_v11 = vadd.f32 %v384_v8, %v328_v4  ;;  %v296_v12 = vld [vmem:[%s5250_s0 + $0x90] sm:$0xff]  ;;  %v297_v19 = vld [vmem:[%s5250_s0 + $0x98] sm:$0xff] }
  0x1b   : > { %666 = vmatpush.bf16.msra.mxu0 %v456_v0  ;;  %v350_v13 = vld [vmem:[%s5251_s1 + $0x80] sm:$0xff]  ;;  %v352_v14 = vld [vmem:[%s5251_s1 + $0x90] sm:$0xff]  ;;  %894 = vmatpush.bf16.msra.mxu2 %v457_v5  ;;  %v469_v15 = vpack.c.bf16 %v437_v6, %v435_v2  ;;  %v351_v20 = vld [vmem:[%s5251_s1 + $0x88] sm:$0xff] }
  0x1c   : > { %v406_v16 = vadd.f32 %v350_v13, %v294_v9  ;;  %v408_v17 = vadd.f32 %v352_v14, %v296_v12  ;;  %v470_v21 = vpack.c.bf16 %v440_v11, %v438_v10  ;;  %v353_v22 = vld [vmem:[%s5251_s1 + $0x98] sm:$0xff]  ;;  %v407_v23 = vadd.f32 %v351_v20, %v295_v18  ;;  %v319_v24 = vld [vmem:[%s5250_s0 + $0x148] sm:$0xff]  ;;  %v322_v30 = vld [vmem:[%s5250_s0 + $0x160] sm:$0xff] }
  0x1d   : > { %v321_v25 = vld [vmem:[%s5250_s0 + $0x158] sm:$0xff]  ;;  %1010 = vmatpush.bf16.msra.mxu3 %v469_v15  ;;  %v409_v27 = vadd.f32 %v353_v22, %v297_v19  ;;  %v375_v28 = vld [vmem:[%s5251_s1 + $0x148] sm:$0xff]  ;;  %v324_v33 = vld [vmem:[%s5250_s0 + $0x170] sm:$0xff] }
  0x1e   : > { %v454_v26 = vpack.c.bf16 %v408_v17, %v406_v16  ;;  %v377_v29 = vld [vmem:[%s5251_s1 + $0x158] sm:$0xff]  ;;  %781 = vmatpush.bf16.msra.mxu1 %v470_v21  ;;  %v431_v31 = vadd.f32 %v375_v28, %v319_v24  ;;  %v378_v34 = vld [vmem:[%s5251_s1 + $0x160] sm:$0xff]  ;;  %v380_v35 = vld [vmem:[%s5251_s1 + $0x170] sm:$0xff] }
  0x1f   : > { %v433_v32 = vadd.f32 %v377_v29, %v321_v25  ;;  %v455_v36 = vpack.c.bf16 %v409_v27, %v407_v23  ;;  %v434_v37 = vadd.f32 %v378_v34, %v322_v30  ;;  %v436_v38 = vadd.f32 %v380_v35, %v324_v33  ;;  %v290_v39 = vld [vmem:[%s5250_s0 + $0x60] sm:$0xff]  ;;  %v292_v40 = vld [vmem:[%s5250_s0 + $0x70] sm:$0xff]  ;;  %v291_v45 = vld [vmem:[%s5250_s0 + $0x68] sm:$0xff] }
  0x20   : > { %667 = vmatpush.bf16.msra.mxu0 %v454_v26  ;;  %v346_v41 = vld [vmem:[%s5251_s1 + $0x60] sm:$0xff]  ;;  %v348_v43 = vld [vmem:[%s5251_s1 + $0x70] sm:$0xff]  ;;  %v293_v46 = vld [vmem:[%s5250_s0 + $0x78] sm:$0xff] }
  0x21   : > { %v467_v42 = vpack.c.bf16 %v433_v32, %v431_v31  ;;  %v402_v44 = vadd.f32 %v346_v41, %v290_v39  ;;  %895 = vmatpush.bf16.msra.mxu2 %v455_v36  ;;  %v468_v47 = vpack.c.bf16 %v436_v38, %v434_v37  ;;  %v404_v48 = vadd.f32 %v348_v43, %v292_v40  ;;  %v347_v49 = vld [vmem:[%s5251_s1 + $0x68] sm:$0xff]  ;;  %v349_v50 = vld [vmem:[%s5251_s1 + $0x78] sm:$0xff]  ;;  %v318_v60 = vld [vmem:[%s5250_s0 + $0x140] sm:$0xff] }
  0x22   : > { %v315_v51 = vld [vmem:[%s5250_s0 + $0x128] sm:$0xff]  ;;  %v403_v52 = vadd.f32 %v347_v49, %v291_v45  ;;  %v405_v53 = vadd.f32 %v349_v50, %v293_v46  ;;  %v317_v54 = vld [vmem:[%s5250_s0 + $0x138] sm:$0xff]  ;;  %v320_v61 = vld [vmem:[%s5250_s0 + $0x150] sm:$0xff] }
  0x23   : > { %1011 = vmatpush.bf16.msra.mxu3 %v467_v42  ;;  %v371_v55 = vld [vmem:[%s5251_s1 + $0x128] sm:$0xff]  ;;  %v373_v56 = vld [vmem:[%s5251_s1 + $0x138] sm:$0xff]  ;;  %782 = vmatpush.bf16.msra.mxu1 %v468_v47  ;;  %v452_v57 = vpack.c.bf16 %v404_v48, %v402_v44  ;;  %v374_v62 = vld [vmem:[%s5251_s1 + $0x140] sm:$0xff] }
  0x24   : > { %v427_v58 = vadd.f32 %v371_v55, %v315_v51  ;;  %v429_v59 = vadd.f32 %v373_v56, %v317_v54  ;;  %v453_v63 = vpack.c.bf16 %v405_v53, %v403_v52  ;;  %v376_v0 = vld [vmem:[%s5251_s1 + $0x150] sm:$0xff]  ;;  %v430_v1 = vadd.f32 %v374_v62, %v318_v60  ;;  %v286_v2 = vld [vmem:[%s5250_s0 + $0x40] sm:$0xff]  ;;  %v287_v8 = vld [vmem:[%s5250_s0 + $0x48] sm:$0xff] }
  0x25   : > { %v288_v3 = vld [vmem:[%s5250_s0 + $0x50] sm:$0xff]  ;;  %668 = vmatpush.bf16.msra.mxu0 %v452_v57  ;;  %v432_v5 = vadd.f32 %v376_v0, %v320_v61  ;;  %v342_v6 = vld [vmem:[%s5251_s1 + $0x40] sm:$0xff]  ;;  %v289_v11 = vld [vmem:[%s5250_s0 + $0x58] sm:$0xff] }
  0x26   : > { %v465_v4 = vpack.c.bf16 %v429_v59, %v427_v58  ;;  %v344_v7 = vld [vmem:[%s5251_s1 + $0x50] sm:$0xff]  ;;  %896 = vmatpush.bf16.msra.mxu2 %v453_v63  ;;  %v398_v9 = vadd.f32 %v342_v6, %v286_v2  ;;  %v343_v12 = vld [vmem:[%s5251_s1 + $0x48] sm:$0xff]  ;;  %v345_v13 = vld [vmem:[%s5251_s1 + $0x58] sm:$0xff] }
  0x27   : > { %v400_v10 = vadd.f32 %v344_v7, %v288_v3  ;;  %v466_v14 = vpack.c.bf16 %v432_v5, %v430_v1  ;;  %v399_v15 = vadd.f32 %v343_v12, %v287_v8  ;;  %v401_v16 = vadd.f32 %v345_v13, %v289_v11  ;;  %v311_v17 = vld [vmem:[%s5250_s0 + $0x108] sm:$0xff]  ;;  %v313_v18 = vld [vmem:[%s5250_s0 + $0x118] sm:$0xff]  ;;  %v314_v23 = vld [vmem:[%s5250_s0 + $0x120] sm:$0xff] }
  0x28   : > { %1012 = vmatpush.bf16.msra.mxu3 %v465_v4  ;;  %v367_v19 = vld [vmem:[%s5251_s1 + $0x108] sm:$0xff]  ;;  %v369_v21 = vld [vmem:[%s5251_s1 + $0x118] sm:$0xff]  ;;  %v316_v24 = vld [vmem:[%s5250_s0 + $0x130] sm:$0xff] }
  0x29   : > { %v450_v20 = vpack.c.bf16 %v400_v10, %v398_v9  ;;  %v423_v22 = vadd.f32 %v367_v19, %v311_v17  ;;  %783 = vmatpush.bf16.msra.mxu1 %v466_v14  ;;  %v451_v25 = vpack.c.bf16 %v401_v16, %v399_v15  ;;  %v425_v26 = vadd.f32 %v369_v21, %v313_v18  ;;  %v370_v27 = vld [vmem:[%s5251_s1 + $0x120] sm:$0xff]  ;;  %v372_v28 = vld [vmem:[%s5251_s1 + $0x130] sm:$0xff]  ;;  %v475_v29 = vld [vmem:[%s3603_s6 + $0x8] sm:$0xff] }
  0x2a   : > { %v426_v30 = vadd.f32 %v370_v27, %v314_v23  ;;  %v428_v31 = vadd.f32 %v372_v28, %v316_v24  ;;  %v477_v32 = vld [vmem:[%s3603_s6 + $0x18] sm:$0xff]  ;;  %v282_v33 = vld [vmem:[%s5250_s0 + $0x20] sm:$0xff]  ;;  %v284_v34 = vld [vmem:[%s5250_s0 + $0x30] sm:$0xff] }
  0x2b   : > { %669 = vmatpush.bf16.msra.mxu0 %v450_v20  ;;  %897 = vmatpush.bf16.msra.mxu2 %v451_v25  ;;  %v463_v35 = vpack.c.bf16 %v425_v26, %v423_v22  ;;  %v338_v36 = vld [vmem:[%s5251_s1 + $0x20] sm:$0xff]  ;;  %v340_v37 = vld [vmem:[%s5251_s1 + $0x30] sm:$0xff]  ;;  %v283_v38 = vld [vmem:[%s5250_s0 + $0x28] sm:$0xff]  ;;  %v559_v40 = vpack.c.bf16 %v477_v32, %v475_v29 }
  0x2c   : > { %v464_v39 = vpack.c.bf16 %v428_v31, %v426_v30  ;;  %v394_v41 = vadd.f32 %v338_v36, %v282_v33  ;;  %v396_v42 = vadd.f32 %v340_v37, %v284_v34  ;;  %v285_v43 = vld [vmem:[%s5250_s0 + $0x38] sm:$0xff]  ;;  %v339_v44 = vld [vmem:[%s5251_s1 + $0x28] sm:$0xff]  ;;  %v310_v48 = vld [vmem:[%s5250_s0 + $0x100] sm:$0xff] }
  0x2d   : > { %v341_v45 = vld [vmem:[%s5251_s1 + $0x38] sm:$0xff]  ;;  %1013 = vmatpush.bf16.msra.mxu3 %v463_v35  ;;  %v395_v46 = vadd.f32 %v339_v44, %v283_v38  ;;  %v312_v49 = vld [vmem:[%s5250_s0 + $0x110] sm:$0xff]  ;;  %v366_v50 = vld [vmem:[%s5251_s1 + $0x100] sm:$0xff] }
  0x2e   : > { %v397_v47 = vadd.f32 %v341_v45, %v285_v43  ;;  %784 = vmatpush.bf16.msra.mxu1 %v464_v39  ;;  %v448_v51 = vpack.c.bf16 %v396_v42, %v394_v41  ;;  %v368_v52 = vld [vmem:[%s5251_s1 + $0x110] sm:$0xff]  ;;  %v422_v53 = vadd.f32 %v366_v50, %v310_v48  ;;  %v278_v54 = vld [vmem:[%s5250_s0] sm:$0xff]  ;;  %v279_v60 = vld [vmem:[%s5250_s0 + $0x8] sm:$0xff] }
  0x2f   : > { %v280_v55 = vld [vmem:[%s5250_s0 + $0x10] sm:$0xff]  ;;  %v424_v57 = vadd.f32 %v368_v52, %v312_v49  ;;  %v334_v58 = vld [vmem:[%s5251_s1] sm:$0xff]  ;;  %v281_v63 = vld [vmem:[%s5250_s0 + $0x18] sm:$0xff] }
  0x30   : > { %v449_v56 = vpack.c.bf16 %v397_v47, %v395_v46  ;;  %v336_v59 = vld [vmem:[%s5251_s1 + $0x10] sm:$0xff]  ;;  %3167 = vmatmul.msk.bf16.vlgmr.msra.gmra.mxu3 %vm600_vm0, %v559_v40  ;;  %670 = vmatpush.bf16.msra.mxu0 %v448_v51  ;;  %v390_v61 = vadd.f32 %v334_v58, %v278_v54  ;;  %v335_v0 = vld [vmem:[%s5251_s1 + $0x8] sm:$0xff]  ;;  %v337_v1 = vld [vmem:[%s5251_s1 + $0x18] sm:$0xff] }
  0x31   : > { %v392_v62 = vadd.f32 %v336_v59, %v280_v55  ;;  %v462_v2 = vpack.c.bf16 %v424_v57, %v422_v53  ;;  %v391_v3 = vadd.f32 %v335_v0, %v279_v60  ;;  %v393_v4 = vadd.f32 %v337_v1, %v281_v63  ;;  %v474_v5 = vld [vmem:[%s3603_s6] sm:$0xff]  ;;  %v476_v6 = vld [vmem:[%s3603_s6 + $0x10] sm:$0xff]  ;;  %v479_v10 = vld [vmem:[%s3603_s6 + $0x28] sm:$0xff] }
  0x32   : > { %898 = vmatpush.bf16.msra.mxu2 %v449_v56  ;;  %v558_v9 = vpack.c.bf16 %v476_v6, %v474_v5  ;;  %v481_v11 = vld [vmem:[%s3603_s6 + $0x38] sm:$0xff]  ;;  %v478_v13 = vld [vmem:[%s3603_s6 + $0x20] sm:$0xff]  ;;  %v480_v14 = vld [vmem:[%s3603_s6 + $0x30] sm:$0xff] }
  0x33   : > { %v446_v7 = vpack.c.bf16 %v392_v62, %v390_v61  ;;  %785 = vmatpush.bf16.msra.mxu1 %v462_v2  ;;  %v447_v8 = vpack.c.bf16 %v393_v4, %v391_v3  ;;  %v561_v12 = vpack.c.bf16 %v481_v11, %v479_v10  ;;  %v560_v15 = vpack.c.bf16 %v480_v14, %v478_v13  ;;  %v483_v16 = vld [vmem:[%s3603_s6 + $0x48] sm:$0xff]  ;;  %v485_v17 = vld [vmem:[%s3603_s6 + $0x58] sm:$0xff]  ;;  %v482_v19 = vld [vmem:[%s3603_s6 + $0x40] sm:$0xff] }
  0x34   : > { %v563_v18 = vpack.c.bf16 %v485_v17, %v483_v16  ;;  %v484_v20 = vld [vmem:[%s3603_s6 + $0x50] sm:$0xff]  ;;  %v487_v22 = vld [vmem:[%s3603_s6 + $0x68] sm:$0xff]  ;;  %v489_v23 = vld [vmem:[%s3603_s6 + $0x78] sm:$0xff] }
  0x35   : > { %671 = vmatpush.bf16.msra.mxu0 %v446_v7  ;;  %v562_v21 = vpack.c.bf16 %v484_v20, %v482_v19  ;;  %v565_v24 = vpack.c.bf16 %v489_v23, %v487_v22  ;;  %v486_v25 = vld [vmem:[%s3603_s6 + $0x60] sm:$0xff]  ;;  %v488_v26 = vld [vmem:[%s3603_s6 + $0x70] sm:$0xff]  ;;  %v491_v28 = vld [vmem:[%s3603_s6 + $0x88] sm:$0xff] }
  0x36   : > { %899 = vmatpush.bf16.msra.mxu2 %v447_v8  ;;  %3146 = vmatmul.msk.bf16.vlgmr.msra.gmra.mxu1 %vm600_vm0, %v559_v40  ;;  %v564_v27 = vpack.c.bf16 %v488_v26, %v486_v25  ;;  %v493_v29 = vld [vmem:[%s3603_s6 + $0x98] sm:$0xff]  ;;  %v490_v31 = vld [vmem:[%s3603_s6 + $0x80] sm:$0xff]  ;;  %v492_v32 = vld [vmem:[%s3603_s6 + $0x90] sm:$0xff] }
  0x37   : > { %v567_v30 = vpack.c.bf16 %v493_v29, %v491_v28  ;;  %v566_v33 = vpack.c.bf16 %v492_v32, %v490_v31  ;;  %v495_v34 = vld [vmem:[%s3603_s6 + $0xa8] sm:$0xff]  ;;  %v497_v35 = vld [vmem:[%s3603_s6 + $0xb8] sm:$0xff]  ;;  %v494_v37 = vld [vmem:[%s3603_s6 + $0xa0] sm:$0xff] }
  0x38   : > { %672 = vmatmul.bf16.vlgmr.msra.gmra.mxu0 %v558_v9  ;;  %v569_v36 = vpack.c.bf16 %v497_v35, %v495_v34  ;;  %v496_v38 = vld [vmem:[%s3603_s6 + $0xb0] sm:$0xff]  ;;  %v499_v40 = vld [vmem:[%s3603_s6 + $0xc8] sm:$0xff]  ;;  %v501_v41 = vld [vmem:[%s3603_s6 + $0xd8] sm:$0xff] }
  0x39   : > { %900 = vmatmul.bf16.vlgmr.msra.gmra.mxu2 %v558_v9  ;;  %v568_v39 = vpack.c.bf16 %v496_v38, %v494_v37  ;;  %v571_v42 = vpack.c.bf16 %v501_v41, %v499_v40  ;;  %v498_v43 = vld [vmem:[%s3603_s6 + $0xc0] sm:$0xff]  ;;  %v500_v44 = vld [vmem:[%s3603_s6 + $0xd0] sm:$0xff]  ;;  %v503_v46 = vld [vmem:[%s3603_s6 + $0xe8] sm:$0xff] }
  0x3a   : > { %v570_v45 = vpack.c.bf16 %v500_v44, %v498_v43  ;;  %v505_v47 = vld [vmem:[%s3603_s6 + $0xf8] sm:$0xff]  ;;  %v502_v49 = vld [vmem:[%s3603_s6 + $0xe0] sm:$0xff]  ;;  %v504_v50 = vld [vmem:[%s3603_s6 + $0xf0] sm:$0xff] }
  0x3b   : > { %v573_v48 = vpack.c.bf16 %v505_v47, %v503_v46  ;;  %v572_v51 = vpack.c.bf16 %v504_v50, %v502_v49  ;;  %v507_v52 = vld [vmem:[%s3603_s6 + $0x108] sm:$0xff]  ;;  %v509_v53 = vld [vmem:[%s3603_s6 + $0x118] sm:$0xff]  ;;  %v506_v55 = vld [vmem:[%s3603_s6 + $0x100] sm:$0xff] }
  0x3c   : > { %v575_v54 = vpack.c.bf16 %v509_v53, %v507_v52  ;;  %v508_v56 = vld [vmem:[%s3603_s6 + $0x110] sm:$0xff]  ;;  %v511_v61 = vld [vmem:[%s3603_s6 + $0x128] sm:$0xff]  ;;  %v513_v62 = vld [vmem:[%s3603_s6 + $0x138] sm:$0xff] }
  0x3d   : > { %v574_v59 = vpack.c.bf16 %v508_v56, %v506_v55  ;;  %v577_v5 = vpack.c.bf16 %v513_v62, %v511_v61  ;;  %v510_v8 = vld [vmem:[%s3603_s6 + $0x120] sm:$0xff]  ;;  %v512_v9 = vld [vmem:[%s3603_s6 + $0x130] sm:$0xff]  ;;  %v515_v26 = vld [vmem:[%s3603_s6 + $0x148] sm:$0xff] }
  0x3e   : > { %v576_v14 = vpack.c.bf16 %v512_v9, %v510_v8  ;;  %v514_v40 = vld [vmem:[%s3603_s6 + $0x140] sm:$0xff]  ;;  %v516_v41 = vld [vmem:[%s3603_s6 + $0x150] sm:$0xff] }
  0x3f   : > { %v578_v47 = vpack.c.bf16 %v516_v41, %v514_v40 }
  0x40   : > { %3168 = vmatmul.msk.bf16.gmra.mxu3 %vm600_vm0, %v561_v12 }
  0x46   : > { %3147 = vmatmul.msk.bf16.gmra.mxu1 %vm600_vm0, %v561_v12 }
  0x48   : > { %677 = vmatmul.bf16.gmra.mxu0 %v560_v15 }
  0x49   : > { %905 = vmatmul.bf16.gmra.mxu2 %v560_v15 }
  0x50   : > { %3169 = vmatmul.msk.bf16.gmra.mxu3 %vm600_vm0, %v563_v18 }
  0x56   : > { %3148 = vmatmul.msk.bf16.gmra.mxu1 %vm600_vm0, %v563_v18 }
  0x58   : > { %682 = vmatmul.bf16.gmra.mxu0 %v562_v21 }
  0x59   : > { %910 = vmatmul.bf16.gmra.mxu2 %v562_v21 }
  0x60   : > { %3170 = vmatmul.msk.bf16.gmra.mxu3 %vm600_vm0, %v565_v24 }
  0x66   : > { %3149 = vmatmul.msk.bf16.gmra.mxu1 %vm600_vm0, %v565_v24 }
  0x68   : > { %687 = vmatmul.bf16.gmra.mxu0 %v564_v27 }
  0x69   : > { %915 = vmatmul.bf16.gmra.mxu2 %v564_v27  ;;  %v517_v27 = vld [vmem:[%s3603_s6 + $0x158] sm:$0xff] }
  0x70   : > { %3171 = vmatmul.msk.bf16.gmra.mxu3 %vm600_vm0, %v567_v30 }
  0x76   : > { %3150 = vmatmul.msk.bf16.gmra.mxu1 %vm600_vm0, %v567_v30 }
  0x78   : > { %692 = vmatmul.bf16.gmra.mxu0 %v566_v33 }
  0x79   : > { %920 = vmatmul.bf16.gmra.mxu2 %v566_v33  ;;  %v579_v33 = vpack.c.bf16 %v517_v27, %v515_v26 }
  0x80   : > { %3172 = vmatmul.msk.bf16.gmra.mxu3 %vm600_vm0, %v569_v36 }
  0x86   : > { %3151 = vmatmul.msk.bf16.gmra.mxu1 %vm600_vm0, %v569_v36 }
  0x88   : > { %697 = vmatmul.bf16.gmra.mxu0 %v568_v39 }
  0x89   : > { %925 = vmatmul.bf16.gmra.mxu2 %v568_v39 }
  0x90   : > { %3173 = vmatmul.msk.bf16.gmra.mxu3 %vm600_vm0, %v571_v42 }
  0x96   : > { %3152 = vmatmul.msk.bf16.gmra.mxu1 %vm600_vm0, %v571_v42 }
  0x98   : > { %702 = vmatmul.bf16.gmra.mxu0 %v570_v45 }
  0x99   : > { %930 = vmatmul.bf16.gmra.mxu2 %v570_v45 }
  0xa0   : > { %3174 = vmatmul.msk.bf16.gmra.mxu3 %vm600_vm0, %v573_v48 }
  0xa6   : > { %3153 = vmatmul.msk.bf16.gmra.mxu1 %vm600_vm0, %v573_v48 }
  0xa8   : > { %707 = vmatmul.bf16.gmra.mxu0 %v572_v51 }
  0xa9   : > { %935 = vmatmul.bf16.gmra.mxu2 %v572_v51 }
  0xb0   : > { %3175 = vmatmul.msk.bf16.gmra.mxu3 %vm600_vm0, %v575_v54 }
  0xb3   : > { %v1015_v57 = vpop.f32.mrf.mxu3  ;;  %v787_v58 = vpop.f32.mrf.mxu1 }
  0xb5   : > { %v673_v60 = vpop.f32.mrf.mxu0 }
  0xb6   : > { %3154 = vmatmul.msk.bf16.gmra.mxu1 %vm600_vm0, %v575_v54  ;;  %v3745_v63 = vadd.f32 %v787_v58, %v673_v60 }
  0xb8   : > { %712 = vmatmul.bf16.gmra.mxu0 %v574_v59  ;;  %v1289_v15 = vmul.f32 %v3745_v63, %v3745_v63 }
  0xb9   : > { %940 = vmatmul.bf16.gmra.mxu2 %v574_v59 }
  0xbb   : > { %v1017_v1 = vpop.f32.mrf.mxu3  ;;  %v789_v3 = vpop.f32.mrf.mxu1 }
  0xbc   : > { %v901_v0 = vpop.f32.mrf.mxu2 }
  0xbd   : > { %v3747_v2 = vadd.f32 %v1015_v57, %v901_v0  ;;  %v675_v4 = vpop.f32.mrf.mxu0 }
  0xbe   : > { %v3757_v11 = vadd.f32 %v789_v3, %v675_v4 }
  0xbf   : > { %v1121_v6 = vsel %vm1120_vm1, %v3747_v2, 0.0  ;;  %v1290_v10 = vmul.f32 %v3747_v2, %v3747_v2 }
  0xc0   : > { %v1122_v7 = vadd.f32 %v1121_v6, %v3745_v63  ;;  %3176 = vmatmul.msk.bf16.gmra.mxu3 %vm600_vm0, %v577_v5  ;;  %v1291_v22 = vmul.f32 %v3757_v11, %v3757_v11 }
  0xc1   : > { %v1373_v19 = vsel %vm1120_vm1, %v1290_v10, 0.0 }
  0xc2   : > { %1123 = vadd.xlane.f32.xlu0 %v1122_v7  ;;  %v1374_v21 = vadd.f32 %v1373_v19, %v1289_v15 }
  0xc3   : > { %v1020_v13 = vpop.f32.mrf.mxu3  ;;  %v792_v17 = vpop.f32.mrf.mxu1 }
  0xc4   : > { %v903_v12 = vpop.f32.mrf.mxu2 }
  0xc5   : > { %v3761_v16 = vadd.f32 %v1017_v1, %v903_v12  ;;  %v678_v18 = vpop.f32.mrf.mxu0 }
  0xc6   : > { %3155 = vmatmul.msk.bf16.gmra.mxu1 %vm600_vm0, %v577_v5  ;;  %v3770_v24 = vadd.f32 %v792_v17, %v678_v18 }
  0xc7   : > { %v1292_v20 = vmul.f32 %v3761_v16, %v3761_v16  ;;  %v1125_v34 = vsel %vm1120_vm1, %v3761_v16, 0.0 }
  0xc8   : > { %717 = vmatmul.bf16.gmra.mxu0 %v576_v14  ;;  %v1293_v35 = vmul.f32 %v3770_v24, %v3770_v24  ;;  %v1126_v38 = vadd.f32 %v1125_v34, %v3757_v11 }
  0xc9   : > { %945 = vmatmul.bf16.gmra.mxu2 %v576_v14  ;;  %v1377_v23 = vsel %vm1120_vm1, %v1292_v20, 0.0 }
  0xca   : > { %1375 = vadd.xlane.f32.xlu0 %v1374_v21  ;;  %v1378_v25 = vadd.f32 %v1377_v23, %v1291_v22 }
  0xcb   : > { %v1022_v29 = vpop.f32.mrf.mxu3  ;;  %v794_v31 = vpop.f32.mrf.mxu1 }
  0xcc   : > { %v906_v28 = vpop.f32.mrf.mxu2  ;;  %1379 = vadd.xlane.f32.xlu1 %v1378_v25 }
  0xcd   : > { %v3774_v30 = vadd.f32 %v1020_v13, %v906_v28  ;;  %v680_v32 = vpop.f32.mrf.mxu0 }
  0xce   : > { %v3790_v44 = vadd.f32 %v794_v31, %v680_v32 }
  0xcf   : > { %v1294_v36 = vmul.f32 %v3774_v30, %v3774_v30  ;;  %v1129_v37 = vsel %vm1120_vm1, %v3774_v30, 0.0 }
  0xd0   : > { %3177 = vmatmul.msk.bf16.gmra.mxu3 %vm600_vm0, %v579_v33  ;;  %v1130_v43 = vadd.f32 %v1129_v37, %v3770_v24  ;;  %v1295_v53 = vmul.f32 %v3790_v44, %v3790_v44 }
  0xd1   : > { %v1381_v39 = vsel %vm1120_vm1, %v1294_v36, 0.0 }
  0xd2   : > { %1127 = vadd.xlane.f32.xlu0 %v1126_v38  ;;  %v1382_v42 = vadd.f32 %v1381_v39, %v1293_v35 }
  0xd3   : > { %v1025_v46 = vpop.f32.mrf.mxu3  ;;  %v797_v49 = vpop.f32.mrf.mxu1 }
  0xd4   : > { %v908_v45 = vpop.f32.mrf.mxu2  ;;  %1383 = vadd.xlane.f32.xlu2 %v1382_v42  ;;  %1131 = vadd.xlane.f32.xlu1 %v1130_v43 }
  0xd5   : > { %v3792_v48 = vadd.f32 %v1022_v29, %v908_v45  ;;  %v683_v50 = vpop.f32.mrf.mxu0 }
  0xd6   : > { %3156 = vmatmul.msk.bf16.gmra.mxu1 %vm600_vm0, %v579_v33  ;;  %v3802_v55 = vadd.f32 %v797_v49, %v683_v50 }
  0xd7   : > { %v1296_v51 = vmul.f32 %v3792_v48, %v3792_v48  ;;  %v1133_v52 = vsel %vm1120_vm1, %v3792_v48, 0.0 }
  0xd8   : > { %722 = vmatmul.bf16.gmra.mxu0 %v578_v47  ;;  %v1134_v57 = vadd.f32 %v1133_v52, %v3790_v44  ;;  %v1297_v0 = vmul.f32 %v3802_v55, %v3802_v55 }
  0xd9   : > { %950 = vmatmul.bf16.gmra.mxu2 %v578_v47  ;;  %v1385_v54 = vsel %vm1120_vm1, %v1296_v51, 0.0 }
  0xda   : > { %v1386_v56 = vadd.f32 %v1385_v54, %v1295_v53 }
  0xdb   : > { %v1027_v59 = vpop.f32.mrf.mxu3  ;;  %v799_v61 = vpop.f32.mrf.mxu1 }
  0xdc   : > { %v911_v58 = vpop.f32.mrf.mxu2  ;;  %1387 = vadd.xlane.f32.xlu0 %v1386_v56  ;;  %1135 = vadd.xlane.f32.xlu1 %v1134_v57 }
  0xdd   : > { %v3805_v60 = vadd.f32 %v1025_v46, %v911_v58  ;;  %v685_v62 = vpop.f32.mrf.mxu0 }
  0xde   : > { %v3817_v13 = vadd.f32 %v799_v61, %v685_v62 }
  0xdf   : > { %v1137_v1 = vsel %vm1120_vm1, %v3805_v60, 0.0  ;;  %v1298_v3 = vmul.f32 %v3805_v60, %v3805_v60 }
  0xe0   : > { %v1138_v4 = vadd.f32 %v1137_v1, %v3802_v55  ;;  %v1299_v26 = vmul.f32 %v3817_v13, %v3817_v13 }
  0xe1   : > { %v1389_v5 = vsel %vm1120_vm1, %v1298_v3, 0.0 }
  0xe2   : > { %1139 = vadd.xlane.f32.xlu2 %v1138_v4  ;;  %v1390_v6 = vadd.f32 %v1389_v5, %v1297_v0 }
  0xe3   : > { %v1030_v8 = vpop.f32.mrf.mxu3  ;;  %v802_v10 = vpop.f32.mrf.mxu1 }
  0xe4   : > { %v913_v7 = vpop.f32.mrf.mxu2  ;;  %1391 = vadd.xlane.f32.xlu1 %v1390_v6 }
  0xe5   : > { %v3815_v9 = vadd.f32 %v1027_v59, %v913_v7  ;;  %v688_v12 = vpop.f32.mrf.mxu0 }
  0xe6   : > { %v3824_v18 = vadd.f32 %v802_v10, %v688_v12 }
  0xe7   : > { %v1141_v14 = vsel %vm1120_vm1, %v3815_v9, 0.0  ;;  %v1300_v17 = vmul.f32 %v3815_v9, %v3815_v9 }
  0xe8   : > { %v1142_v15 = vadd.f32 %v1141_v14, %v3817_v13  ;;  %v1301_v34 = vmul.f32 %v3824_v18, %v3824_v18 }
  0xe9   : > { %v1393_v25 = vsel %vm1120_vm1, %v1300_v17, 0.0 }
  0xea   : > { %1143 = vadd.xlane.f32.xlu2 %v1142_v15  ;;  %v1394_v28 = vadd.f32 %v1393_v25, %v1299_v26 }
  0xeb   : > { %v1032_v20 = vpop.f32.mrf.mxu3  ;;  %v804_v22 = vpop.f32.mrf.mxu1 }
  0xec   : > { %v916_v19 = vpop.f32.mrf.mxu2 }
  0xed   : > { %v3826_v21 = vadd.f32 %v1030_v8, %v916_v19  ;;  %v690_v23 = vpop.f32.mrf.mxu0 }
  0xee   : > { %v3841_v39 = vadd.f32 %v804_v22, %v690_v23 }
  0xef   : > { %5301 = vst [vmem:[#allocation2_spill] sm:$0xff] %v3826_v21  ;;  %v1145_v27 = vsel %vm1120_vm1, %v3826_v21, 0.0  ;;  %v1302_v31 = vmul.f32 %v3826_v21, %v3826_v21 }
  0xf0   : > { %v1146_v29 = vadd.f32 %v1145_v27, %v3824_v18  ;;  %v1303_v53 = vmul.f32 %v3841_v39, %v3841_v39 }
  0xf1   : > { %v1397_v38 = vsel %vm1120_vm1, %v1302_v31, 0.0 }
  0xf2   : > { %1395 = vadd.xlane.f32.xlu2 %v1394_v28  ;;  %1147 = vadd.xlane.f32.xlu0 %v1146_v29  ;;  %v1398_v41 = vadd.f32 %v1397_v38, %v1301_v34 }
  0xf3   : > { %v1035_v33 = vpop.f32.mrf.mxu3  ;;  %v807_v36 = vpop.f32.mrf.mxu1 }
  0xf4   : > { %v918_v32 = vpop.f32.mrf.mxu2 }
  0xf5   : > { %v3838_v35 = vadd.f32 %v1032_v20, %v918_v32  ;;  %v693_v37 = vpop.f32.mrf.mxu0 }
  0xf6   : > { %v3848_v45 = vadd.f32 %v807_v36, %v693_v37 }
  0xf7   : > { %v1149_v40 = vsel %vm1120_vm1, %v3838_v35, 0.0  ;;  %v1304_v43 = vmul.f32 %v3838_v35, %v3838_v35 }
  0xf8   : > { %v1150_v42 = vadd.f32 %v1149_v40, %v3841_v39  ;;  %5302 = vst [vmem:[#allocation3_spill] sm:$0xff] %v3848_v45  ;;  %v1305_v62 = vmul.f32 %v3848_v45, %v3848_v45 }
  0xf9   : > { %v1401_v52 = vsel %vm1120_vm1, %v1304_v43, 0.0 }
  0xfa   : > { %1399 = vadd.xlane.f32.xlu0 %v1398_v41  ;;  %1151 = vadd.xlane.f32.xlu1 %v1150_v42  ;;  %v1402_v56 = vadd.f32 %v1401_v52, %v1303_v53 }
  0xfb   : > { %v1037_v47 = vpop.f32.mrf.mxu3  ;;  %v809_v50 = vpop.f32.mrf.mxu1 }
  0xfc   : > { %v921_v46 = vpop.f32.mrf.mxu2 }
  0xfd   : > { %v3850_v49 = vadd.f32 %v1035_v33, %v921_v46  ;;  %v695_v51 = vpop.f32.mrf.mxu0 }
  0xfe   : > { %v3865_v5 = vadd.f32 %v809_v50, %v695_v51 }
  0xff   : > { %5303 = vst [vmem:[#allocation4_spill] sm:$0xff] %v3850_v49  ;;  %v1153_v54 = vsel %vm1120_vm1, %v3850_v49, 0.0  ;;  %v1306_v58 = vmul.f32 %v3850_v49, %v3850_v49 }
 0x100   : > { %v1154_v57 = vadd.f32 %v1153_v54, %v3848_v45  ;;  %5305 = vst [vmem:[#allocation6_spill] sm:$0xff] %v3865_v5  ;;  %v1307_v23 = vmul.f32 %v3865_v5, %v3865_v5 }
 0x101   : > { %v1405_v4 = vsel %vm1120_vm1, %v1306_v58, 0.0 }
 0x102   : > { %1403 = vadd.xlane.f32.xlu1 %v1402_v56  ;;  %1155 = vadd.xlane.f32.xlu2 %v1154_v57  ;;  %v1406_v7 = vadd.f32 %v1405_v4, %v1305_v62 }
 0x103   : > { %v1040_v61 = vpop.f32.mrf.mxu3  ;;  %v812_v1 = vpop.f32.mrf.mxu1 }
 0x104   : > { %v923_v59 = vpop.f32.mrf.mxu2 }
 0x105   : > { %v3862_v0 = vadd.f32 %v1037_v47, %v923_v59  ;;  %v698_v3 = vpop.f32.mrf.mxu0 }
 0x106   : > { %v3872_v12 = vadd.f32 %v812_v1, %v698_v3 }
 0x107   : > { %5304 = vst [vmem:[#allocation5_spill] sm:$0xff] %v3862_v0  ;;  %v1157_v6 = vsel %vm1120_vm1, %v3862_v0, 0.0  ;;  %v1308_v10 = vmul.f32 %v3862_v0, %v3862_v0  ;;  %v528_v0 = vld [vmem:[%s3603_s6 + $0x1b0] sm:$0xff] }
 0x108   : > { %v1158_v8 = vadd.f32 %v1157_v6, %v3865_v5  ;;  %5306 = vst [vmem:[#allocation7_spill] sm:$0xff] %v3872_v12  ;;  %v1309_v32 = vmul.f32 %v3872_v12, %v3872_v12  ;;  %v527_v5 = vld [vmem:[%s3603_s6 + $0x1a8] sm:$0xff] }
 0x109   : > { %v1409_v22 = vsel %vm1120_vm1, %v1308_v10, 0.0 }
 0x10a   : > { %1407 = vadd.xlane.f32.xlu2 %v1406_v7  ;;  %1159 = vadd.xlane.f32.xlu0 %v1158_v8  ;;  %v1410_v26 = vadd.f32 %v1409_v22, %v1307_v23 }
 0x10b   : > { %v1042_v15 = vpop.f32.mrf.mxu3  ;;  %v814_v19 = vpop.f32.mrf.mxu1 }
 0x10c   : > { %v926_v14 = vpop.f32.mrf.mxu2 }
 0x10d   : > { %v3874_v17 = vadd.f32 %v1040_v61, %v926_v14  ;;  %v700_v20 = vpop.f32.mrf.mxu0 }
 0x10e   : > { %v3889_v38 = vadd.f32 %v814_v19, %v700_v20 }
 0x10f   : > { %5307 = vst [vmem:[#allocation8_spill] sm:$0xff] %v3874_v17  ;;  %v1161_v25 = vsel %vm1120_vm1, %v3874_v17, 0.0  ;;  %v1310_v28 = vmul.f32 %v3874_v17, %v3874_v17 }
 0x110   : > { %v1162_v27 = vadd.f32 %v1161_v25, %v3872_v12  ;;  %5309 = vst [vmem:[#allocation10_spill] sm:$0xff] %v3889_v38  ;;  %v1311_v56 = vmul.f32 %v3889_v38, %v3889_v38  ;;  %v529_v12 = vld [vmem:[%s3603_s6 + $0x1b8] sm:$0xff] }
 0x111   : > { %v1413_v37 = vsel %vm1120_vm1, %v1310_v28, 0.0 }
 0x112   : > { %1411 = vadd.xlane.f32.xlu0 %v1410_v26  ;;  %1163 = vadd.xlane.f32.xlu1 %v1162_v27  ;;  %v1414_v41 = vadd.f32 %v1413_v37, %v1309_v32 }
 0x113   : > { %v1045_v31 = vpop.f32.mrf.mxu3  ;;  %v817_v34 = vpop.f32.mrf.mxu1 }
 0x114   : > { %v928_v29 = vpop.f32.mrf.mxu2 }
 0x115   : > { %v3886_v33 = vadd.f32 %v1042_v15, %v928_v29  ;;  %v703_v36 = vpop.f32.mrf.mxu0 }
 0x116   : > { %v3896_v46 = vadd.f32 %v817_v34, %v703_v36 }
 0x117   : > { %5308 = vst [vmem:[#allocation9_spill] sm:$0xff] %v3886_v33  ;;  %v1165_v40 = vsel %vm1120_vm1, %v3886_v33, 0.0  ;;  %v1312_v43 = vmul.f32 %v3886_v33, %v3886_v33 }
 0x118   : > { %v1166_v42 = vadd.f32 %v1165_v40, %v3889_v38  ;;  %5310 = vst [vmem:[#allocation11_spill] sm:$0xff] %v3896_v46  ;;  %v1313_v3 = vmul.f32 %v3896_v46, %v3896_v46  ;;  %v518_v40 = vld [vmem:[%s3603_s6 + $0x160] sm:$0xff] }
 0x119   : > { %v1417_v54 = vsel %vm1120_vm1, %v1312_v43, 0.0  ;;  %v519_v43 = vld [vmem:[%s3603_s6 + $0x168] sm:$0xff] }
 0x11a   : > { %1415 = vadd.xlane.f32.xlu1 %v1414_v41  ;;  %1167 = vadd.xlane.f32.xlu2 %v1166_v42  ;;  %v1418_v58 = vadd.f32 %v1417_v54, %v1311_v56  ;;  %v520_v41 = vld [vmem:[%s3603_s6 + $0x170] sm:$0xff] }
 0x11b   : > { %v1047_v50 = vpop.f32.mrf.mxu3  ;;  %v819_v52 = vpop.f32.mrf.mxu1  ;;  %v580_v42 = vpack.c.bf16 %v520_v41, %v518_v40 }
 0x11c   : > { %v931_v47 = vpop.f32.mrf.mxu2 }
 0x11d   : > { %v3898_v51 = vadd.f32 %v1045_v31, %v931_v47  ;;  %v705_v53 = vpop.f32.mrf.mxu0  ;;  %v521_v47 = vld [vmem:[%s3603_s6 + $0x178] sm:$0xff]  ;;  %955 = vmatmul.bf16.gmra.mxu2 %v580_v42  ;;  %727 = vmatmul.bf16.gmra.mxu0 %v580_v42 }
 0x11e   : > { %v3913_v10 = vadd.f32 %v819_v52, %v705_v53 }
 0x11f   : > { %5311 = vst [vmem:[#allocation12_spill] sm:$0xff] %v3898_v51  ;;  %v1169_v57 = vsel %vm1120_vm1, %v3898_v51, 0.0  ;;  %v1314_v61 = vmul.f32 %v3898_v51, %v3898_v51 }
 0x120   : > { %v1170_v59 = vadd.f32 %v1169_v57, %v3896_v46  ;;  %5313 = vst [vmem:[#allocation14_spill] sm:$0xff] %v3913_v10  ;;  %v1315_v31 = vmul.f32 %v3913_v10, %v3913_v10 }
 0x121   : > { %v1421_v8 = vsel %vm1120_vm1, %v1314_v61, 0.0 }
 0x122   : > { %1419 = vadd.xlane.f32.xlu2 %v1418_v58  ;;  %1171 = vadd.xlane.f32.xlu0 %v1170_v59  ;;  %v1422_v15 = vadd.f32 %v1421_v8, %v1313_v3 }
 0x123   : > { %v1050_v1 = vpop.f32.mrf.mxu3  ;;  %v822_v6 = vpop.f32.mrf.mxu1 }
 0x124   : > { %v933_v62 = vpop.f32.mrf.mxu2 }
 0x125   : > { %v3910_v4 = vadd.f32 %v1047_v50, %v933_v62  ;;  %v708_v7 = vpop.f32.mrf.mxu0  ;;  %v581_v50 = vpack.c.bf16 %v521_v47, %v519_v43  ;;  %v3296_v47 = vmov 0  }
 0x126   : > { %v3920_v22 = vadd.f32 %v822_v6, %v708_v7  ;;  %3202 = vset.pattern.permute.xlu1 %v3296_v47  ;;  %3201 = vset.pattern.permute.xlu0 %v3296_v47 }
 0x127   : > { %5312 = vst [vmem:[#allocation13_spill] sm:$0xff] %v3910_v4  ;;  %v1173_v14 = vsel %vm1120_vm1, %v3910_v4, 0.0  ;;  %v1316_v20 = vmul.f32 %v3910_v4, %v3910_v4  ;;  %3178 = vmatmul.msk.bf16.gmra.mxu3 %vm600_vm0, %v581_v50  ;;  %3157 = vmatmul.msk.bf16.gmra.mxu1 %vm600_vm0, %v581_v50 }
 0x128   : > { %v1174_v19 = vadd.f32 %v1173_v14, %v3913_v10  ;;  %5314 = vst [vmem:[#allocation15_spill] sm:$0xff] %v3920_v22  ;;  %v1317_v54 = vmul.f32 %v3920_v22, %v3920_v22  ;;  %3203 = vset.pattern.permute.xlu2 %v3296_v47  ;;  %v2180_v10 = vld [vmem:[%s4004_s26 + $0x48] sm:$0xff] }
 0x129   : > { %v1425_v29 = vsel %vm1120_vm1, %v1316_v20, 0.0 }
 0x12a   : > { %1423 = vadd.xlane.f32.xlu0 %v1422_v15  ;;  %1175 = vadd.xlane.f32.xlu1 %v1174_v19  ;;  %v1426_v34 = vadd.f32 %v1425_v29, %v1315_v31 }
 0x12b   : > { %v1052_v25 = vpop.f32.mrf.mxu3  ;;  %v824_v27 = vpop.f32.mrf.mxu1 }
 0x12c   : > { %v936_v23 = vpop.f32.mrf.mxu2 }
 0x12d   : > { %v3922_v26 = vadd.f32 %v1050_v1, %v936_v23  ;;  %v710_v28 = vpop.f32.mrf.mxu0 }
 0x12e   : > { %v3943_v61 = vadd.f32 %v824_v27, %v710_v28 }
 0x12f   : > { %5315 = vst [vmem:[#allocation16_spill] sm:$0xff] %v3922_v26  ;;  %v1177_v32 = vsel %vm1120_vm1, %v3922_v26, 0.0  ;;  %v1318_v37 = vmul.f32 %v3922_v26, %v3922_v26 }
 0x130   : > { %v1178_v36 = vadd.f32 %v1177_v32, %v3920_v22  ;;  %5317 = vst [vmem:[#allocation18_spill] sm:$0xff] %v3943_v61  ;;  %v1319_v32 = vmul.f32 %v3943_v61, %v3943_v61 }
 0x131   : > { %v1429_v59 = vsel %vm1120_vm1, %v1318_v37, 0.0 }
 0x132   : > { %1427 = vadd.xlane.f32.xlu1 %v1426_v34  ;;  %1179 = vadd.xlane.f32.xlu2 %v1178_v36  ;;  %v1430_v3 = vadd.f32 %v1429_v59, %v1317_v54 }
 0x133   : > { %v1055_v53 = vpop.f32.mrf.mxu3  ;;  %v827_v57 = vpop.f32.mrf.mxu1 }
 0x134   : > { %v938_v52 = vpop.f32.mrf.mxu2 }
 0x135   : > { %v3938_v56 = vadd.f32 %v1052_v25, %v938_v52  ;;  %v1124_v58 = vpop.xlane.xlu0 %1123  ;;  %v713_v62 = vpop.f32.mrf.mxu0 }
 0x136   : > { %v3950_v8 = vmul.f32 0.0051020407, %v1124_v58  ;;  %v3952_v14 = vadd.f32 %v827_v57, %v713_v62 }
 0x137   : > { %5316 = vst [vmem:[#allocation17_spill] sm:$0xff] %v3938_v56  ;;  %v1181_v1 = vsel %vm1120_vm1, %v3938_v56, 0.0  ;;  %v1320_v7 = vmul.f32 %v3938_v56, %v3938_v56 }
 0x138   : > { %v1182_v6 = vadd.f32 %v1181_v1, %v3943_v61  ;;  %5318 = vst [vmem:[#allocation19_spill] sm:$0xff] %v3952_v14  ;;  %v1625_v28 = vmul.f32 %v3950_v8, %v3950_v8  ;;  %v1321_v52 = vmul.f32 %v3952_v14, %v3952_v14 }
 0x139   : > { %v1433_v27 = vsel %vm1120_vm1, %v1320_v7, 0.0 }
 0x13a   : > { %1431 = vadd.xlane.f32.xlu2 %v1430_v3  ;;  %1183 = vadd.xlane.f32.xlu0 %v1182_v6  ;;  %v1434_v40 = vadd.f32 %v1433_v27, %v1319_v32 }
 0x13b   : > { %v1057_v19 = vpop.f32.mrf.mxu3  ;;  %v829_v23 = vpop.f32.mrf.mxu1 }
 0x13c   : > { %v941_v15 = vpop.f32.mrf.mxu2 }
 0x13d   : > { %v3954_v20 = vadd.f32 %v1055_v53, %v941_v15  ;;  %v1376_v25 = vpop.xlane.xlu0 %1375  ;;  %v715_v31 = vpop.f32.mrf.mxu0 }
 0x13e   : > { %v1583_v29 = vmul.f32 0.0051020407, %v1376_v25  ;;  %v3973_v57 = vadd.f32 %v829_v23, %v715_v31 }
 0x13f   : > { %5319 = vst [vmem:[#allocation20_spill] sm:$0xff] %v3954_v20  ;;  %v3961_v34 = vpop.xlane.xlu1 %1379  ;;  %v1185_v36 = vsel %vm1120_vm1, %v3954_v20, 0.0  ;;  %v1322_v42 = vmul.f32 %v3954_v20, %v3954_v20 }
 0x140   : > { %v1667_v37 = vsub.f32 %v1583_v29, %v1625_v28  ;;  %v1186_v41 = vadd.f32 %v1185_v36, %v3952_v14  ;;  %5321 = vst [vmem:[#allocation22_spill] sm:$0xff] %v3973_v57 }
 0x141   : > { %v1437_v54 = vsel %vm1120_vm1, %v1322_v42, 0.0 }
 0x142   : > { %v1709_v43 = vadd.f32 0.001, %v1667_v37  ;;  %1435 = vadd.xlane.f32.xlu0 %v1434_v40  ;;  %1187 = vadd.xlane.f32.xlu1 %v1186_v41  ;;  %v1438_v6 = vadd.f32 %v1437_v54, %v1321_v52  ;;  %v1323_v40 = vmul.f32 %v3973_v57, %v3973_v57 }
 0x143   : > { %v1060_v58 = vpop.f32.mrf.mxu3  ;;  %v832_v59 = vpop.f32.mrf.mxu1 }
 0x144   : > { %3204 = vrsqrt.f32 %v1709_v43  ;;  %v943_v50 = vpop.f32.mrf.mxu2  ;;  %vm1757_vm3 = vweird.f32 %v1709_v43 }
 0x145   : > { %v3970_v53 = vadd.f32 %v1057_v19, %v943_v50  ;;  %v718_v3 = vpop.f32.mrf.mxu0 }
 0x146   : > { %v3982_v27 = vadd.f32 %v832_v59, %v718_v3 }
 0x147   : > { %5320 = vst [vmem:[#allocation21_spill] sm:$0xff] %v3970_v53  ;;  %v1132_v62 = vpop.xlane.xlu1 %1131  ;;  %v1189_v1 = vsel %vm1120_vm1, %v3970_v53, 0.0  ;;  %v1324_v19 = vmul.f32 %v3970_v53, %v3970_v53  ;;  %v1384_v28 = vpop.xlane.xlu2 %1383 }
 0x148   : > { %v1190_v7 = vadd.f32 %v1189_v1, %v3973_v57  ;;  %v3978_v15 = vmul.f32 0.0051020407, %v1132_v62  ;;  %5322 = vst [vmem:[#allocation23_spill] sm:$0xff] %v3982_v27  ;;  %v1585_v42 = vmul.f32 0.0051020407, %v1384_v28  ;;  %v525_v57 = vld [vmem:[%s3603_s6 + $0x198] sm:$0xff] }
 0x149   : > { %v1441_v37 = vsel %vm1120_vm1, %v1324_v19, 0.0 }
 0x14a   : > { %v3205_v25 = vpop.eup %3204  ;;  %1439 = vadd.xlane.f32.xlu1 %v1438_v6  ;;  %1191 = vadd.xlane.f32.xlu2 %v1190_v7  ;;  %v1627_v32 = vmul.f32 %v3978_v15, %v3978_v15  ;;  %v1442_v50 = vadd.f32 %v1441_v37, %v1323_v40 }
 0x14b   : > { %v1752_v23 = vmul.f32 %v3205_v25, %v1709_v43  ;;  %v3994_v59 = vpop.f32.mrf.mxu3  ;;  %v3996_v62 = vpop.f32.mrf.mxu1  ;;  %vm1758_vm2 = vweird.f32 %v3205_v25 }
 0x14c   : > { %v946_v29 = vpop.f32.mrf.mxu2  ;;  %v1669_v54 = vsub.f32 %v1585_v42, %v1627_v32  ;;  %vm1759_vm4 = vmor %vm1757_vm3, %vm1758_vm2  ;;  %v2255_v42 = vld [vmem:[%s4012_s30] sm:$0xff] }
 0x14d   : > { %v1753_v31 = vmul.f32 %v3205_v25, %v1752_v23  ;;  %v3986_v36 = vadd.f32 %v1060_v58, %v946_v29  ;;  %v3999_v1 = vpop.f32.mrf.mxu0  ;;  %v2171_v23 = vld [vmem:[%s4004_s26] sm:$0xff]  ;;  %v1128_v29 = vpop.xlane.xlu0 %1127 }
 0x14e   : > { %v1711_v7 = vadd.f32 0.001, %v1669_v54  ;;  %v4031_v26 = vmul.f32 0.0051020407, %v1128_v29  ;;  %v4072_v33 = vadd.f32 %v3996_v62, %v3999_v1 }
 0x14f   : > { %5323 = vst [vmem:[#allocation24_spill] sm:$0xff] %v3986_v36  ;;  %v1754_v41 = vmul.f32 0.5, %v1753_v31  ;;  %v1193_v47 = vsel %vm1120_vm1, %v3986_v36, 0.0 }
 0x150   : > { %v1194_v58 = vadd.f32 %v1193_v47, %v3982_v27  ;;  %3206 = vrsqrt.f32 %v1711_v7  ;;  %vm1777_vm6 = vweird.f32 %v1711_v7  ;;  %5327 = vst [vmem:[#allocation28_spill] sm:$0xff] %v4072_v33 }
 0x151   : > { %v1755_v52 = vsub.f32 1.5, %v1754_v41 }
 0x152   : > { %1443 = vadd.xlane.f32.xlu2 %v1442_v50  ;;  %1195 = vadd.xlane.f32.xlu0 %v1194_v58 }
 0x153   : > { %v1756_v3 = vmul.f32 %v3205_v25, %v1755_v52  ;;  %v1065_v31 = vpop.f32.mrf.mxu3  ;;  %v837_v32 = vpop.f32.mrf.mxu1 }
 0x154   : > { %v4006_v6 = vpop.f32.mrf.mxu2 }
 0x155   : > { %v1760_v19 = vsel %vm1759_vm4, %v3205_v25, %v1756_v3  ;;  %v723_v37 = vpop.f32.mrf.mxu0  ;;  %v4023_v3 = vpop.xlane.xlu0 %1387 }
 0x156   : > { %v2213_v28 = vmul.f32 %v2171_v23, %v1760_v19  ;;  %v4014_v43 = vadd.f32 %v837_v32, %v723_v37  ;;  %v3207_v47 = vpop.eup %3206  ;;  %v4025_v19 = vpop.xlane.xlu2 %1139  ;;  %v524_v32 = vld [vmem:[%s3603_s6 + $0x190] sm:$0xff]  ;;  %v523_v37 = vld [vmem:[%s3603_s6 + $0x188] sm:$0xff] }
 0x157   : > { %v1772_v58 = vmul.f32 %v3207_v47, %v1711_v7  ;;  %vm1778_vm5 = vweird.f32 %v3207_v47 }
 0x158   : > { %5324 = vst [vmem:[#allocation25_spill] sm:$0xff] %v4014_v43  ;;  %v2297_v25 = vmul.f32 %v2213_v28, %v3950_v8  ;;  %v522_v8 = vld [vmem:[%s3603_s6 + $0x180] sm:$0xff]  ;;  %vm1779_vm7 = vmor %vm1777_vm6, %vm1778_vm5 }
 0x159   : > { %v1773_v23 = vmul.f32 %v3207_v47, %v1772_v58  ;;  %v582_v53 = vpack.c.bf16 %v524_v32, %v522_v8 }
 0x15a   : > { %v2339_v54 = vsub.f32 %v2255_v42, %v2297_v25  ;;  %v583_v25 = vpack.c.bf16 %v525_v57, %v523_v37 }
 0x15b   : > { %960 = vmatmul.bf16.gmra.mxu2 %v582_v53  ;;  %732 = vmatmul.bf16.gmra.mxu0 %v582_v53 }
 0x15c   : > { %v951_v40 = vpop.f32.mrf.mxu2  ;;  %3179 = vmatmul.msk.bf16.gmra.mxu3 %vm600_vm0, %v583_v25  ;;  %3158 = vmatmul.msk.bf16.gmra.mxu1 %vm600_vm0, %v583_v25 }
 0x15d   : > { %v4016_v41 = vadd.f32 %v1065_v31, %v951_v40  ;;  %v1136_v31 = vpop.xlane.xlu1 %1135  ;;  %v1774_v40 = vmul.f32 0.5, %v1773_v23  ;;  %v2173_v23 = vld [vmem:[%s4004_s26 + $0x10] sm:$0xff] }
 0x15e   : > { %v4082_v62 = vmul.f32 0.0051020407, %v1136_v31  ;;  %v1586_v31 = vmul.f32 0.0051020407, %v4023_v3 }
 0x15f   : > { %5325 = vst [vmem:[#allocation26_spill] sm:$0xff] %v4016_v41  ;;  %v1201_v50 = vsel %vm1120_vm1, %v4016_v41, 0.0  ;;  %v1775_v42 = vsub.f32 1.5, %v1774_v40 }
 0x160   : > { %v1202_v52 = vadd.f32 %v1201_v50, %v4014_v43 }
 0x161   : > { %v1776_v58 = vmul.f32 %v3207_v47, %v1775_v42 }
 0x162   : > { %1203 = vadd.xlane.f32.xlu2 %v1202_v52  ;;  %v1626_v52 = vmul.f32 %v4031_v26, %v4031_v26 }
 0x163   : > { %2677 = vperm.xlu1 %3202, %v2339_v54   ;;  %v1584_v54 = vmul.f32 0.0051020407, %v3961_v34  ;;  %v1780_v8 = vsel %vm1779_vm7, %v3207_v47, %v1776_v58  ;;  %v4062_v47 = vadd.f32 %v3994_v59, %v4006_v6 }
 0x164   : > { %v4049_v40 = vmul.f32 %v2173_v23, %v1780_v8 }
 0x165   : > { %v4033_v50 = vpop.xlane.xlu0 %1147  ;;  %v4042_v29 = vpop.xlane.xlu1 %1391  ;;  %v1668_v57 = vsub.f32 %v1584_v54, %v1626_v52  ;;  %5326 = vst [vmem:[#allocation27_spill] sm:$0xff] %v4062_v47  ;;  %v1197_v61 = vsel %vm1120_vm1, %v4062_v47, 0.0 }
 0x166   : > { %2383 = vperm.xlu0 %3201, %v2213_v28   ;;  %v4037_v28 = vpop.xlane.xlu2 %1143  ;;  %v1198_v20 = vadd.f32 %v1197_v61, %v4072_v33  ;;  %v1628_v61 = vmul.f32 %v4082_v62, %v4082_v62 }
 0x167   : > { %v1710_v32 = vadd.f32 0.001, %v1668_v57 }
 0x169   : > { %3208 = vrsqrt.f32 %v1710_v32  ;;  %vm1767_vm9 = vweird.f32 %v1710_v32 }
 0x16d   : > { %v4044_v53 = vpop.xlane.xlu0 %1399  ;;  %v4051_v25 = vpop.xlane.xlu1 %1151 }
 0x16e   : > { %v4047_v37 = vpop.xlane.xlu2 %1395 }
 0x16f   : > { %v3209_v52 = vpop.eup %3208 }
 0x170   : > { %v1762_v22 = vmul.f32 %v3209_v52, %v1710_v32  ;;  %vm1768_vm8 = vweird.f32 %v3209_v52 }
 0x171   : > { %vm1769_vm10 = vmor %vm1767_vm9, %vm1768_vm8 }
 0x172   : > { %v1763_v8 = vmul.f32 %v3209_v52, %v1762_v22  ;;  %v1325_v22 = vmul.f32 %v3982_v27, %v3982_v27 }
 0x175   : > { %v4058_v54 = vpop.xlane.xlu1 %1403 }
 0x176   : > { %v4054_v42 = vpop.xlane.xlu2 %1155 }
 0x17a   : > { %2393 = vperm.xlu2 %3203, %v4049_v40  }
 0x17d   : > { %v1160_v34 = vpop.xlane.xlu0 %1159 }
 0x17e   : > { %v4056_v7 = vmul.f32 0.0051020407, %v1160_v34  ;;  %v1326_v34 = vmul.f32 %v3986_v36, %v3986_v36  ;;  %v4074_v38 = vpop.xlane.xlu2 %1407 }
 0x180   : > { %v1634_v57 = vmul.f32 %v4056_v7, %v4056_v7 }
 0x185   : > { %v1412_v58 = vpop.xlane.xlu0 %1411  ;;  %v4076_v6 = vpop.xlane.xlu1 %1163 }
 0x186   : > { %v1592_v23 = vmul.f32 0.0051020407, %v1412_v58  ;;  %v1764_v58 = vmul.f32 0.5, %v1763_v8 }
 0x188   : > { %v1676_v56 = vsub.f32 %v1592_v23, %v1634_v57  ;;  %v1445_v57 = vsel %vm1120_vm1, %v1326_v34, 0.0  ;;  %v1765_v36 = vsub.f32 1.5, %v1764_v58 }
 0x189   : > { %v1446_v23 = vadd.f32 %v1445_v57, %v1325_v22  ;;  %v2172_v22 = vld [vmem:[%s4004_s26 + $0x8] sm:$0xff]  ;;  %v1670_v57 = vsub.f32 %v1586_v31, %v1628_v61 }
 0x18a   : > { %v1718_v59 = vadd.f32 0.001, %v1676_v56  ;;  %v1766_v51 = vmul.f32 %v3209_v52, %v1765_v36 }
 0x18b   : > { %v4099_v3 = vadd.f32 0.001, %v1670_v57 }
 0x18c   : > { %3210 = vrsqrt.f32 %v1718_v59  ;;  %v1770_v58 = vsel %vm1769_vm10, %v3209_v52, %v1766_v51  ;;  %vm1847_vm12 = vweird.f32 %v1718_v59 }
 0x18d   : > { %1199 = vadd.xlane.f32.xlu1 %v1198_v20  ;;  %v4084_v56 = vpop.xlane.xlu2 %1167  ;;  %v4088_v27 = vpop.xlane.xlu1 %1415  ;;  %v2214_v46 = vmul.f32 %v2172_v22, %v1770_v58  ;;  %3212 = vrsqrt.f32 %v4099_v3  ;;  %vm1787_vm7 = vweird.f32 %v4099_v3 }
 0x190   : > { %1447 = vadd.xlane.f32.xlu0 %v1446_v23 }
 0x192   : > { %v3211_v1 = vpop.eup %3210 }
 0x193   : > { %v1842_v14 = vmul.f32 %v3211_v1, %v1718_v59  ;;  %vm1848_vm11 = vweird.f32 %v3211_v1  ;;  %v1329_v59 = vmul.f32 %v4014_v43, %v4014_v43  ;;  %v526_v43 = vld [vmem:[%s3603_s6 + $0x1a0] sm:$0xff] }
 0x194   : > { %vm1849_vm13 = vmor %vm1847_vm12, %vm1848_vm11  ;;  %v584_v17 = vpack.c.bf16 %v528_v0, %v526_v43 }
 0x195   : > { %v1843_v8 = vmul.f32 %v3211_v1, %v1842_v14  ;;  %v1172_v20 = vpop.xlane.xlu0 %1171  ;;  %v1330_v14 = vmul.f32 %v4016_v41, %v4016_v41  ;;  %v4097_v32 = vpop.xlane.xlu2 %1419 }
 0x196   : > { %v4092_v36 = vmul.f32 0.0051020407, %v1172_v20  ;;  %965 = vmatmul.bf16.gmra.mxu2 %v584_v17  ;;  %737 = vmatmul.bf16.gmra.mxu0 %v584_v17 }
 0x197   : > { %v1844_v34 = vmul.f32 0.5, %v1843_v8  ;;  %v1453_v22 = vsel %vm1120_vm1, %v1330_v14, 0.0 }
 0x198   : > { %v1637_v61 = vmul.f32 %v4092_v36, %v4092_v36 }
 0x199   : > { %v1845_v23 = vsub.f32 1.5, %v1844_v34  ;;  %v2298_v34 = vmul.f32 %v2214_v46, %v4031_v26 }
 0x19b   : > { %v1846_v4 = vmul.f32 %v3211_v1, %v1845_v23  ;;  %v2256_v23 = vld [vmem:[%s4012_s30 + $0x8] sm:$0xff] }
 0x19c   : > { %v2340_v41 = vsub.f32 %v2256_v23, %v2298_v34 }
 0x19d   : > { %v1424_v8 = vpop.xlane.xlu0 %1423  ;;  %v1176_v51 = vpop.xlane.xlu1 %1175  ;;  %v1850_v52 = vsel %vm1849_vm13, %v3211_v1, %v1846_v4 }
 0x19e   : > { %v1595_v20 = vmul.f32 0.0051020407, %v1424_v8  ;;  %v4105_v31 = vmul.f32 %v2180_v10, %v1850_v52  ;;  %v4115_v1 = vmul.f32 0.0051020407, %v1176_v51  ;;  %v1454_v8 = vadd.f32 %v1453_v22, %v1329_v59 }
 0x1a0   : > { %v1679_v58 = vsub.f32 %v1595_v20, %v1637_v61  ;;  %v4112_v57 = vmul.f32 %v4105_v31, %v4056_v7  ;;  %v1638_v14 = vmul.f32 %v4115_v1, %v4115_v1  ;;  %v4119_v61 = vpop.eup %3212 }
 0x1a1   : > { %v1782_v51 = vmul.f32 %v4119_v61, %v4099_v3  ;;  %vm1788_vm4 = vweird.f32 %v4119_v61 }
 0x1a2   : > { %v1721_v4 = vadd.f32 0.001, %v1679_v58  ;;  %vm1789_vm8 = vmor %vm1787_vm7, %vm1788_vm4 }
 0x1a3   : > { %1455 = vadd.xlane.f32.xlu2 %v1454_v8  ;;  %v1783_v23 = vmul.f32 %v4119_v61, %v1782_v51 }
 0x1a4   : > { %3214 = vrsqrt.f32 %v1721_v4  ;;  %2682 = vperm.xlu0 %3201, %v2340_v41   ;;  %vm1877_vm15 = vweird.f32 %v1721_v4 }
 0x1a5   : > { %v1428_v10 = vpop.xlane.xlu1 %1427  ;;  %v1180_v26 = vpop.xlane.xlu2 %1179  ;;  %v1784_v49 = vmul.f32 0.5, %v1783_v23 }
 0x1a6   : > { %v1596_v52 = vmul.f32 0.0051020407, %v1428_v10  ;;  %2388 = vperm.xlu1 %3202, %v2214_v46   ;;  %v4125_v41 = vmul.f32 0.0051020407, %v1180_v26 }
 0x1a8   : > { %v1680_v7 = vsub.f32 %v1596_v52, %v1638_v14  ;;  %v1639_v8 = vmul.f32 %v4125_v41, %v4125_v41 }
 0x1aa   : > { %v3215_v20 = vpop.eup %3214  ;;  %v4123_v59 = vadd.f32 0.001, %v1680_v7  ;;  %v4132_v7 = vmul.f32 0.0051020407, %v4025_v19 }
 0x1ab   : > { %v1872_v34 = vmul.f32 %v3215_v20, %v1721_v4  ;;  %vm1878_vm14 = vweird.f32 %v3215_v20 }
 0x1ac   : > { %3216 = vrsqrt.f32 %v4123_v59  ;;  %vm1879_vm2 = vmor %vm1877_vm15, %vm1878_vm14  ;;  %v1629_v23 = vmul.f32 %v4132_v7, %v4132_v7  ;;  %vm1887_vm5 = vweird.f32 %v4123_v59 }
 0x1ad   : > { %v1873_v22 = vmul.f32 %v3215_v20, %v1872_v34  ;;  %v1432_v58 = vpop.xlane.xlu2 %1431  ;;  %v1184_v46 = vpop.xlane.xlu0 %1183 }
 0x1ae   : > { %v1597_v10 = vmul.f32 0.0051020407, %v1432_v58  ;;  %v4139_v51 = vmul.f32 0.0051020407, %v1184_v46  ;;  %v585_v58 = vpack.c.bf16 %v529_v12, %v527_v5  ;;  %v1587_v46 = vmul.f32 0.0051020407, %v4042_v29 }
 0x1af   : > { %v1874_v14 = vmul.f32 0.5, %v1873_v22  ;;  %v2299_v12 = vmul.f32 %v4049_v40, %v3978_v15  ;;  %v2257_v29 = vld [vmem:[%s4012_s30 + $0x10] sm:$0xff] }
 0x1b0   : > { %v1681_v52 = vsub.f32 %v1597_v10, %v1639_v8  ;;  %v2183_v8 = vld [vmem:[%s4004_s26 + $0x60] sm:$0xff]  ;;  %3180 = vmatmul.msk.bf16.gmra.mxu3 %vm600_vm0, %v585_v58  ;;  %3159 = vmatmul.msk.bf16.gmra.mxu1 %vm600_vm0, %v585_v58  ;;  %v1640_v17 = vmul.f32 %v4139_v51, %v4139_v51  ;;  %v1671_v58 = vsub.f32 %v1587_v46, %v1629_v23 }
 0x1b1   : > { %v1875_v26 = vsub.f32 1.5, %v1874_v14 }
 0x1b2   : > { %v3217_v34 = vpop.eup %3216  ;;  %v4137_v45 = vadd.f32 0.001, %v1681_v52  ;;  %v1785_v52 = vsub.f32 1.5, %v1784_v49  ;;  %v4173_v23 = vadd.f32 0.001, %v1671_v58 }
 0x1b3   : > { %v1882_v22 = vmul.f32 %v3217_v34, %v4123_v59  ;;  %v1876_v19 = vmul.f32 %v3215_v20, %v1875_v26  ;;  %vm1888_vm3 = vweird.f32 %v3217_v34 }
 0x1b4   : > { %3218 = vrsqrt.f32 %v4137_v45  ;;  %v1786_v49 = vmul.f32 %v4119_v61, %v1785_v52  ;;  %vm1889_vm6 = vmor %vm1887_vm5, %vm1888_vm3  ;;  %v2174_v52 = vld [vmem:[%s4004_s26 + $0x18] sm:$0xff]  ;;  %vm1897_vm10 = vweird.f32 %v4137_v45  ;;  %vm1797_vm7 = vweird.f32 %v4173_v23 }
 0x1b5   : > { %v1883_v0 = vmul.f32 %v3217_v34, %v1882_v22  ;;  %v1436_v43 = vpop.xlane.xlu0 %1435  ;;  %v1188_v4 = vpop.xlane.xlu1 %1187  ;;  %v1880_v5 = vsel %vm1879_vm2, %v3215_v20, %v1876_v19 }
 0x1b6   : > { %v1598_v10 = vmul.f32 0.0051020407, %v1436_v43  ;;  %v4155_v14 = vmul.f32 %v2183_v8, %v1880_v5  ;;  %v4165_v40 = vmul.f32 0.0051020407, %v1188_v4  ;;  %v2341_v8 = vsub.f32 %v2257_v29, %v2299_v12  ;;  %v2184_v43 = vld [vmem:[%s4004_s26 + $0x68] sm:$0xff] }
 0x1b7   : > { %v1884_v26 = vmul.f32 0.5, %v1883_v0 }
 0x1b8   : > { %v1682_v22 = vsub.f32 %v1598_v10, %v1640_v17  ;;  %v4160_v21 = vmul.f32 %v4155_v14, %v4092_v36  ;;  %v1641_v59 = vmul.f32 %v4165_v40, %v4165_v40 }
 0x1b9   : > { %v1885_v20 = vsub.f32 1.5, %v1884_v26  ;;  %v1790_v26 = vsel %vm1789_vm8, %v4119_v61, %v1786_v49 }
 0x1ba   : > { %5328 = vst [vmem:[#allocation29_spill] sm:$0xff] %v4160_v21  ;;  %v3219_v19 = vpop.eup %3218  ;;  %v4163_v15 = vadd.f32 0.001, %v1682_v22 }
 0x1bb   : > { %v1892_v0 = vmul.f32 %v3219_v19, %v4137_v45  ;;  %v1886_v36 = vmul.f32 %v3217_v34, %v1885_v20  ;;  %2687 = vperm.xlu2 %3203, %v2341_v8   ;;  %v4188_v20 = vmul.f32 %v2174_v52, %v1790_v26  ;;  %vm1898_vm9 = vweird.f32 %v3219_v19  ;;  %v725_v45 = vpop.f32.mrf.mxu0 }
 0x1bc   : > { %3220 = vrsqrt.f32 %v4163_v15  ;;  %vm1899_vm11 = vmor %vm1897_vm10, %vm1898_vm9  ;;  %vm1907_vm13 = vweird.f32 %v4163_v15 }
 0x1bd   : > { %v1893_v46 = vmul.f32 %v3219_v19, %v1892_v0  ;;  %v1440_v4 = vpop.xlane.xlu1 %1439  ;;  %v1192_v5 = vpop.xlane.xlu2 %1191  ;;  %v1890_v12 = vsel %vm1889_vm6, %v3217_v34, %v1886_v36  ;;  %3222 = vrsqrt.f32 %v4173_v23 }
 0x1be   : > { %v1599_v17 = vmul.f32 0.0051020407, %v1440_v4  ;;  %v4179_v10 = vmul.f32 %v2184_v43, %v1890_v12  ;;  %v4192_v0 = vmul.f32 0.0051020407, %v1192_v5  ;;  %v953_v36 = vpop.f32.mrf.mxu2  ;;  %v1328_v4 = vmul.f32 %v4062_v47, %v4062_v47  ;;  %v2185_v12 = vld [vmem:[%s4004_s26 + $0x70] sm:$0xff] }
 0x1bf   : > { %v1894_v29 = vmul.f32 0.5, %v1893_v46 }
 0x1c0   : > { %v1683_v3 = vsub.f32 %v1599_v17, %v1641_v59  ;;  %v4185_v22 = vmul.f32 %v4179_v10, %v4115_v1  ;;  %v1067_v1 = vpop.f32.mrf.mxu3  ;;  %v1642_v59 = vmul.f32 %v4192_v0, %v4192_v0  ;;  %v1449_v47 = vsel %vm1120_vm1, %v1328_v4, 0.0 }
 0x1c1   : > { %v1895_v34 = vsub.f32 1.5, %v1894_v29  ;;  %v4201_v5 = vadd.f32 %v1067_v1, %v953_v36 }
 0x1c2   : > { %v3221_v58 = vpop.eup %3220  ;;  %v4190_v8 = vadd.f32 0.001, %v1683_v3  ;;  %v839_v3 = vpop.f32.mrf.mxu1 }
 0x1c3   : > { %v1902_v61 = vmul.f32 %v3221_v58, %v4163_v15  ;;  %v1896_v49 = vmul.f32 %v3219_v19, %v1895_v34  ;;  %2398 = vperm.xlu2 %3203, %v4188_v20   ;;  %5329 = vst [vmem:[#allocation30_spill] sm:$0xff] %v4201_v5  ;;  %v4205_v52 = vpop.eup %3222  ;;  %vm1908_vm12 = vweird.f32 %v3221_v58  ;;  %v1332_v15 = vmul.f32 %v4201_v5, %v4201_v5 }
 0x1c4   : > { %3224 = vrsqrt.f32 %v4190_v8  ;;  %v1792_v1 = vmul.f32 %v4205_v52, %v4173_v23  ;;  %vm1909_vm14 = vmor %vm1907_vm13, %vm1908_vm12  ;;  %vm1917_vm2 = vweird.f32 %v4190_v8  ;;  %vm1798_vm5 = vweird.f32 %v4205_v52 }
 0x1c5   : > { %v1903_v43 = vmul.f32 %v3221_v58, %v1902_v61  ;;  %v1444_v46 = vpop.xlane.xlu2 %1443  ;;  %v1900_v29 = vsel %vm1899_vm11, %v3219_v19, %v1896_v49  ;;  %v4220_v49 = vadd.f32 %v839_v3, %v725_v45  ;;  %vm1799_vm9 = vmor %vm1797_vm7, %vm1798_vm5 }
 0x1c6   : > { %v1600_v17 = vmul.f32 0.0051020407, %v1444_v46  ;;  %v4207_v61 = vmul.f32 %v2185_v12, %v1900_v29 }
 0x1c7   : > { %v1904_v26 = vmul.f32 0.5, %v1903_v43  ;;  %v1205_v43 = vsel %vm1120_vm1, %v4201_v5, 0.0  ;;  %5331 = vst [vmem:[#allocation32_spill] sm:$0xff] %v4220_v49 }
 0x1c8   : > { %v1684_v34 = vsub.f32 %v1600_v17, %v1642_v59  ;;  %v4218_v19 = vmul.f32 %v4207_v61, %v4125_v41  ;;  %v2186_v59 = vld [vmem:[%s4004_s26 + $0x78] sm:$0xff]  ;;  %v1327_v17 = vmul.f32 %v4072_v33, %v4072_v33  ;;  %v1206_v29 = vadd.f32 %v1205_v43, %v4220_v49  ;;  %v4254_v5 = vpop.f32.mrf.mxu3 }
 0x1c9   : > { %v1905_v21 = vsub.f32 1.5, %v1904_v26  ;;  %v1793_v41 = vmul.f32 %v4205_v52, %v1792_v1 }
 0x1ca   : > { %v3225_v36 = vpop.eup %3224  ;;  %v4212_v46 = vadd.f32 0.001, %v1684_v34  ;;  %5330 = vst [vmem:[#allocation31_spill] sm:$0xff] %v4218_v19  ;;  %v1450_v3 = vadd.f32 %v1449_v47, %v1327_v17  ;;  %v4238_v19 = vpop.xlane.xlu0 %1195  ;;  %v1457_v47 = vsel %vm1120_vm1, %v1332_v15, 0.0  ;;  %v2187_v17 = vld [vmem:[%s4004_s26 + $0x80] sm:$0xff] }
 0x1cb   : > { %v1912_v4 = vmul.f32 %v3225_v36, %v4190_v8  ;;  %v1906_v12 = vmul.f32 %v3221_v58, %v1905_v21  ;;  %vm1918_vm15 = vweird.f32 %v3225_v36  ;;  %v1794_v1 = vmul.f32 0.5, %v1793_v41 }
 0x1cc   : > { %3226 = vrsqrt.f32 %v4212_v46  ;;  %vm1919_vm3 = vmor %vm1917_vm2, %vm1918_vm15  ;;  %v1588_v15 = vmul.f32 0.0051020407, %v4047_v37  ;;  %v4263_v37 = vpop.f32.mrf.mxu0  ;;  %vm1927_vm6 = vweird.f32 %v4212_v46 }
 0x1cd   : > { %v1913_v26 = vmul.f32 %v3225_v36, %v1912_v4  ;;  %v1910_v34 = vsel %vm1909_vm14, %v3221_v58, %v1906_v12  ;;  %v1331_v12 = vmul.f32 %v4220_v49, %v4220_v49 }
 0x1ce   : > { %v4232_v45 = vmul.f32 %v2186_v59, %v1910_v34  ;;  %1207 = vadd.xlane.f32.xlu0 %v1206_v29 }
 0x1cf   : > { %v1914_v21 = vmul.f32 0.5, %v1913_v26  ;;  %v1458_v29 = vadd.f32 %v1457_v47, %v1331_v12  ;;  %v4265_v47 = vpop.f32.mrf.mxu1 }
 0x1d0   : > { %1451 = vadd.xlane.f32.xlu1 %v1450_v3  ;;  %v4236_v33 = vmul.f32 %v4232_v45, %v4139_v51  ;;  %v4247_v51 = vmul.f32 0.0051020407, %v4037_v28  ;;  %v1795_v3 = vsub.f32 1.5, %v1794_v1 }
 0x1d1   : > { %v1915_v4 = vsub.f32 1.5, %v1914_v21  ;;  %v4252_v21 = vpop.f32.mrf.mxu2 }
 0x1d2   : > { %v3227_v58 = vpop.eup %3226  ;;  %v1630_v28 = vmul.f32 %v4247_v51, %v4247_v51 }
 0x1d3   : > { %v1922_v43 = vmul.f32 %v3227_v58, %v4212_v46  ;;  %v1916_v59 = vmul.f32 %v3225_v36, %v1915_v4  ;;  %vm1928_vm4 = vweird.f32 %v3227_v58 }
 0x1d4   : > { %vm1929_vm8 = vmor %vm1927_vm6, %vm1928_vm4 }
 0x1d5   : > { %v1923_v26 = vmul.f32 %v3227_v58, %v1922_v43  ;;  %v1920_v34 = vsel %vm1919_vm3, %v3225_v36, %v1916_v59  ;;  %v1672_v59 = vsub.f32 %v1588_v15, %v1630_v28 }
 0x1d6   : > { %v4249_v41 = vmul.f32 %v2187_v17, %v1920_v34  ;;  %1459 = vadd.xlane.f32.xlu0 %v1458_v29  ;;  %v2678_v17 = vpop.permute.xlu1 %2677  ;;  %v2188_v29 = vld [vmem:[%s4004_s26 + $0x88] sm:$0xff] }
 0x1d7   : > { %v1924_v8 = vmul.f32 0.5, %v1923_v26 }
 0x1d8   : > { %v4258_v4 = vmul.f32 %v4249_v41, %v4165_v40  ;;  %v2384_v1 = vpop.permute.xlu0 %2383  ;;  %v1796_v40 = vmul.f32 %v4205_v52, %v1795_v3  ;;  %v2175_v3 = vld [vmem:[%s4004_s26 + $0x20] sm:$0xff] }
 0x1d9   : > { %v1925_v36 = vsub.f32 1.5, %v1924_v8  ;;  %v2591_v43 = vmul.f32 %v2384_v1, %v3745_v63  ;;  %v2592_v12 = vmul.f32 %v2384_v1, %v3747_v2  ;;  %v1714_v8 = vadd.f32 0.001, %v1672_v59  ;;  %v958_v28 = vpop.f32.mrf.mxu2 }
 0x1da   : > { %v1800_v34 = vsel %vm1799_vm9, %v4205_v52, %v1796_v40  ;;  %v2258_v40 = vld [vmem:[%s4012_s30 + $0x18] sm:$0xff] }
 0x1db   : > { %v1926_v26 = vmul.f32 %v3227_v58, %v1925_v36  ;;  %v2885_v63 = vadd.f32 %v2678_v17, %v2591_v43  ;;  %v2886_v2 = vadd.f32 %v2678_v17, %v2592_v12  ;;  %v1072_v36 = vpop.f32.mrf.mxu3  ;;  %v4294_v1 = vmul.f32 %v2175_v3, %v1800_v34  ;;  %v730_v43 = vpop.f32.mrf.mxu0  ;;  %v532_v3 = vld [vmem:[%s3603_s6 + $0x1d0] sm:$0xff] }
 0x1dc   : > { %3228 = vrsqrt.f32 %v1714_v8  ;;  %v4298_v52 = vadd.f32 %v1072_v36, %v958_v28  ;;  %v844_v12 = vpop.f32.mrf.mxu1  ;;  %v531_v28 = vld [vmem:[%s3603_s6 + $0x1c8] sm:$0xff]  ;;  %vm1807_vm11 = vweird.f32 %v1714_v8 }
 0x1dd   : > { %v1930_v46 = vsel %vm1929_vm8, %v3227_v58, %v1926_v26  ;;  %2969 = vst [vmem:[%s4276_s10] sm:$0xff] %v2885_v63  ;;  %v2300_v58 = vmul.f32 %v4188_v20, %v4082_v62  ;;  %v2301_v59 = vmul.f32 %v4294_v1, %v4132_v7  ;;  %v4304_v17 = vadd.f32 %v844_v12, %v730_v43  ;;  %v530_v7 = vld [vmem:[%s3603_s6 + $0x1c0] sm:$0xff]  ;;  %v533_v43 = vld [vmem:[%s3603_s6 + $0x1d8] sm:$0xff] }
 0x1de   : > { %v4286_v15 = vmul.f32 %v2188_v29, %v1930_v46  ;;  %2970 = vst.msk [vmem:[%s4276_s10 + $0x8] sm:$0xff] %vm1120_vm1, %v2886_v2  ;;  %v1213_v62 = vsel %vm1120_vm1, %v4298_v52, 0.0  ;;  %v587_v12 = vpack.c.bf16 %v533_v43, %v531_v28  ;;  %v536_v28 = vld [vmem:[%s3603_s6 + $0x1f0] sm:$0xff]  ;;  %v537_v43 = vld [vmem:[%s3603_s6 + $0x1f8] sm:$0xff] }
 0x1df   : > { %5332 = vst [vmem:[#allocation33_spill] sm:$0xff] %v4298_v52  ;;  %v2342_v26 = vsub.f32 %v2258_v40, %v2300_v58  ;;  %v1214_v63 = vadd.f32 %v1213_v62, %v4304_v17  ;;  %v586_v58 = vpack.c.bf16 %v532_v3, %v530_v7  ;;  %v4320_v62 = vmul.f32 0.0051020407, %v4238_v19 }
 0x1e0   : > { %v4292_v23 = vmul.f32 %v4286_v15, %v4192_v0  ;;  %v2259_v0 = vld [vmem:[%s4012_s30 + $0x20] sm:$0xff]  ;;  %5333 = vst [vmem:[#allocation34_spill] sm:$0xff] %v4304_v17  ;;  %3181 = vmatmul.msk.bf16.gmra.mxu3 %vm600_vm0, %v587_v12  ;;  %3160 = vmatmul.msk.bf16.gmra.mxu1 %vm600_vm0, %v587_v12 }
 0x1e1   : > { %v2343_v29 = vsub.f32 %v2259_v0, %v2301_v59  ;;  %970 = vmatmul.bf16.gmra.mxu2 %v586_v58  ;;  %742 = vmatmul.bf16.gmra.mxu0 %v586_v58  ;;  %v2176_v0 = vld [vmem:[%s4004_s26 + $0x28] sm:$0xff]  ;;  %v961_v7 = vpop.f32.mrf.mxu2 }
 0x1e2   : > { %v3229_v20 = vpop.eup %3228 }
 0x1e3   : > { %v1802_v2 = vmul.f32 %v3229_v20, %v1714_v8  ;;  %vm1808_vm10 = vweird.f32 %v3229_v20  ;;  %v1075_v3 = vpop.f32.mrf.mxu3 }
 0x1e4   : > { %vm1809_vm12 = vmor %vm1807_vm11, %vm1808_vm10  ;;  %v847_v49 = vpop.f32.mrf.mxu1 }
 0x1e5   : > { %v1803_v46 = vmul.f32 %v3229_v20, %v1802_v2 }
 0x1e7   : > { %v1804_v34 = vmul.f32 0.5, %v1803_v46  ;;  %v4329_v46 = vpop.xlane.xlu2 %1203 }
 0x1e8   : > { %5334 = vst [vmem:[#allocation35_spill] sm:$0xff] %v4329_v46 }
 0x1e9   : > { %2692 = vperm.xlu1 %3202, %v2342_v26   ;;  %v1805_v36 = vsub.f32 1.5, %v1804_v34  ;;  %v4317_v26 = vmul.f32 0.0051020407, %v4051_v25 }
 0x1ea   : > { %2697 = vperm.xlu0 %3201, %v2343_v29   ;;  %v1590_v29 = vmul.f32 0.0051020407, %v4058_v54  ;;  %v534_v54 = vld [vmem:[%s3603_s6 + $0x1e0] sm:$0xff] }
 0x1eb   : > { %v1806_v40 = vmul.f32 %v3229_v20, %v1805_v36  ;;  %v1632_v8 = vmul.f32 %v4317_v26, %v4317_v26  ;;  %v535_v36 = vld [vmem:[%s3603_s6 + $0x1e8] sm:$0xff]  ;;  %v588_v58 = vpack.c.bf16 %v536_v28, %v534_v54 }
 0x1ec   : > { %1215 = vadd.xlane.f32.xlu2 %v1214_v63 }
 0x1ed   : > { %v1810_v59 = vsel %vm1809_vm12, %v3229_v20, %v1806_v40  ;;  %v1643_v20 = vmul.f32 %v4320_v62, %v4320_v62  ;;  %v1674_v34 = vsub.f32 %v1590_v29, %v1632_v8  ;;  %v589_v40 = vpack.c.bf16 %v537_v43, %v535_v36 }
 0x1ee   : > { %v4323_v63 = vmul.f32 %v2176_v0, %v1810_v59  ;;  %v4338_v59 = vadd.f32 %v4254_v5, %v4252_v21  ;;  %v4340_v0 = vadd.f32 %v1075_v3, %v961_v7  ;;  %v4346_v8 = vadd.f32 %v4265_v47, %v4263_v37 }
 0x1ef   : > { %v1716_v29 = vadd.f32 0.001, %v1674_v34 }
 0x1f0   : > { %5335 = vst [vmem:[#allocation36_spill] sm:$0xff] %v4340_v0  ;;  %3182 = vmatmul.msk.bf16.gmra.mxu3 %vm600_vm0, %v589_v40  ;;  %3161 = vmatmul.msk.bf16.gmra.mxu1 %vm600_vm0, %v589_v40  ;;  %v1209_v5 = vsel %vm1120_vm1, %v4338_v59, 0.0  ;;  %v1217_v21 = vsel %vm1120_vm1, %v4340_v0, 0.0 }
 0x1f1   : > { %975 = vmatmul.bf16.gmra.mxu2 %v588_v58  ;;  %747 = vmatmul.bf16.gmra.mxu0 %v588_v58  ;;  %v1210_v7 = vadd.f32 %v1209_v5, %v4346_v8  ;;  %vm1827_vm3 = vweird.f32 %v1716_v29 }
 0x200   : > { %v4354_v34 = vpop.xlane.xlu1 %1199 }
 0x203   : > { %v1448_v2 = vpop.xlane.xlu0 %1447 }
 0x204   : > { %v1601_v25 = vmul.f32 0.0051020407, %v1448_v2  ;;  %2408 = vperm.xlu2 %3203, %v4323_v63   ;;  %v733_v2 = vpop.f32.mrf.mxu0 }
 0x206   : > { %v1685_v19 = vsub.f32 %v1601_v25, %v1643_v20  ;;  %v4348_v20 = vadd.f32 %v847_v49, %v733_v2  ;;  %v2394_v25 = vpop.permute.xlu2 %2393  ;;  %v1338_v49 = vmul.f32 %v4340_v0, %v4340_v0 }
 0x208   : > { %v1727_v12 = vadd.f32 0.001, %v1685_v19  ;;  %5336 = vst [vmem:[#allocation37_spill] sm:$0xff] %v4348_v20  ;;  %v1218_v3 = vadd.f32 %v1217_v21, %v4348_v20  ;;  %v1337_v28 = vmul.f32 %v4348_v20, %v4348_v20  ;;  %v1469_v58 = vsel %vm1120_vm1, %v1338_v49, 0.0  ;;  %v2189_v20 = vld [vmem:[%s4004_s26 + $0x90] sm:$0xff] }
 0x20a   : > { %3230 = vrsqrt.f32 %v1727_v12  ;;  %vm1937_vm14 = vweird.f32 %v1727_v12 }
 0x20b   : > { %3232 = vrsqrt.f32 %v1716_v29 }
 0x210   : > { %v3231_v19 = vpop.eup %3230 }
 0x211   : > { %v1932_v54 = vmul.f32 %v3231_v19, %v1727_v12  ;;  %v3233_v47 = vpop.eup %3232  ;;  %vm1938_vm13 = vweird.f32 %v3231_v19 }
 0x212   : > { %v1822_v40 = vmul.f32 %v3233_v47, %v1716_v29  ;;  %vm1939_vm15 = vmor %vm1937_vm14, %vm1938_vm13  ;;  %vm1828_vm2 = vweird.f32 %v3233_v47  ;;  %v735_v29 = vpop.f32.mrf.mxu0 }
 0x213   : > { %1211 = vadd.xlane.f32.xlu1 %v1210_v7  ;;  %v1933_v37 = vmul.f32 %v3231_v19, %v1932_v54  ;;  %v1470_v54 = vadd.f32 %v1469_v58, %v1337_v28  ;;  %vm1829_vm4 = vmor %vm1827_vm3, %vm1828_vm2 }
 0x214   : > { %1219 = vadd.xlane.f32.xlu0 %v1218_v3 }
 0x215   : > { %v1934_v36 = vmul.f32 0.5, %v1933_v37 }
 0x216   : > { %v4363_v43 = vpop.xlane.xlu2 %1455  ;;  %v2683_v3 = vpop.permute.xlu0 %2682 }
 0x217   : > { %5337 = vst [vmem:[#allocation38_spill] sm:$0xff] %v4363_v43  ;;  %v1935_v2 = vsub.f32 1.5, %v1934_v36  ;;  %v1823_v43 = vmul.f32 %v3233_v47, %v1822_v40 }
 0x218   : > { %v2389_v5 = vpop.permute.xlu1 %2388 }
 0x219   : > { %v2593_v21 = vmul.f32 %v2389_v5, %v3757_v11  ;;  %v2594_v7 = vmul.f32 %v2389_v5, %v3761_v16  ;;  %v1936_v0 = vmul.f32 %v3231_v19, %v1935_v2  ;;  %v2595_v11 = vmul.f32 %v2394_v25, %v3770_v24 }
 0x21a   : > { %v2596_v16 = vmul.f32 %v2394_v25, %v3774_v30  ;;  %v1824_v58 = vmul.f32 0.5, %v1823_v43  ;;  %v1336_v24 = vmul.f32 %v4298_v52, %v4298_v52  ;;  %v1335_v30 = vmul.f32 %v4304_v17, %v4304_v17 }
 0x21b   : > { %v2887_v37 = vadd.f32 %v2683_v3, %v2593_v21  ;;  %v2888_v49 = vadd.f32 %v2683_v3, %v2594_v7  ;;  %v1940_v46 = vsel %vm1939_vm15, %v3231_v19, %v1936_v0  ;;  %v2178_v19 = vld [vmem:[%s4004_s26 + $0x38] sm:$0xff]  ;;  %v1077_v3 = vpop.f32.mrf.mxu3 }
 0x21c   : > { %1471 = vadd.xlane.f32.xlu0 %v1470_v54  ;;  %v4369_v36 = vmul.f32 %v2189_v20, %v1940_v46  ;;  %v1825_v46 = vsub.f32 1.5, %v1824_v58  ;;  %v2262_v21 = vld [vmem:[%s4012_s30 + $0x38] sm:$0xff]  ;;  %v963_v54 = vpop.f32.mrf.mxu2 }
 0x21d   : > { %2971 = vst [vmem:[%s4276_s10 + $0x10] sm:$0xff] %v2887_v37  ;;  %v4391_v37 = vadd.f32 %v1077_v3, %v963_v54  ;;  %v541_v54 = vld [vmem:[%s3603_s6 + $0x218] sm:$0xff] }
 0x21e   : > { %2972 = vst.msk [vmem:[%s4276_s10 + $0x18] sm:$0xff] %vm1120_vm1, %v2888_v49  ;;  %v2688_v12 = vpop.permute.xlu2 %2687  ;;  %v4377_v28 = vmul.f32 %v4369_v36, %v4320_v62  ;;  %v1826_v0 = vmul.f32 %v3233_v47, %v1825_v46  ;;  %v1465_v62 = vsel %vm1120_vm1, %v1336_v24, 0.0  ;;  %v849_v49 = vpop.f32.mrf.mxu1 }
 0x21f   : > { %v2889_v2 = vadd.f32 %v2688_v12, %v2595_v11  ;;  %v2890_v40 = vadd.f32 %v2688_v12, %v2596_v16  ;;  %v1466_v20 = vadd.f32 %v1465_v62, %v1335_v30  ;;  %v4393_v11 = vadd.f32 %v849_v49, %v735_v29  ;;  %v2260_v12 = vld [vmem:[%s4012_s30 + $0x28] sm:$0xff] }
 0x220   : > { %v1830_v25 = vsel %vm1829_vm4, %v3233_v47, %v1826_v0  ;;  %v4399_v47 = vmul.f32 0.0051020407, %v4354_v34  ;;  %v1589_v16 = vmul.f32 0.0051020407, %v4044_v53  ;;  %v1334_v29 = vmul.f32 %v4338_v59, %v4338_v59 }
 0x221   : > { %2973 = vst [vmem:[%s4276_s10 + $0x20] sm:$0xff] %v2889_v2  ;;  %v2220_v43 = vmul.f32 %v2178_v19, %v1830_v25 }
 0x222   : > { %2974 = vst.msk [vmem:[%s4276_s10 + $0x28] sm:$0xff] %vm1120_vm1, %v2890_v40  ;;  %v1644_v46 = vmul.f32 %v4399_v47, %v4399_v47 }
 0x223   : > { %v2304_v5 = vmul.f32 %v2220_v43, %v4317_v26  ;;  %v2302_v26 = vmul.f32 %v4323_v63, %v4247_v51 }
 0x224   : > { %v4413_v0 = vpop.f32.mrf.mxu2 }
 0x225   : > { %v2346_v7 = vsub.f32 %v2262_v21, %v2304_v5  ;;  %v2344_v34 = vsub.f32 %v2260_v12, %v2302_v26  ;;  %v540_v5 = vld [vmem:[%s3603_s6 + $0x210] sm:$0xff]  ;;  %v539_v21 = vld [vmem:[%s3603_s6 + $0x208] sm:$0xff]  ;;  %v4426_v26 = vpop.f32.mrf.mxu0  ;;  %v4431_v12 = vmul.f32 0.0051020407, %v4076_v6 }
 0x226   : > { %v591_v49 = vpack.c.bf16 %v541_v54, %v539_v21  ;;  %v2399_v54 = vpop.permute.xlu2 %2398 }
 0x227   : > { %v1635_v6 = vmul.f32 %v4431_v12, %v4431_v12  ;;  %v2598_v52 = vmul.f32 %v2399_v54, %v3792_v48 }
 0x228   : > { %3183 = vmatmul.msk.bf16.gmra.mxu3 %vm600_vm0, %v591_v49  ;;  %3162 = vmatmul.msk.bf16.gmra.mxu1 %vm600_vm0, %v591_v49 }
 0x22c   : > { %2403 = vperm.xlu1 %3202, %v4294_v1   ;;  %v4396_v1 = vmul.f32 0.0051020407, %v4033_v50 }
 0x22d   : > { %1467 = vadd.xlane.f32.xlu2 %v1466_v20 }
 0x22e   : > { %v1631_v2 = vmul.f32 %v4396_v1, %v4396_v1 }
 0x230   : > { %2418 = vperm.xlu0 %3201, %v2220_v43   ;;  %v1673_v24 = vsub.f32 %v1589_v16, %v1631_v2  ;;  %v538_v43 = vld [vmem:[%s3603_s6 + $0x200] sm:$0xff]  ;;  %v4428_v16 = vpop.f32.mrf.mxu1 }
 0x232   : > { %v4411_v63 = vadd.f32 0.001, %v1673_v24 }
 0x233   : > { %v4415_v20 = vpop.f32.mrf.mxu3 }
 0x234   : > { %vm1817_vm12 = vweird.f32 %v4411_v63 }
 0x238   : > { %2712 = vperm.xlu0 %3201, %v2346_v7   ;;  %v590_v7 = vpack.c.bf16 %v540_v5, %v538_v43 }
 0x23a   : > { %980 = vmatmul.bf16.gmra.mxu2 %v590_v7  ;;  %752 = vmatmul.bf16.gmra.mxu0 %v590_v7  ;;  %v4446_v7 = vmul.f32 0.0051020407, %v4054_v42  ;;  %v2597_v42 = vmul.f32 %v2399_v54, %v3790_v44 }
 0x241   : > { %v1208_v58 = vpop.xlane.xlu0 %1207 }
 0x242   : > { %v4409_v51 = vmul.f32 0.0051020407, %v1208_v58 }
 0x243   : > { %v1452_v40 = vpop.xlane.xlu1 %1451 }
 0x244   : > { %v1602_v50 = vmul.f32 0.0051020407, %v1452_v40  ;;  %v1646_v25 = vmul.f32 %v4409_v51, %v4409_v51  ;;  %v1333_v40 = vmul.f32 %v4346_v8, %v4346_v8 }
 0x245   : > { %2702 = vperm.xlu2 %3203, %v2344_v34   ;;  %v1461_v34 = vsel %vm1120_vm1, %v1334_v29, 0.0 }
 0x246   : > { %v1686_v30 = vsub.f32 %v1602_v50, %v1644_v46  ;;  %v1593_v46 = vmul.f32 0.0051020407, %v4088_v27 }
 0x248   : > { %v1728_v53 = vadd.f32 0.001, %v1686_v30  ;;  %v1677_v43 = vsub.f32 %v1593_v46, %v1635_v6  ;;  %v1591_v46 = vmul.f32 0.0051020407, %v4074_v38 }
 0x249   : > { %v1460_v62 = vpop.xlane.xlu0 %1459 }
 0x24a   : > { %3234 = vrsqrt.f32 %v1728_v53  ;;  %v1604_v19 = vmul.f32 0.0051020407, %v1460_v62  ;;  %v1462_v62 = vadd.f32 %v1461_v34, %v1333_v40  ;;  %v740_v40 = vpop.f32.mrf.mxu0  ;;  %v4451_v34 = vadd.f32 0.001, %v1677_v43 }
 0x24b   : > { %3236 = vrsqrt.f32 %v4411_v63  ;;  %vm1947_vm6 = vweird.f32 %v1728_v53 }
 0x24c   : > { %v1688_v3 = vsub.f32 %v1604_v19, %v1646_v25  ;;  %v968_v25 = vpop.f32.mrf.mxu2  ;;  %v1082_v19 = vpop.f32.mrf.mxu3  ;;  %vm1857_vm15 = vweird.f32 %v4451_v34 }
 0x24d   : > { %v4448_v29 = vadd.f32 %v1082_v19, %v968_v25  ;;  %v1633_v19 = vmul.f32 %v4446_v7, %v4446_v7 }
 0x24e   : > { %v1730_v58 = vadd.f32 0.001, %v1688_v3 }
 0x24f   : > { %5338 = vst [vmem:[#allocation39_spill] sm:$0xff] %v4448_v29  ;;  %v1675_v48 = vsub.f32 %v1591_v46, %v1633_v19  ;;  %v2192_v46 = vld [vmem:[%s4004_s26 + $0xa8] sm:$0xff] }
 0x250   : > { %v3235_v2 = vpop.eup %3234  ;;  %3238 = vrsqrt.f32 %v1730_v58  ;;  %vm1967_vm9 = vweird.f32 %v1730_v58 }
 0x251   : > { %v1942_v50 = vmul.f32 %v3235_v2, %v1728_v53  ;;  %v4439_v24 = vpop.eup %3236  ;;  %vm1948_vm5 = vweird.f32 %v3235_v2  ;;  %v1229_v53 = vsel %vm1120_vm1, %v4448_v29, 0.0  ;;  %3240 = vrsqrt.f32 %v4451_v34 }
 0x252   : > { %v1812_v21 = vmul.f32 %v4439_v24, %v4411_v63  ;;  %vm1949_vm7 = vmor %vm1947_vm6, %vm1948_vm5  ;;  %vm1818_vm11 = vweird.f32 %v4439_v24 }
 0x253   : > { %v1943_v30 = vmul.f32 %v3235_v2, %v1942_v50  ;;  %v854_v50 = vpop.f32.mrf.mxu1  ;;  %vm1819_vm13 = vmor %vm1817_vm12, %vm1818_vm11 }
 0x254   : > { %v4459_v38 = vadd.f32 %v854_v50, %v740_v40 }
 0x255   : > { %v1944_v5 = vmul.f32 0.5, %v1943_v30  ;;  %v2190_v30 = vld [vmem:[%s4004_s26 + $0x98] sm:$0xff] }
 0x256   : > { %1463 = vadd.xlane.f32.xlu1 %v1462_v62  ;;  %v3239_v27 = vpop.eup %3238  ;;  %v1813_v62 = vmul.f32 %v4439_v24, %v1812_v21  ;;  %5339 = vst [vmem:[#allocation40_spill] sm:$0xff] %v4459_v38 }
 0x257   : > { %v1945_v3 = vsub.f32 1.5, %v1944_v5  ;;  %v1962_v49 = vmul.f32 %v3239_v27, %v1730_v58  ;;  %vm1968_vm8 = vweird.f32 %v3239_v27  ;;  %v4483_v58 = vadd.f32 %v4415_v20, %v4413_v0 }
 0x258   : > { %v1814_v54 = vmul.f32 0.5, %v1813_v62  ;;  %vm1969_vm10 = vmor %vm1967_vm9, %vm1968_vm8 }
 0x259   : > { %v1946_v6 = vmul.f32 %v3235_v2, %v1945_v3  ;;  %v1963_v25 = vmul.f32 %v3239_v27, %v1962_v49  ;;  %5340 = vst [vmem:[#allocation41_spill] sm:$0xff] %v4483_v58  ;;  %v1225_v0 = vsel %vm1120_vm1, %v4483_v58, 0.0 }
 0x25b   : > { %v2693_v5 = vpop.permute.xlu1 %2692  ;;  %v1950_v43 = vsel %vm1949_vm7, %v3235_v2, %v1946_v6  ;;  %v1964_v3 = vmul.f32 0.5, %v1963_v25  ;;  %v1230_v2 = vadd.f32 %v1229_v53, %v4459_v38  ;;  %v1717_v6 = vadd.f32 0.001, %v1675_v48 }
 0x25c   : > { %v2891_v21 = vadd.f32 %v2693_v5, %v2597_v42  ;;  %v2892_v44 = vadd.f32 %v2693_v5, %v2598_v52  ;;  %v4463_v17 = vmul.f32 %v2190_v30, %v1950_v43  ;;  %v1344_v52 = vmul.f32 %v4448_v29, %v4448_v29  ;;  %v3241_v42 = vpop.eup %3240 }
 0x25d   : > { %v1965_v49 = vsub.f32 1.5, %v1964_v3  ;;  %v1815_v30 = vsub.f32 1.5, %v1814_v54  ;;  %3242 = vrsqrt.f32 %v1717_v6  ;;  %v4495_v43 = vadd.f32 %v4428_v16, %v4426_v26 }
 0x25e   : > { %2975 = vst [vmem:[%s4276_s10 + $0x30] sm:$0xff] %v2891_v21  ;;  %v4469_v40 = vmul.f32 %v4463_v17, %v4399_v47  ;;  %v1343_v47 = vmul.f32 %v4459_v38, %v4459_v38  ;;  %v1481_v19 = vsel %vm1120_vm1, %v1344_v52, 0.0  ;;  %v2177_v21 = vld [vmem:[%s4004_s26 + $0x30] sm:$0xff]  ;;  %vm1858_vm14 = vweird.f32 %v3241_v42 }
 0x25f   : > { %2976 = vst.msk [vmem:[%s4276_s10 + $0x38] sm:$0xff] %vm1120_vm1, %v2892_v44  ;;  %v1966_v50 = vmul.f32 %v3239_v27, %v1965_v49  ;;  %v1816_v53 = vmul.f32 %v4439_v24, %v1815_v30  ;;  %v1226_v48 = vadd.f32 %v1225_v0, %v4495_v43  ;;  %v2261_v52 = vld [vmem:[%s4012_s30 + $0x30] sm:$0xff]  ;;  %vm1859_vm2 = vmor %vm1857_vm15, %vm1858_vm14  ;;  %v2698_v0 = vpop.permute.xlu0 %2697  ;;  %vm1837_vm4 = vweird.f32 %v1717_v6 }
 0x260   : > { %5341 = vst [vmem:[#allocation42_spill] sm:$0xff] %v4495_v43  ;;  %v1482_v3 = vadd.f32 %v1481_v19, %v1343_v47  ;;  %v1342_v38 = vmul.f32 %v4483_v58, %v4483_v58 }
 0x261   : > { %v1970_v62 = vsel %vm1969_vm10, %v3239_v27, %v1966_v50  ;;  %v1852_v27 = vmul.f32 %v3241_v42, %v4451_v34  ;;  %v1820_v20 = vsel %vm1819_vm13, %v4439_v24, %v1816_v53 }
 0x262   : > { %1231 = vadd.xlane.f32.xlu0 %v1230_v2  ;;  %v4479_v25 = vmul.f32 %v2192_v46, %v1970_v62  ;;  %v2219_v54 = vmul.f32 %v2177_v21, %v1820_v20  ;;  %v2181_v62 = vld [vmem:[%s4004_s26 + $0x50] sm:$0xff]  ;;  %v2179_v20 = vld [vmem:[%s4004_s26 + $0x40] sm:$0xff] }
 0x263   : > { %v3243_v44 = vpop.eup %3242  ;;  %v1085_v53 = vpop.f32.mrf.mxu3  ;;  %v2265_v21 = vld [vmem:[%s4012_s30 + $0x50] sm:$0xff] }
 0x264   : > { %v4488_v5 = vmul.f32 %v4479_v25, %v4409_v51  ;;  %v1853_v51 = vmul.f32 %v3241_v42, %v1852_v27  ;;  %v1832_v49 = vmul.f32 %v3243_v44, %v1717_v6  ;;  %v2303_v16 = vmul.f32 %v2219_v54, %v4396_v1  ;;  %v971_v1 = vpop.f32.mrf.mxu2 }
 0x265   : > { %vm1838_vm3 = vweird.f32 %v3243_v44 }
 0x266   : > { %v1854_v26 = vmul.f32 0.5, %v1853_v51  ;;  %v1833_v2 = vmul.f32 %v3243_v44, %v1832_v49  ;;  %v2345_v50 = vsub.f32 %v2261_v52, %v2303_v16  ;;  %vm1839_vm5 = vmor %vm1837_vm4, %vm1838_vm3 }
 0x268   : > { %v1855_v63 = vsub.f32 1.5, %v1854_v26  ;;  %v1834_v46 = vmul.f32 0.5, %v1833_v2 }
 0x26a   : > { %1483 = vadd.xlane.f32.xlu0 %v1482_v3  ;;  %v1856_v30 = vmul.f32 %v3241_v42, %v1855_v63  ;;  %v1835_v47 = vsub.f32 1.5, %v1834_v46  ;;  %v4507_v3 = vadd.f32 %v1085_v53, %v971_v1  ;;  %v545_v1 = vld [vmem:[%s3603_s6 + $0x238] sm:$0xff] }
 0x26b   : > { %v1087_v46 = vpop.f32.mrf.mxu3 }
 0x26c   : > { %v1860_v24 = vsel %vm1859_vm2, %v3241_v42, %v1856_v30  ;;  %v1836_v27 = vmul.f32 %v3243_v44, %v1835_v47  ;;  %v743_v42 = vpop.f32.mrf.mxu0  ;;  %v542_v30 = vld [vmem:[%s3603_s6 + $0x220] sm:$0xff] }
 0x26d   : > { %v2223_v19 = vmul.f32 %v2181_v62, %v1860_v24  ;;  %v544_v24 = vld [vmem:[%s3603_s6 + $0x230] sm:$0xff]  ;;  %v543_v62 = vld [vmem:[%s3603_s6 + $0x228] sm:$0xff] }
 0x26e   : > { %1227 = vadd.xlane.f32.xlu2 %v1226_v48  ;;  %v1840_v34 = vsel %vm1839_vm5, %v3243_v44, %v1836_v27  ;;  %v857_v48 = vpop.f32.mrf.mxu1  ;;  %v592_v27 = vpack.c.bf16 %v544_v24, %v542_v30 }
 0x26f   : > { %2413 = vperm.xlu1 %3202, %v2219_v54   ;;  %v2307_v51 = vmul.f32 %v2223_v19, %v4431_v12  ;;  %v4512_v54 = vadd.f32 %v857_v48, %v743_v42  ;;  %v4514_v49 = vmul.f32 %v2179_v20, %v1840_v34  ;;  %v4519_v12 = vpop.xlane.xlu2 %1215  ;;  %v593_v20 = vpack.c.bf16 %v545_v1, %v543_v62 }
 0x270   : > { %985 = vmatmul.bf16.gmra.mxu2 %v592_v27  ;;  %757 = vmatmul.bf16.gmra.mxu0 %v592_v27  ;;  %v1221_v48 = vsel %vm1120_vm1, %v4391_v37, 0.0  ;;  %v1339_v1 = vmul.f32 %v4393_v11, %v4393_v11 }
 0x271   : > { %v2349_v26 = vsub.f32 %v2265_v21, %v2307_v51  ;;  %3184 = vmatmul.msk.bf16.gmra.mxu3 %vm600_vm0, %v593_v20  ;;  %3163 = vmatmul.msk.bf16.gmra.mxu1 %vm600_vm0, %v593_v20 }
 0x274   : > { %v745_v47 = vpop.f32.mrf.mxu0 }
 0x277   : > { %2707 = vperm.xlu1 %3202, %v2345_v50   ;;  %v973_v50 = vpop.f32.mrf.mxu2  ;;  %v2409_v42 = vpop.permute.xlu2 %2408 }
 0x278   : > { %v4529_v51 = vadd.f32 %v1087_v46, %v973_v50 }
 0x27a   : > { %5342 = vst [vmem:[#allocation43_spill] sm:$0xff] %v4529_v51 }
 0x27e   : > { %2433 = vperm.xlu0 %3201, %v2223_v19   ;;  %v859_v19 = vpop.f32.mrf.mxu1 }
 0x27f   : > { %v4531_v34 = vadd.f32 %v859_v19, %v745_v47  ;;  %v976_v62 = vpop.f32.mrf.mxu2  ;;  %v1090_v47 = vpop.f32.mrf.mxu3  ;;  %v548_v19 = vld [vmem:[%s3603_s6 + $0x250] sm:$0xff] }
 0x281   : > { %5343 = vst [vmem:[#allocation44_spill] sm:$0xff] %v4531_v34 }
 0x286   : > { %2423 = vperm.xlu2 %3203, %v4514_v49   ;;  %2727 = vperm.xlu0 %3201, %v2349_v26   ;;  %v4533_v21 = vpop.xlane.xlu1 %1211  ;;  %v862_v29 = vpop.f32.mrf.mxu1 }
 0x287   : > { %v1220_v6 = vpop.xlane.xlu0 %1219 }
 0x288   : > { %v4517_v16 = vmul.f32 0.0051020407, %v1220_v6 }
 0x28a   : > { %v1649_v44 = vmul.f32 %v4517_v16, %v4517_v16 }
 0x28f   : > { %v1472_v2 = vpop.xlane.xlu0 %1471 }
 0x290   : > { %v1607_v63 = vmul.f32 0.0051020407, %v1472_v2 }
 0x292   : > { %v1691_v52 = vsub.f32 %v1607_v63, %v1649_v44  ;;  %v1222_v63 = vadd.f32 %v1221_v48, %v4393_v11  ;;  %v549_v48 = vld [vmem:[%s3603_s6 + $0x258] sm:$0xff] }
 0x294   : > { %v4527_v53 = vadd.f32 0.001, %v1691_v52  ;;  %v1340_v52 = vmul.f32 %v4391_v37, %v4391_v37 }
 0x296   : > { %3244 = vrsqrt.f32 %v4527_v53  ;;  %vm1997_vm6 = vweird.f32 %v4527_v53 }
 0x29c   : > { %v4540_v26 = vpop.eup %3244 }
 0x29d   : > { %v1992_v50 = vmul.f32 %v4540_v26, %v4527_v53  ;;  %vm1998_vm7 = vweird.f32 %v4540_v26 }
 0x29e   : > { %v2404_v6 = vpop.permute.xlu1 %2403  ;;  %vm1999_vm8 = vmor %vm1997_vm6, %vm1998_vm7 }
 0x29f   : > { %v2599_v44 = vmul.f32 %v2404_v6, %v3802_v55  ;;  %v2600_v2 = vmul.f32 %v2404_v6, %v3805_v60  ;;  %v546_v55 = vld [vmem:[%s3603_s6 + $0x240] sm:$0xff]  ;;  %v547_v60 = vld [vmem:[%s3603_s6 + $0x248] sm:$0xff]  ;;  %v1473_v6 = vsel %vm1120_vm1, %v1340_v52, 0.0  ;;  %v2601_v52 = vmul.f32 %v2409_v42, %v3817_v13 }
 0x2a0   : > { %v4549_v24 = vpop.xlane.xlu2 %1467  ;;  %v594_v20 = vpack.c.bf16 %v548_v19, %v546_v55  ;;  %v1341_v55 = vmul.f32 %v4495_v43, %v4495_v43 }
 0x2a1   : > { %v2893_v46 = vadd.f32 %v2698_v0, %v2599_v44  ;;  %v2894_v30 = vadd.f32 %v2698_v0, %v2600_v2  ;;  %1223 = vadd.xlane.f32.xlu1 %v1222_v63  ;;  %v1993_v0 = vmul.f32 %v4540_v26, %v1992_v50  ;;  %v4562_v44 = vadd.f32 %v1090_v47, %v976_v62  ;;  %v748_v63 = vpop.f32.mrf.mxu0 }
 0x2a2   : > { %v2419_v27 = vpop.permute.xlu0 %2418  ;;  %v595_v2 = vpack.c.bf16 %v549_v48, %v547_v60  ;;  %990 = vmatmul.bf16.gmra.mxu2 %v594_v20  ;;  %762 = vmatmul.bf16.gmra.mxu0 %v594_v20  ;;  %v2602_v50 = vmul.f32 %v2409_v42, %v3815_v9  ;;  %v4570_v47 = vadd.f32 %v862_v29, %v748_v63  ;;  %v1477_v20 = vsel %vm1120_vm1, %v1342_v38, 0.0 }
 0x2a3   : > { %2977 = vst [vmem:[%s4276_s10 + $0x40] sm:$0xff] %v2893_v46  ;;  %v1474_v46 = vadd.f32 %v1473_v6, %v1339_v1  ;;  %v1241_v19 = vsel %vm1120_vm1, %v4562_v44, 0.0  ;;  %v2605_v60 = vmul.f32 %v2419_v27, %v3841_v39  ;;  %v2606_v13 = vmul.f32 %v2419_v27, %v3838_v35 }
 0x2a4   : > { %2978 = vst.msk [vmem:[%s4276_s10 + $0x48] sm:$0xff] %vm1120_vm1, %v2894_v30  ;;  %3185 = vmatmul.msk.bf16.gmra.mxu3 %vm600_vm0, %v595_v2  ;;  %3164 = vmatmul.msk.bf16.gmra.mxu1 %vm600_vm0, %v595_v2  ;;  %v1994_v30 = vmul.f32 0.5, %v1993_v0  ;;  %v1242_v6 = vadd.f32 %v1241_v19, %v4570_v47  ;;  %v1478_v2 = vadd.f32 %v1477_v20, %v1341_v55  ;;  %v2264_v55 = vld [vmem:[%s4012_s30 + $0x48] sm:$0xff]  ;;  %v1563_v19 = vmul.f32 0.0051020407, %v4533_v21 }
 0x2a5   : > { %v1350_v39 = vmul.f32 %v4562_v44, %v4562_v44  ;;  %v1349_v35 = vmul.f32 %v4570_v47, %v4570_v47 }
 0x2a6   : > { %v1995_v0 = vsub.f32 1.5, %v1994_v30  ;;  %v2305_v30 = vmul.f32 %v4514_v49, %v4446_v7  ;;  %v2268_v49 = vld [vmem:[%s4012_s30 + $0x68] sm:$0xff] }
 0x2a7   : > { %v1493_v38 = vsel %vm1120_vm1, %v1350_v39, 0.0 }
 0x2a8   : > { %v2703_v62 = vpop.permute.xlu2 %2702  ;;  %v1996_v27 = vmul.f32 %v4540_v26, %v1995_v0 }
 0x2a9   : > { %1475 = vadd.xlane.f32.xlu1 %v1474_v46  ;;  %v2895_v1 = vadd.f32 %v2703_v62, %v2601_v52  ;;  %v2896_v9 = vadd.f32 %v2703_v62, %v2602_v50  ;;  %v2195_v46 = vld [vmem:[%s4004_s26 + $0xc0] sm:$0xff]  ;;  %v1494_v52 = vadd.f32 %v1493_v38, %v1349_v35 }
 0x2aa   : > { %v2713_v42 = vpop.permute.xlu0 %2712  ;;  %v2000_v63 = vsel %vm1999_vm8, %v4540_v26, %v1996_v27  ;;  %v2263_v62 = vld [vmem:[%s4012_s30 + $0x40] sm:$0xff] }
 0x2ab   : > { %2979 = vst [vmem:[%s4276_s10 + $0x50] sm:$0xff] %v2895_v1  ;;  %v2899_v48 = vadd.f32 %v2713_v42, %v2605_v60  ;;  %v2900_v29 = vadd.f32 %v2713_v42, %v2606_v13  ;;  %v4596_v50 = vmul.f32 %v2195_v46, %v2000_v63  ;;  %v2347_v26 = vsub.f32 %v2263_v62, %v2305_v30  ;;  %v1092_v42 = vpop.f32.mrf.mxu3 }
 0x2ac   : > { %2980 = vst.msk [vmem:[%s4276_s10 + $0x58] sm:$0xff] %vm1120_vm1, %v2896_v9  ;;  %v2348_v60 = vsub.f32 %v2264_v55, %v4112_v57  ;;  %v1647_v1 = vmul.f32 %v1563_v19, %v1563_v19  ;;  %v2352_v57 = vsub.f32 %v2268_v49, %v4185_v22  ;;  %v4621_v46 = vmul.f32 0.0051020407, %v4084_v56 }
 0x2ad   : > { %2983 = vst [vmem:[%s4276_s10 + $0x70] sm:$0xff] %v2899_v48  ;;  %v4600_v53 = vmul.f32 %v4596_v50, %v4517_v16  ;;  %v978_v16 = vpop.f32.mrf.mxu2  ;;  %v750_v48 = vpop.f32.mrf.mxu0  ;;  %v1594_v22 = vmul.f32 0.0051020407, %v4097_v32 }
 0x2ae   : > { %2984 = vst.msk [vmem:[%s4276_s10 + $0x78] sm:$0xff] %vm1120_vm1, %v2900_v29  ;;  %v4611_v21 = vadd.f32 %v1092_v42, %v978_v16  ;;  %v1636_v55 = vmul.f32 %v4621_v46, %v4621_v46  ;;  %v2193_v16 = vld [vmem:[%s4004_s26 + $0xb0] sm:$0xff] }
 0x2af   : > { %1479 = vadd.xlane.f32.xlu2 %v1478_v2 }
 0x2b0   : > { %1243 = vadd.xlane.f32.xlu0 %v1242_v6 }
 0x2b3   : > { %v1095_v0 = vpop.f32.mrf.mxu3 }
 0x2b7   : > { %v753_v39 = vpop.f32.mrf.mxu0 }
 0x2b8   : > { %1495 = vadd.xlane.f32.xlu0 %v1494_v52 }
 0x2bd   : > { %v981_v6 = vpop.f32.mrf.mxu2 }
 0x2be   : > { %v4616_v2 = vadd.f32 %v1095_v0, %v981_v6  ;;  %v5344_v6 = vld [vmem:[#allocation2_spill] sm:$0xff] }
 0x2c2   : > { %2428 = vperm.xlu1 %3202, %v4105_v31   ;;  %v864_v31 = vpop.f32.mrf.mxu1 }
 0x2c3   : > { %v4613_v29 = vadd.f32 %v864_v31, %v750_v48 }
 0x2c7   : > { %2717 = vperm.xlu2 %3203, %v2347_v26  }
 0x2c9   : > { %v1464_v13 = vpop.xlane.xlu1 %1463 }
 0x2ca   : > { %v1605_v9 = vmul.f32 0.0051020407, %v1464_v13  ;;  %2722 = vperm.xlu1 %3202, %v2348_v60   ;;  %v867_v35 = vpop.f32.mrf.mxu1 }
 0x2cb   : > { %v4618_v38 = vadd.f32 %v867_v35, %v753_v39  ;;  %v550_v35 = vld [vmem:[%s3603_s6 + $0x260] sm:$0xff] }
 0x2cc   : > { %v1689_v20 = vsub.f32 %v1605_v9, %v1647_v1  ;;  %2448 = vperm.xlu0 %3201, %v4179_v10   ;;  %v1678_v1 = vsub.f32 %v1594_v22, %v1636_v55 }
 0x2ce   : > { %v1731_v7 = vadd.f32 0.001, %v1689_v20  ;;  %v4631_v31 = vadd.f32 0.001, %v1678_v1 }
 0x2d0   : > { %3246 = vrsqrt.f32 %v1731_v7  ;;  %vm1977_vm10 = vweird.f32 %v1731_v7  ;;  %vm1867_vm2 = vweird.f32 %v4631_v31 }
 0x2d4   : > { %2742 = vperm.xlu0 %3201, %v2352_v57  }
 0x2d5   : > { %v1232_v10 = vpop.xlane.xlu0 %1231 }
 0x2d6   : > { %v3247_v27 = vpop.eup %3246  ;;  %v4623_v30 = vmul.f32 0.0051020407, %v1232_v10  ;;  %v551_v10 = vld [vmem:[%s3603_s6 + $0x268] sm:$0xff] }
 0x2d7   : > { %v1972_v63 = vmul.f32 %v3247_v27, %v1731_v7  ;;  %vm1978_vm9 = vweird.f32 %v3247_v27 }
 0x2d8   : > { %v1652_v60 = vmul.f32 %v4623_v30, %v4623_v30  ;;  %vm1979_vm11 = vmor %vm1977_vm10, %vm1978_vm9 }
 0x2d9   : > { %v1973_v52 = vmul.f32 %v3247_v27, %v1972_v63 }
 0x2db   : > { %v1974_v62 = vmul.f32 0.5, %v1973_v52 }
 0x2dd   : > { %v1975_v26 = vsub.f32 1.5, %v1974_v62  ;;  %v1484_v13 = vpop.xlane.xlu0 %1483  ;;  %v553_v62 = vld [vmem:[%s3603_s6 + $0x278] sm:$0xff] }
 0x2de   : > { %v1610_v9 = vmul.f32 0.0051020407, %v1484_v13 }
 0x2df   : > { %v1976_v56 = vmul.f32 %v3247_v27, %v1975_v26  ;;  %v597_v26 = vpack.c.bf16 %v553_v62, %v551_v10  ;;  %v869_v10 = vpop.f32.mrf.mxu1 }
 0x2e0   : > { %v1694_v42 = vsub.f32 %v1610_v9, %v1652_v60  ;;  %v1233_v9 = vsel %vm1120_vm1, %v4507_v3, 0.0 }
 0x2e1   : > { %v2414_v32 = vpop.permute.xlu1 %2413  ;;  %v1980_v20 = vsel %vm1979_vm11, %v3247_v27, %v1976_v56  ;;  %v552_v27 = vld [vmem:[%s3603_s6 + $0x270] sm:$0xff]  ;;  %3186 = vmatmul.msk.bf16.gmra.mxu3 %vm600_vm0, %v597_v26  ;;  %3165 = vmatmul.msk.bf16.gmra.mxu1 %vm600_vm0, %v597_v26 }
 0x2e2   : > { %v1736_v48 = vadd.f32 0.001, %v1694_v42  ;;  %v4633_v49 = vmul.f32 %v2193_v16, %v1980_v20  ;;  %v2603_v7 = vmul.f32 %v2414_v32, %v3824_v18  ;;  %v2604_v0 = vmul.f32 %v2414_v32, %v5344_v6  ;;  %v983_v42 = vpop.f32.mrf.mxu2  ;;  %v1097_v20 = vpop.f32.mrf.mxu3 }
 0x2e3   : > { %v596_v22 = vpack.c.bf16 %v552_v27, %v550_v35  ;;  %v1234_v6 = vadd.f32 %v1233_v9, %v4512_v54  ;;  %v4659_v35 = vadd.f32 %v1097_v20, %v983_v42  ;;  %v755_v27 = vpop.f32.mrf.mxu0  ;;  %v5346_v9 = vld [vmem:[#allocation8_spill] sm:$0xff] }
 0x2e4   : > { %3248 = vrsqrt.f32 %v1736_v48  ;;  %v4636_v57 = vmul.f32 %v4633_v49, %v1563_v19  ;;  %v1237_v19 = vsel %vm1120_vm1, %v4529_v51, 0.0  ;;  %vm2027_vm12 = vweird.f32 %v1736_v48 }
 0x2e5   : > { %3250 = vrsqrt.f32 %v4631_v31  ;;  %995 = vmatmul.bf16.gmra.mxu2 %v596_v22  ;;  %767 = vmatmul.bf16.gmra.mxu0 %v596_v22  ;;  %v1238_v1 = vadd.f32 %v1237_v19, %v4531_v34  ;;  %v1345_v22 = vmul.f32 %v4512_v54, %v4512_v54  ;;  %v4664_v62 = vadd.f32 %v869_v10, %v755_v27 }
 0x2e9   : > { %v2708_v39 = vpop.permute.xlu1 %2707 }
 0x2ea   : > { %v2897_v63 = vadd.f32 %v2708_v39, %v2603_v7  ;;  %v2898_v52 = vadd.f32 %v2708_v39, %v2604_v0  ;;  %v3249_v55 = vpop.eup %3248  ;;  %v1346_v0 = vmul.f32 %v4507_v3, %v4507_v3 }
 0x2eb   : > { %v2022_v60 = vmul.f32 %v3249_v55, %v1736_v48  ;;  %v3251_v18 = vpop.eup %3250  ;;  %vm2028_vm13 = vweird.f32 %v3249_v55 }
 0x2ec   : > { %2981 = vst [vmem:[%s4276_s10 + $0x60] sm:$0xff] %v2897_v63  ;;  %v1862_v56 = vmul.f32 %v3251_v18, %v4631_v31  ;;  %vm2029_vm14 = vmor %vm2027_vm12, %vm2028_vm13  ;;  %v1485_v26 = vsel %vm1120_vm1, %v1346_v0, 0.0  ;;  %vm1868_vm15 = vweird.f32 %v3251_v18 }
 0x2ed   : > { %2982 = vst.msk [vmem:[%s4276_s10 + $0x68] sm:$0xff] %vm1120_vm1, %v2898_v52  ;;  %v2023_v13 = vmul.f32 %v3249_v55, %v2022_v60  ;;  %v2198_v52 = vld [vmem:[%s4004_s26 + $0xd8] sm:$0xff]  ;;  %vm1869_vm3 = vmor %vm1867_vm2, %vm1868_vm15  ;;  %v758_v31 = vpop.f32.mrf.mxu0 }
 0x2ee   : > { %v1863_v39 = vmul.f32 %v3251_v18, %v1862_v56 }
 0x2ef   : > { %v2024_v16 = vmul.f32 0.5, %v2023_v13  ;;  %v5345_v13 = vld [vmem:[#allocation7_spill] sm:$0xff] }
 0x2f0   : > { %v2434_v32 = vpop.permute.xlu0 %2433  ;;  %1239 = vadd.xlane.f32.xlu2 %v1238_v1  ;;  %v1864_v19 = vmul.f32 0.5, %v1863_v39  ;;  %v1356_v39 = vmul.f32 %v4659_v35, %v4659_v35 }
 0x2f1   : > { %v2025_v7 = vsub.f32 1.5, %v2024_v16  ;;  %v2611_v1 = vmul.f32 %v2434_v32, %v5345_v13  ;;  %v2612_v56 = vmul.f32 %v2434_v32, %v5346_v9  ;;  %v1253_v16 = vsel %vm1120_vm1, %v4659_v35, 0.0  ;;  %v2267_v13 = vld [vmem:[%s4012_s30 + $0x60] sm:$0xff] }
 0x2f2   : > { %v1254_v0 = vadd.f32 %v1253_v16, %v4664_v62  ;;  %v1865_v32 = vsub.f32 1.5, %v1864_v19  ;;  %v1505_v27 = vsel %vm1120_vm1, %v1356_v39, 0.0 }
 0x2f3   : > { %v2026_v63 = vmul.f32 %v3249_v55, %v2025_v7  ;;  %v986_v9 = vpop.f32.mrf.mxu2 }
 0x2f4   : > { %1235 = vadd.xlane.f32.xlu1 %v1234_v6  ;;  %v1486_v6 = vadd.f32 %v1485_v26, %v1345_v22  ;;  %v1866_v10 = vmul.f32 %v3251_v18, %v1865_v32  ;;  %v2182_v22 = vld [vmem:[%s4004_s26 + $0x58] sm:$0xff]  ;;  %v1228_v26 = vpop.xlane.xlu2 %1227 }
 0x2f5   : > { %v2030_v48 = vsel %vm2029_vm14, %v3249_v55, %v2026_v63 }
 0x2f6   : > { %v4667_v60 = vmul.f32 %v2198_v52, %v2030_v48  ;;  %v1870_v52 = vsel %vm1869_vm3, %v3251_v18, %v1866_v10  ;;  %v5347_v18 = vld [vmem:[#allocation29_spill] sm:$0xff] }
 0x2f7   : > { %v4688_v48 = vmul.f32 %v2182_v22, %v1870_v52  ;;  %v760_v22 = vpop.f32.mrf.mxu0 }
 0x2f8   : > { %v2728_v42 = vpop.permute.xlu0 %2727  ;;  %v4675_v20 = vmul.f32 %v4667_v60, %v4623_v30  ;;  %v1355_v30 = vmul.f32 %v4664_v62, %v4664_v62 }
 0x2f9   : > { %v2905_v55 = vadd.f32 %v2728_v42, %v2611_v1  ;;  %v2906_v7 = vadd.f32 %v2728_v42, %v2612_v56  ;;  %v1100_v56 = vpop.f32.mrf.mxu3  ;;  %v2351_v42 = vsub.f32 %v2267_v13, %v5347_v18 }
 0x2fa   : > { %v1506_v63 = vadd.f32 %v1505_v27, %v1355_v30  ;;  %v4702_v30 = vmul.f32 0.0051020407, %v1228_v26 }
 0x2fb   : > { %2989 = vst [vmem:[%s4276_s10 + $0xa0] sm:$0xff] %v2905_v55  ;;  %v4697_v55 = vadd.f32 %v1100_v56, %v986_v9 }
 0x2fc   : > { %1487 = vadd.xlane.f32.xlu1 %v1486_v6  ;;  %2990 = vst.msk [vmem:[%s4276_s10 + $0xa8] sm:$0xff] %vm1120_vm1, %v2906_v7  ;;  %v2424_v16 = vpop.permute.xlu2 %2423  ;;  %v872_v7 = vpop.f32.mrf.mxu1  ;;  %v1651_v56 = vmul.f32 %v4702_v30, %v4702_v30 }
 0x2fd   : > { %v4704_v27 = vadd.f32 %v872_v7, %v758_v31 }
 0x2fe   : > { %1255 = vadd.xlane.f32.xlu0 %v1254_v0 }
 0x301   : > { %v1102_v52 = vpop.f32.mrf.mxu3 }
 0x304   : > { %v874_v9 = vpop.f32.mrf.mxu1 }
 0x306   : > { %1507 = vadd.xlane.f32.xlu0 %v1506_v63  ;;  %v988_v63 = vpop.f32.mrf.mxu2 }
 0x307   : > { %v4707_v13 = vadd.f32 %v1102_v52, %v988_v63 }
 0x308   : > { %2438 = vperm.xlu2 %3203, %v4688_v48  }
 0x309   : > { %5348 = vst [vmem:[#allocation2_spill] sm:$0xff] %v4707_v13 }
 0x314   : > { %v1224_v19 = vpop.xlane.xlu1 %1223 }
 0x315   : > { %2443 = vperm.xlu1 %3202, %v4155_v14   ;;  %v4693_v1 = vmul.f32 0.0051020407, %v1224_v19  ;;  %v2271_v14 = vld [vmem:[%s4012_s30 + $0x80] sm:$0xff] }
 0x317   : > { %v1650_v0 = vmul.f32 %v4693_v1, %v4693_v1 }
 0x31a   : > { %2463 = vperm.xlu0 %3201, %v4249_v41   ;;  %v2355_v41 = vsub.f32 %v2271_v14, %v4258_v4 }
 0x31c   : > { %v1476_v6 = vpop.xlane.xlu1 %1475 }
 0x31d   : > { %v1608_v39 = vmul.f32 0.0051020407, %v1476_v6  ;;  %2737 = vperm.xlu1 %3202, %v2351_v42   ;;  %v4711_v42 = vadd.f32 %v874_v9, %v760_v22 }
 0x31f   : > { %v1692_v32 = vsub.f32 %v1608_v39, %v1650_v0  ;;  %v1348_v0 = vmul.f32 %v4529_v51, %v4529_v51  ;;  %v5349_v39 = vld [vmem:[#allocation3_spill] sm:$0xff] }
 0x320   : > { %v2607_v14 = vmul.f32 %v2424_v16, %v5349_v39 }
 0x321   : > { %v1734_v10 = vadd.f32 0.001, %v1692_v32  ;;  %v5350_v32 = vld [vmem:[#allocation4_spill] sm:$0xff] }
 0x322   : > { %v1480_v19 = vpop.xlane.xlu2 %1479  ;;  %2757 = vperm.xlu0 %3201, %v2355_v41   ;;  %v2608_v41 = vmul.f32 %v2424_v16, %v5350_v32 }
 0x323   : > { %3252 = vrsqrt.f32 %v1734_v10  ;;  %v1609_v18 = vmul.f32 0.0051020407, %v1480_v19  ;;  %v1244_v26 = vpop.xlane.xlu0 %1243  ;;  %vm2007_vm5 = vweird.f32 %v1734_v10 }
 0x324   : > { %v4713_v7 = vmul.f32 0.0051020407, %v1244_v26 }
 0x325   : > { %v1693_v31 = vsub.f32 %v1609_v18, %v1651_v56  ;;  %v1347_v18 = vmul.f32 %v4531_v34, %v4531_v34  ;;  %v2196_v34 = vld [vmem:[%s4004_s26 + $0xc8] sm:$0xff] }
 0x326   : > { %v4721_v22 = vmul.f32 %v4713_v7, %v4713_v7 }
 0x327   : > { %v1735_v4 = vadd.f32 0.001, %v1693_v31  ;;  %v1489_v31 = vsel %vm1120_vm1, %v1348_v0, 0.0 }
 0x329   : > { %v3253_v6 = vpop.eup %3252  ;;  %3254 = vrsqrt.f32 %v1735_v4  ;;  %vm2017_vm8 = vweird.f32 %v1735_v4 }
 0x32a   : > { %v2002_v63 = vmul.f32 %v3253_v6, %v1734_v10  ;;  %v2718_v52 = vpop.permute.xlu2 %2717  ;;  %vm2008_vm4 = vweird.f32 %v3253_v6 }
 0x32b   : > { %v2901_v9 = vadd.f32 %v2718_v52, %v2607_v14  ;;  %v2902_v56 = vadd.f32 %v2718_v52, %v2608_v41  ;;  %v1496_v26 = vpop.xlane.xlu0 %1495  ;;  %v1490_v14 = vadd.f32 %v1489_v31, %v1347_v18  ;;  %vm2009_vm6 = vmor %vm2007_vm5, %vm2008_vm4  ;;  %v2197_v18 = vld [vmem:[%s4004_s26 + $0xd0] sm:$0xff]  ;;  %v5351_v31 = vld [vmem:[#allocation6_spill] sm:$0xff] }
 0x32c   : > { %v2003_v19 = vmul.f32 %v3253_v6, %v2002_v63  ;;  %v4726_v39 = vmul.f32 0.0051020407, %v1496_v26 }
 0x32d   : > { %2985 = vst [vmem:[%s4276_s10 + $0x80] sm:$0xff] %v2901_v9 }
 0x32e   : > { %v2004_v16 = vmul.f32 0.5, %v2003_v19  ;;  %2986 = vst.msk [vmem:[%s4276_s10 + $0x88] sm:$0xff] %vm1120_vm1, %v2902_v56 }
 0x32f   : > { %v3255_v51 = vpop.eup %3254 }
 0x330   : > { %v2005_v63 = vsub.f32 1.5, %v2004_v16  ;;  %v2012_v41 = vmul.f32 %v3255_v51, %v1735_v4  ;;  %vm2018_vm7 = vweird.f32 %v3255_v51 }
 0x331   : > { %1491 = vadd.xlane.f32.xlu2 %v1490_v14  ;;  %vm2019_vm9 = vmor %vm2017_vm8, %vm2018_vm7  ;;  %v5352_v14 = vld [vmem:[#allocation5_spill] sm:$0xff] }
 0x332   : > { %v2006_v52 = vmul.f32 %v3253_v6, %v2005_v63  ;;  %v2013_v0 = vmul.f32 %v3255_v51, %v2012_v41 }
 0x334   : > { %v2429_v26 = vpop.permute.xlu1 %2428  ;;  %v2010_v19 = vsel %vm2009_vm6, %v3253_v6, %v2006_v52  ;;  %v2014_v9 = vmul.f32 0.5, %v2013_v0 }
 0x335   : > { %v4734_v58 = vmul.f32 %v2196_v34, %v2010_v19  ;;  %v2609_v63 = vmul.f32 %v2429_v26, %v5351_v31  ;;  %v2610_v41 = vmul.f32 %v2429_v26, %v5352_v14  ;;  %v1245_v26 = vsel %vm1120_vm1, %v4611_v21, 0.0 }
 0x336   : > { %v2015_v56 = vsub.f32 1.5, %v2014_v9  ;;  %v991_v9 = vpop.f32.mrf.mxu2  ;;  %v1246_v31 = vadd.f32 %v1245_v26, %v4613_v29  ;;  %v1351_v26 = vmul.f32 %v4613_v29, %v4613_v29 }
 0x337   : > { %v4738_v16 = vmul.f32 %v4734_v58, %v4693_v1 }
 0x338   : > { %v2016_v10 = vmul.f32 %v3255_v51, %v2015_v56  ;;  %v1105_v56 = vpop.f32.mrf.mxu3 }
 0x33a   : > { %v2020_v6 = vsel %vm2019_vm9, %v3255_v51, %v2016_v10  ;;  %v4754_v51 = vadd.f32 %v1105_v56, %v991_v9  ;;  %v877_v10 = vpop.f32.mrf.mxu1 }
 0x33b   : > { %v4743_v34 = vmul.f32 %v2197_v18, %v2020_v6  ;;  %v763_v18 = vpop.f32.mrf.mxu0  ;;  %v5357_v6 = vld [vmem:[#allocation14_spill] sm:$0xff] }
 0x33c   : > { %v2723_v52 = vpop.permute.xlu1 %2722  ;;  %5355 = vst [vmem:[#allocation29_spill] sm:$0xff] %v4754_v51  ;;  %v4761_v14 = vadd.f32 %v877_v10, %v763_v18  ;;  %v1265_v9 = vsel %vm1120_vm1, %v4754_v51, 0.0 }
 0x33d   : > { %5353 = vst [vmem:[#allocation7_spill] sm:$0xff] %v4743_v34  ;;  %v2903_v0 = vadd.f32 %v2723_v52, %v2609_v63  ;;  %v2904_v19 = vadd.f32 %v2723_v52, %v2610_v41  ;;  %v4747_v1 = vmul.f32 %v4743_v34, %v4702_v30  ;;  %v2308_v63 = vmul.f32 %v4688_v48, %v4621_v46  ;;  %v2266_v41 = vld [vmem:[%s4012_s30 + $0x58] sm:$0xff] }
 0x33e   : > { %v2449_v4 = vpop.permute.xlu0 %2448  ;;  %v1352_v30 = vmul.f32 %v4611_v21, %v4611_v21  ;;  %5356 = vst [vmem:[#allocation3_spill] sm:$0xff] %v4761_v14  ;;  %v1266_v18 = vadd.f32 %v1265_v9, %v4761_v14  ;;  %v2270_v9 = vld [vmem:[%s4012_s30 + $0x78] sm:$0xff] }
 0x33f   : > { %5354 = vst [vmem:[#allocation8_spill] sm:$0xff] %v4747_v1  ;;  %v2617_v52 = vmul.f32 %v2449_v4, %v5357_v6  ;;  %v2350_v32 = vsub.f32 %v2266_v41, %v2308_v63  ;;  %v1361_v6 = vmul.f32 %v4761_v14, %v4761_v14  ;;  %v993_v41 = vpop.f32.mrf.mxu2  ;;  %v555_v14 = vld [vmem:[%s3603_s6 + $0x288] sm:$0xff] }
 0x340   : > { %2987 = vst [vmem:[%s4276_s10 + $0x90] sm:$0xff] %v2903_v0  ;;  %v5358_v0 = vld [vmem:[#allocation13_spill] sm:$0xff]  ;;  %v1497_v10 = vsel %vm1120_vm1, %v1352_v30, 0.0 }
 0x341   : > { %2988 = vst.msk [vmem:[%s4276_s10 + $0x98] sm:$0xff] %vm1120_vm1, %v2904_v19  ;;  %v2618_v19 = vmul.f32 %v2449_v4, %v5358_v0  ;;  %v1362_v4 = vmul.f32 %v4754_v51, %v4754_v51  ;;  %v556_v51 = vld [vmem:[%s3603_s6 + $0x290] sm:$0xff] }
 0x343   : > { %v1517_v63 = vsel %vm1120_vm1, %v1362_v4, 0.0  ;;  %v765_v0 = vpop.f32.mrf.mxu0 }
 0x344   : > { %v1518_v30 = vadd.f32 %v1517_v63, %v1361_v6 }
 0x346   : > { %v2743_v56 = vpop.permute.xlu0 %2742 }
 0x347   : > { %1247 = vadd.xlane.f32.xlu1 %v1246_v31  ;;  %v2911_v46 = vadd.f32 %v2743_v56, %v2617_v52  ;;  %v2912_v48 = vadd.f32 %v2743_v56, %v2618_v19  ;;  %v1498_v31 = vadd.f32 %v1497_v10, %v1351_v26  ;;  %v1107_v52 = vpop.f32.mrf.mxu3  ;;  %v879_v19 = vpop.f32.mrf.mxu1  ;;  %v2274_v56 = vld [vmem:[%s4012_s30 + $0x98] sm:$0xff]  ;;  %v1249_v26 = vsel %vm1120_vm1, %v4616_v2, 0.0 }
 0x348   : > { %v1250_v10 = vadd.f32 %v1249_v26, %v4618_v38 }
 0x349   : > { %2995 = vst [vmem:[%s4276_s10 + $0xd0] sm:$0xff] %v2911_v46  ;;  %2732 = vperm.xlu2 %3203, %v2350_v32   ;;  %v4780_v32 = vadd.f32 %v1107_v52, %v993_v41  ;;  %v2354_v46 = vsub.f32 %v2270_v9, %v4236_v33 }
 0x34a   : > { %2996 = vst.msk [vmem:[%s4276_s10 + $0xd8] sm:$0xff] %vm1120_vm1, %v2912_v48  ;;  %v2358_v48 = vsub.f32 %v2274_v56, %v4469_v40 }
 0x34c   : > { %1267 = vadd.xlane.f32.xlu0 %v1266_v18  ;;  %v4791_v18 = vadd.f32 %v879_v19, %v765_v0 }
 0x34f   : > { %1499 = vadd.xlane.f32.xlu1 %v1498_v31 }
 0x354   : > { %1519 = vadd.xlane.f32.xlu0 %v1518_v30 }
 0x35e   : > { %v882_v6 = vpop.f32.mrf.mxu1 }
 0x367   : > { %v4797_v41 = vpop.xlane.xlu1 %1235 }
 0x368   : > { %2458 = vperm.xlu1 %3202, %v4232_v45   ;;  %2478 = vperm.xlu0 %3201, %v4463_v17   ;;  %v996_v4 = vpop.f32.mrf.mxu2  ;;  %v1110_v45 = vpop.f32.mrf.mxu3 }
 0x369   : > { %v4793_v31 = vadd.f32 %v1110_v45, %v996_v4  ;;  %v768_v17 = vpop.f32.mrf.mxu0  ;;  %v5360_v45 = vld [vmem:[#allocation12_spill] sm:$0xff] }
 0x36a   : > { %v4795_v30 = vadd.f32 %v882_v6, %v768_v17 }
 0x36f   : > { %v4809_v9 = vpop.xlane.xlu1 %1487 }
 0x370   : > { %2752 = vperm.xlu1 %3202, %v2354_v46   ;;  %2772 = vperm.xlu0 %3201, %v2358_v48   ;;  %v998_v26 = vpop.f32.mrf.mxu2  ;;  %v1112_v48 = vpop.f32.mrf.mxu3 }
 0x371   : > { %v1256_v63 = vpop.xlane.xlu0 %1255  ;;  %v4814_v43 = vadd.f32 %v1112_v48, %v998_v26  ;;  %v770_v1 = vpop.f32.mrf.mxu0  ;;  %v5364_v26 = vld [vmem:[#allocation20_spill] sm:$0xff] }
 0x372   : > { %1251 = vadd.xlane.f32.xlu2 %v1250_v10  ;;  %v4799_v33 = vmul.f32 0.0051020407, %v1256_v63  ;;  %v5359_v10 = vld [vmem:[#allocation11_spill] sm:$0xff] }
 0x373   : > { %5361 = vst [vmem:[#allocation4_spill] sm:$0xff] %v4814_v43 }
 0x374   : > { %v4803_v40 = vmul.f32 %v4799_v33, %v4799_v33 }
 0x379   : > { %v1508_v52 = vpop.xlane.xlu0 %1507 }
 0x37a   : > { %v4805_v0 = vmul.f32 0.0051020407, %v1508_v52 }
 0x37c   : > { %v1700_v19 = vsub.f32 %v4805_v0, %v4803_v40  ;;  %v884_v40 = vpop.f32.mrf.mxu1  ;;  %v1240_v0 = vpop.xlane.xlu2 %1239 }
 0x387   : > { %v2444_v56 = vpop.permute.xlu1 %2443 }
 0x388   : > { %v2615_v4 = vmul.f32 %v2444_v56, %v5359_v10  ;;  %v2616_v17 = vmul.f32 %v2444_v56, %v5360_v45  ;;  %v1257_v56 = vsel %vm1120_vm1, %v4697_v55, 0.0  ;;  %v5363_v10 = vld [vmem:[#allocation19_spill] sm:$0xff]  ;;  %v1277_v45 = vsel %vm1120_vm1, %v4814_v43, 0.0 }
 0x389   : > { %v1258_v34 = vadd.f32 %v1257_v56, %v4704_v27 }
 0x38a   : > { %2453 = vperm.xlu2 %3203, %v4207_v61   ;;  %v4819_v61 = vadd.f32 %v884_v40, %v770_v1  ;;  %v554_v40 = vld [vmem:[%s3603_s6 + $0x280] sm:$0xff] }
 0x38c   : > { %v2464_v46 = vpop.permute.xlu0 %2463  ;;  %5362 = vst [vmem:[#allocation6_spill] sm:$0xff] %v4819_v61  ;;  %v1278_v1 = vadd.f32 %v1277_v45, %v4819_v61  ;;  %v1357_v45 = vmul.f32 %v4704_v27, %v4704_v27 }
 0x38d   : > { %v2624_v48 = vmul.f32 %v2464_v46, %v5364_v26  ;;  %v557_v26 = vld [vmem:[%s3603_s6 + $0x298] sm:$0xff] }
 0x38e   : > { %v599_v56 = vpack.c.bf16 %v557_v26, %v555_v14  ;;  %v4851_v14 = vmul.f32 0.0051020407, %v1240_v0 }
 0x38f   : > { %v2738_v6 = vpop.permute.xlu1 %2737 }
 0x390   : > { %v2909_v63 = vadd.f32 %v2738_v6, %v2615_v4  ;;  %v2910_v52 = vadd.f32 %v2738_v6, %v2616_v17  ;;  %v2623_v4 = vmul.f32 %v2464_v46, %v5363_v10  ;;  %v1368_v46 = vmul.f32 %v4814_v43, %v4814_v43  ;;  %3187 = vmatmul.msk.bf16.gmra.mxu3 %vm600_vm0, %v599_v56 }
 0x391   : > { %v598_v10 = vpack.c.bf16 %v556_v51, %v554_v40  ;;  %3166 = vmatmul.msk.bf16.gmra.mxu1 %vm600_vm0, %v599_v56  ;;  %v1654_v40 = vmul.f32 %v4851_v14, %v4851_v14  ;;  %v1611_v56 = vmul.f32 0.0051020407, %v4809_v9 }
 0x392   : > { %2993 = vst [vmem:[%s4276_s10 + $0xc0] sm:$0xff] %v2909_v63  ;;  %v1529_v51 = vsel %vm1120_vm1, %v1368_v46, 0.0  ;;  %v4856_v46 = vmul.f32 0.0051020407, %v4797_v41 }
 0x393   : > { %2994 = vst.msk [vmem:[%s4276_s10 + $0xc8] sm:$0xff] %vm1120_vm1, %v2910_v52  ;;  %v1358_v52 = vmul.f32 %v4697_v55, %v4697_v55  ;;  %1000 = vmatmul.bf16.gmra.mxu2 %v598_v10  ;;  %772 = vmatmul.bf16.gmra.mxu0 %v598_v10  ;;  %v4858_v10 = vadd.f32 0.001, %v1700_v19 }
 0x394   : > { %v2758_v17 = vpop.permute.xlu0 %2757 }
 0x395   : > { %v2917_v6 = vadd.f32 %v2758_v17, %v2623_v4  ;;  %v2918_v63 = vadd.f32 %v2758_v17, %v2624_v48  ;;  %v5365_v4 = vsub.f32 %v4726_v39, %v4721_v22  ;;  %v1509_v17 = vsel %vm1120_vm1, %v1358_v52, 0.0  ;;  %v2439_v22 = vpop.permute.xlu2 %2438 }
 0x396   : > { %v1510_v39 = vadd.f32 %v1509_v17, %v1357_v45  ;;  %v1653_v17 = vmul.f32 %v4856_v46, %v4856_v46  ;;  %vm2087_vm15 = vweird.f32 %v4858_v10 }
 0x397   : > { %3001 = vst [vmem:[%s4276_s10 + $0x100] sm:$0xff] %v2917_v6  ;;  %v1739_v48 = vadd.f32 0.001, %v5365_v4  ;;  %v1367_v6 = vmul.f32 %v4819_v61, %v4819_v61 }
 0x398   : > { %3002 = vst.msk [vmem:[%s4276_s10 + $0x108] sm:$0xff] %vm1120_vm1, %v2918_v63 }
 0x399   : > { %3256 = vrsqrt.f32 %v1739_v48  ;;  %vm2057_vm0 = vweird.f32 %v1739_v48 }
 0x39a   : > { %1259 = vadd.xlane.f32.xlu1 %v1258_v34  ;;  %1279 = vadd.xlane.f32.xlu0 %v1278_v1  ;;  %v1530_v34 = vadd.f32 %v1529_v51, %v1367_v6  ;;  %3258 = vrsqrt.f32 %v4858_v10  ;;  %v1354_v6 = vmul.f32 %v4616_v2, %v4616_v2  ;;  %v5366_v51 = vld [vmem:[#allocation10_spill] sm:$0xff] }
 0x39b   : > { %v2613_v41 = vmul.f32 %v2439_v22, %v5366_v51 }
 0x39f   : > { %v3257_v63 = vpop.eup %3256 }
 0x3a0   : > { %v2052_v52 = vmul.f32 %v3257_v63, %v1739_v48  ;;  %v4872_v43 = vpop.eup %3258  ;;  %vm2058_vm10 = vweird.f32 %v3257_v63 }
 0x3a1   : > { %vm2059_vm11 = vmor %vm2057_vm0, %vm2058_vm10  ;;  %vm2088_vm2 = vweird.f32 %v4872_v43 }
 0x3a2   : > { %1511 = vadd.xlane.f32.xlu1 %v1510_v39  ;;  %1531 = vadd.xlane.f32.xlu0 %v1530_v34  ;;  %v2053_v0 = vmul.f32 %v3257_v63, %v2052_v52  ;;  %v5367_v39 = vld [vmem:[#allocation9_spill] sm:$0xff]  ;;  %v1695_v34 = vsub.f32 %v1611_v56, %v1653_v17  ;;  %vm2089_vm3 = vmor %vm2087_vm15, %vm2088_vm2 }
 0x3a3   : > { %v2614_v19 = vmul.f32 %v2439_v22, %v5367_v39 }
 0x3a4   : > { %v1492_v1 = vpop.xlane.xlu2 %1491  ;;  %v2054_v9 = vmul.f32 0.5, %v2053_v0  ;;  %v4874_v61 = vadd.f32 0.001, %v1695_v34  ;;  %v2082_v0 = vmul.f32 %v4872_v43, %v4858_v10  ;;  %v2269_v10 = vld [vmem:[%s4012_s30 + $0x70] sm:$0xff] }
 0x3a5   : > { %v1612_v26 = vmul.f32 0.0051020407, %v1492_v1 }
 0x3a6   : > { %v2055_v22 = vsub.f32 1.5, %v2054_v9  ;;  %vm2037_vm5 = vweird.f32 %v4874_v61 }
 0x3a7   : > { %v1696_v4 = vsub.f32 %v1612_v26, %v1654_v40  ;;  %v1353_v26 = vmul.f32 %v4618_v38, %v4618_v38 }
 0x3a9   : > { %v1738_v45 = vadd.f32 0.001, %v1696_v4  ;;  %v1501_v4 = vsel %vm1120_vm1, %v1354_v6, 0.0 }
 0x3aa   : > { %v1502_v56 = vadd.f32 %v1501_v4, %v1353_v26 }
 0x3ab   : > { %3260 = vrsqrt.f32 %v1738_v45  ;;  %vm2047_vm13 = vweird.f32 %v1738_v45 }
 0x3ac   : > { %v2733_v1 = vpop.permute.xlu2 %2732  ;;  %3262 = vrsqrt.f32 %v4874_v61 }
 0x3ad   : > { %v2907_v40 = vadd.f32 %v2733_v1, %v2613_v41  ;;  %v2908_v52 = vadd.f32 %v2733_v1, %v2614_v19  ;;  %v2056_v41 = vmul.f32 %v3257_v63, %v2055_v22  ;;  %v2083_v19 = vmul.f32 %v4872_v43, %v2082_v0  ;;  %v2201_v1 = vld [vmem:[%s4004_s26 + $0xf0] sm:$0xff]  ;;  %v2200_v22 = vld [vmem:[%s4004_s26 + $0xe8] sm:$0xff] }
 0x3af   : > { %2991 = vst [vmem:[%s4276_s10 + $0xb0] sm:$0xff] %v2907_v40  ;;  %v2060_v34 = vsel %vm2059_vm11, %v3257_v63, %v2056_v41  ;;  %v2273_v41 = vld [vmem:[%s4012_s30 + $0x90] sm:$0xff] }
 0x3b0   : > { %2992 = vst.msk [vmem:[%s4276_s10 + $0xb8] sm:$0xff] %vm1120_vm1, %v2908_v52  ;;  %v4884_v9 = vmul.f32 %v2201_v1, %v2060_v34  ;;  %v2277_v52 = vld [vmem:[%s4012_s30 + $0xb0] sm:$0xff]  ;;  %v2357_v34 = vsub.f32 %v2273_v41, %v4377_v28 }
 0x3b1   : > { %v3261_v51 = vpop.eup %3260 }
 0x3b2   : > { %v2042_v17 = vmul.f32 %v3261_v51, %v1738_v45  ;;  %vm2048_vm12 = vweird.f32 %v3261_v51  ;;  %v3263_v26 = vpop.eup %3262  ;;  %v4890_v4 = vmul.f32 %v4884_v9, %v4713_v7 }
 0x3b3   : > { %1503 = vadd.xlane.f32.xlu2 %v1502_v56  ;;  %v2084_v56 = vmul.f32 0.5, %v2083_v19  ;;  %vm2049_vm14 = vmor %vm2047_vm13, %vm2048_vm12  ;;  %vm2038_vm4 = vweird.f32 %v3263_v26 }
 0x3b4   : > { %v2043_v6 = vmul.f32 %v3261_v51, %v2042_v17  ;;  %v2361_v17 = vsub.f32 %v2277_v52, %v4636_v57  ;;  %vm2039_vm6 = vmor %vm2037_vm5, %vm2038_vm4 }
 0x3b6   : > { %v2044_v39 = vmul.f32 0.5, %v2043_v6  ;;  %2493 = vperm.xlu0 %3201, %v4633_v49   ;;  %v2032_v6 = vmul.f32 %v3263_v26, %v4874_v61 }
 0x3b8   : > { %v2045_v48 = vsub.f32 1.5, %v2044_v39  ;;  %v2033_v57 = vmul.f32 %v3263_v26, %v2032_v6 }
 0x3ba   : > { %v1248_v40 = vpop.xlane.xlu1 %1247  ;;  %v2046_v49 = vmul.f32 %v3261_v51, %v2045_v48  ;;  %v2034_v52 = vmul.f32 0.5, %v2033_v57 }
 0x3bb   : > { %2473 = vperm.xlu1 %3202, %v4369_v36   ;;  %v4893_v63 = vmul.f32 0.0051020407, %v1248_v40  ;;  %v2085_v36 = vsub.f32 1.5, %v2084_v56 }
 0x3bc   : > { %v2050_v0 = vsel %vm2049_vm14, %v3261_v51, %v2046_v49  ;;  %v2035_v41 = vsub.f32 1.5, %v2034_v52  ;;  %v2199_v52 = vld [vmem:[%s4004_s26 + $0xe0] sm:$0xff] }
 0x3bd   : > { %v4898_v39 = vmul.f32 %v2200_v22, %v2050_v0  ;;  %v1656_v19 = vmul.f32 %v4893_v63, %v4893_v63 }
 0x3be   : > { %2787 = vperm.xlu0 %3201, %v2361_v17   ;;  %v2204_v17 = vld [vmem:[%s4004_s26 + $0x108] sm:$0xff]  ;;  %v2036_v57 = vmul.f32 %v3263_v26, %v2035_v41 }
 0x3bf   : > { %v1268_v45 = vpop.xlane.xlu0 %1267  ;;  %v4902_v7 = vmul.f32 %v4898_v39, %v4851_v14  ;;  %v2086_v14 = vmul.f32 %v4872_v43, %v2085_v36  ;;  %v5368_v36 = vld [vmem:[#allocation31_spill] sm:$0xff] }
 0x3c0   : > { %v4909_v48 = vmul.f32 0.0051020407, %v1268_v45  ;;  %v2353_v45 = vsub.f32 %v2269_v10, %v5368_v36 }
 0x3c1   : > { %v2090_v56 = vsel %vm2089_vm3, %v4872_v43, %v2086_v14 }
 0x3c2   : > { %v1500_v51 = vpop.xlane.xlu1 %1499  ;;  %v4915_v28 = vmul.f32 %v4909_v48, %v4909_v48  ;;  %v4922_v6 = vmul.f32 %v2204_v17, %v2090_v56  ;;  %v2283_v17 = vld [vmem:[%s4012_s30 + $0xe0] sm:$0xff] }
 0x3c3   : > { %v1614_v1 = vmul.f32 0.0051020407, %v1500_v51  ;;  %2767 = vperm.xlu1 %3202, %v2357_v34  }
 0x3c4   : > { %v4930_v34 = vmul.f32 %v4922_v6, %v4799_v33 }
 0x3c5   : > { %v1698_v40 = vsub.f32 %v1614_v1, %v1656_v19  ;;  %v2280_v19 = vld [vmem:[%s4012_s30 + $0xc8] sm:$0xff] }
 0x3c6   : > { %2508 = vperm.xlu0 %3201, %v4734_v58   ;;  %v2364_v43 = vsub.f32 %v2280_v19, %v4738_v16  ;;  %v5370_v19 = vld [vmem:[#allocation17_spill] sm:$0xff] }
 0x3c7   : > { %v1740_v49 = vadd.f32 0.001, %v1698_v40  ;;  %v1520_v22 = vpop.xlane.xlu0 %1519  ;;  %v2040_v40 = vsel %vm2039_vm6, %v3263_v26, %v2036_v57  ;;  %v5369_v26 = vld [vmem:[#allocation18_spill] sm:$0xff]  ;;  %v5371_v57 = vld [vmem:[#allocation28_spill] sm:$0xff] }
 0x3c8   : > { %v4920_v0 = vmul.f32 0.0051020407, %v1520_v22  ;;  %v2241_v10 = vmul.f32 %v2199_v52, %v2040_v40 }
 0x3c9   : > { %3264 = vrsqrt.f32 %v1740_v49  ;;  %vm2067_vm7 = vweird.f32 %v1740_v49 }
 0x3ca   : > { %v2325_v33 = vmul.f32 %v2241_v10, %v4856_v46 }
 0x3cb   : > { %2747 = vperm.xlu2 %3203, %v2353_v45  }
 0x3cc   : > { %v2367_v36 = vsub.f32 %v2283_v17, %v2325_v33 }
 0x3ce   : > { %2802 = vperm.xlu0 %3201, %v2364_v43  }
 0x3cf   : > { %v3265_v51 = vpop.eup %3264 }
 0x3d0   : > { %v2062_v1 = vmul.f32 %v3265_v51, %v1740_v49  ;;  %vm2068_vm8 = vweird.f32 %v3265_v51  ;;  %v2202_v49 = vld [vmem:[%s4004_s26 + $0xf8] sm:$0xff] }
 0x3d1   : > { %vm2069_vm9 = vmor %vm2067_vm7, %vm2068_vm8 }
 0x3d2   : > { %v2063_v14 = vmul.f32 %v3265_v51, %v2062_v1  ;;  %v5372_v1 = vld [vmem:[#allocation27_spill] sm:$0xff] }
 0x3d4   : > { %v2064_v22 = vmul.f32 0.5, %v2063_v14 }
 0x3d6   : > { %2523 = vperm.xlu0 %3201, %v2241_v10   ;;  %v2065_v56 = vsub.f32 1.5, %v2064_v22 }
 0x3d8   : > { %v2066_v61 = vmul.f32 %v3265_v51, %v2065_v56 }
 0x3da   : > { %v2459_v16 = vpop.permute.xlu1 %2458  ;;  %v2479_v41 = vpop.permute.xlu0 %2478  ;;  %v2070_v52 = vsel %vm2069_vm9, %v3265_v51, %v2066_v61  ;;  %v2286_v61 = vld [vmem:[%s4012_s30 + $0xf8] sm:$0xff] }
 0x3db   : > { %v2621_v45 = vmul.f32 %v2459_v16, %v5369_v26  ;;  %v2622_v43 = vmul.f32 %v2459_v16, %v5370_v19  ;;  %v2629_v46 = vmul.f32 %v2479_v41, %v5371_v57  ;;  %v2630_v14 = vmul.f32 %v2479_v41, %v5372_v1 }
 0x3dc   : > { %v1269_v16 = vsel %vm1120_vm1, %v4780_v32, 0.0  ;;  %v1364_v26 = vmul.f32 %v4780_v32, %v4780_v32  ;;  %v1363_v19 = vmul.f32 %v4791_v18, %v4791_v18  ;;  %v1261_v57 = vsel %vm1120_vm1, %v4707_v13, 0.0 }
 0x3dd   : > { %v1270_v51 = vadd.f32 %v1269_v16, %v4791_v18  ;;  %v1262_v1 = vadd.f32 %v1261_v57, %v4711_v42 }
 0x3de   : > { %2817 = vperm.xlu0 %3201, %v2367_v36   ;;  %v2244_v36 = vmul.f32 %v2202_v49, %v2070_v52  ;;  %v2276_v52 = vld [vmem:[%s4012_s30 + $0xa8] sm:$0xff] }
 0x3e0   : > { %v2328_v41 = vmul.f32 %v2244_v36, %v4893_v63 }
 0x3e2   : > { %v2753_v40 = vpop.permute.xlu1 %2752  ;;  %v2773_v33 = vpop.permute.xlu0 %2772 }
 0x3e3   : > { %v2915_v10 = vadd.f32 %v2753_v40, %v2621_v45  ;;  %v2916_v22 = vadd.f32 %v2753_v40, %v2622_v43  ;;  %v2923_v56 = vadd.f32 %v2773_v33, %v2629_v46  ;;  %v2924_v17 = vadd.f32 %v2773_v33, %v2630_v14 }
 0x3e4   : > { %v2370_v45 = vsub.f32 %v2286_v61, %v2328_v41  ;;  %v1521_v43 = vsel %vm1120_vm1, %v1364_v26, 0.0 }
 0x3e5   : > { %2999 = vst [vmem:[%s4276_s10 + $0xf0] sm:$0xff] %v2915_v10  ;;  %v1522_v46 = vadd.f32 %v1521_v43, %v1363_v19  ;;  %v1252_v33 = vpop.xlane.xlu2 %1251 }
 0x3e6   : > { %3000 = vst.msk [vmem:[%s4276_s10 + $0xf8] sm:$0xff] %vm1120_vm1, %v2916_v22  ;;  %2538 = vperm.xlu0 %3201, %v2244_v36   ;;  %v2360_v22 = vsub.f32 %v2276_v52, %v4488_v5 }
 0x3e7   : > { %3007 = vst [vmem:[%s4276_s10 + $0x130] sm:$0xff] %v2923_v56 }
 0x3e8   : > { %3008 = vst.msk [vmem:[%s4276_s10 + $0x138] sm:$0xff] %vm1120_vm1, %v2924_v17 }
 0x3ed   : > { %1271 = vadd.xlane.f32.xlu1 %v1270_v51  ;;  %v2454_v61 = vpop.permute.xlu2 %2453 }
 0x3ee   : > { %2832 = vperm.xlu0 %3201, %v2370_v45   ;;  %v4975_v45 = vmul.f32 0.0051020407, %v1252_v33  ;;  %v1360_v33 = vmul.f32 %v4707_v13, %v4707_v13  ;;  %v5375_v13 = vld [vmem:[#allocation23_spill] sm:$0xff] }
 0x3f4   : > { %1263 = vadd.xlane.f32.xlu2 %v1262_v1 }
 0x3f5   : > { %1523 = vadd.xlane.f32.xlu1 %v1522_v46  ;;  %v1657_v46 = vmul.f32 %v4975_v45, %v4975_v45 }
 0x40c   : > { %2468 = vperm.xlu2 %3203, %v4286_v15  }
 0x40d   : > { %v1260_v63 = vpop.xlane.xlu1 %1259  ;;  %v1280_v14 = vpop.xlane.xlu0 %1279 }
 0x40e   : > { %2488 = vperm.xlu1 %3202, %v4479_v25   ;;  %v1575_v40 = vmul.f32 0.0051020407, %v1260_v63  ;;  %v4964_v49 = vmul.f32 0.0051020407, %v1280_v14 }
 0x410   : > { %v1659_v10 = vmul.f32 %v1575_v40, %v1575_v40  ;;  %v4969_v17 = vmul.f32 %v4964_v49, %v4964_v49 }
 0x413   : > { %v1115_v58 = vpop.f32.mrf.mxu3 }
 0x415   : > { %v1512_v56 = vpop.xlane.xlu1 %1511  ;;  %v1532_v15 = vpop.xlane.xlu0 %1531 }
 0x416   : > { %v1617_v36 = vmul.f32 0.0051020407, %v1512_v56  ;;  %2782 = vperm.xlu1 %3202, %v2360_v22   ;;  %v4971_v16 = vmul.f32 0.0051020407, %v1532_v15  ;;  %v2205_v56 = vld [vmem:[%s4004_s26 + $0x110] sm:$0xff]  ;;  %v1001_v51 = vpop.f32.mrf.mxu2 }
 0x418   : > { %v1701_v25 = vsub.f32 %v1617_v36, %v1659_v10 }
 0x41a   : > { %v1743_v41 = vadd.f32 0.001, %v1701_v25  ;;  %v5373_v25 = vld [vmem:[#allocation15_spill] sm:$0xff] }
 0x41c   : > { %3266 = vrsqrt.f32 %v1743_v41  ;;  %vm2097_vm0 = vweird.f32 %v1743_v41 }
 0x422   : > { %v3267_v26 = vpop.eup %3266 }
 0x423   : > { %v2092_v5 = vmul.f32 %v3267_v26, %v1743_v41  ;;  %vm2098_vm10 = vweird.f32 %v3267_v26  ;;  %v2619_v41 = vmul.f32 %v2454_v61, %v5373_v25  ;;  %v1513_v25 = vsel %vm1120_vm1, %v1360_v33, 0.0  ;;  %v773_v33 = vpop.f32.mrf.mxu0 }
 0x424   : > { %vm2099_vm11 = vmor %vm2097_vm0, %vm2098_vm10 }
 0x425   : > { %v2093_v19 = vmul.f32 %v3267_v26, %v2092_v5  ;;  %v5374_v5 = vld [vmem:[#allocation16_spill] sm:$0xff] }
 0x426   : > { %v1504_v57 = vpop.xlane.xlu2 %1503 }
 0x427   : > { %v2094_v43 = vmul.f32 0.5, %v2093_v19  ;;  %v1615_v1 = vmul.f32 0.0051020407, %v1504_v57  ;;  %v2620_v19 = vmul.f32 %v2454_v61, %v5374_v5 }
 0x428   : > { %v2494_v14 = vpop.permute.xlu0 %2493 }
 0x429   : > { %v2095_v63 = vsub.f32 1.5, %v2094_v43  ;;  %v1699_v52 = vsub.f32 %v1615_v1, %v1657_v46  ;;  %v1359_v46 = vmul.f32 %v4711_v42, %v4711_v42  ;;  %v2635_v1 = vmul.f32 %v2494_v14, %v4346_v8 }
 0x42b   : > { %v2096_v10 = vmul.f32 %v3267_v26, %v2095_v63  ;;  %v1741_v22 = vadd.f32 0.001, %v1699_v52 }
 0x42d   : > { %v2474_v36 = vpop.permute.xlu1 %2473  ;;  %v2100_v15 = vsel %vm2099_vm11, %v3267_v26, %v2096_v10  ;;  %3268 = vrsqrt.f32 %v1741_v22  ;;  %v2636_v26 = vmul.f32 %v2494_v14, %v4338_v59  ;;  %v5376_v14 = vld [vmem:[#allocation24_spill] sm:$0xff]  ;;  %vm2077_vm13 = vweird.f32 %v1741_v22 }
 0x42e   : > { %v2748_v57 = vpop.permute.xlu2 %2747  ;;  %v2247_v43 = vmul.f32 %v2205_v56, %v2100_v15  ;;  %v2289_v15 = vld [vmem:[%s4012_s30 + $0x110] sm:$0xff]  ;;  %v2627_v59 = vmul.f32 %v2474_v36, %v5375_v13 }
 0x42f   : > { %v2913_v63 = vadd.f32 %v2748_v57, %v2619_v41  ;;  %v2914_v52 = vadd.f32 %v2748_v57, %v2620_v19  ;;  %v2628_v41 = vmul.f32 %v2474_v36, %v5376_v14  ;;  %v1514_v19 = vadd.f32 %v1513_v25, %v1359_v46 }
 0x430   : > { %2553 = vperm.xlu0 %3201, %v2247_v43   ;;  %v2788_v10 = vpop.permute.xlu0 %2787  ;;  %v2331_v61 = vmul.f32 %v2247_v43, %v1575_v40 }
 0x431   : > { %2997 = vst [vmem:[%s4276_s10 + $0xe0] sm:$0xff] %v2913_v63  ;;  %v2929_v5 = vadd.f32 %v2788_v10, %v2635_v1  ;;  %v2930_v56 = vadd.f32 %v2788_v10, %v2636_v26  ;;  %v4998_v1 = vadd.f32 %v1115_v58, %v1001_v51  ;;  %v887_v26 = vpop.f32.mrf.mxu1 }
 0x432   : > { %2998 = vst.msk [vmem:[%s4276_s10 + $0xe8] sm:$0xff] %vm1120_vm1, %v2914_v52  ;;  %v2373_v43 = vsub.f32 %v2289_v15, %v2331_v61  ;;  %v5001_v13 = vadd.f32 %v887_v26, %v773_v33 }
 0x433   : > { %v3269_v8 = vpop.eup %3268  ;;  %3013 = vst [vmem:[%s4276_s10 + $0x160] sm:$0xff] %v2929_v5  ;;  %v1281_v25 = vsel %vm1120_vm1, %v4998_v1, 0.0  ;;  %v1370_v5 = vmul.f32 %v4998_v1, %v4998_v1 }
 0x434   : > { %v2072_v57 = vmul.f32 %v3269_v8, %v1741_v22  ;;  %3014 = vst.msk [vmem:[%s4276_s10 + $0x168] sm:$0xff] %vm1120_vm1, %v2930_v56  ;;  %vm2078_vm12 = vweird.f32 %v3269_v8  ;;  %v1282_v58 = vadd.f32 %v1281_v25, %v5001_v13  ;;  %v2203_v56 = vld [vmem:[%s4004_s26 + $0x100] sm:$0xff]  ;;  %v5377_v25 = vld [vmem:[#allocation35_spill] sm:$0xff] }
 0x435   : > { %v2768_v40 = vpop.permute.xlu1 %2767  ;;  %1515 = vadd.xlane.f32.xlu2 %v1514_v19  ;;  %vm2079_vm14 = vmor %vm2077_vm13, %vm2078_vm12  ;;  %v1533_v22 = vsel %vm1120_vm1, %v1370_v5, 0.0 }
 0x436   : > { %v2921_v63 = vadd.f32 %v2768_v40, %v2627_v59  ;;  %v2922_v52 = vadd.f32 %v2768_v40, %v2628_v41  ;;  %v2073_v10 = vmul.f32 %v3269_v8, %v2072_v57  ;;  %v1369_v41 = vmul.f32 %v5001_v13, %v5001_v13 }
 0x438   : > { %3005 = vst [vmem:[%s4276_s10 + $0x120] sm:$0xff] %v2921_v63  ;;  %v2074_v36 = vmul.f32 0.5, %v2073_v10  ;;  %2847 = vperm.xlu0 %3201, %v2373_v43   ;;  %v2509_v46 = vpop.permute.xlu0 %2508  ;;  %v2272_v43 = vld [vmem:[%s4012_s30 + $0x88] sm:$0xff] }
 0x439   : > { %3006 = vst.msk [vmem:[%s4276_s10 + $0x128] sm:$0xff] %vm1120_vm1, %v2922_v52  ;;  %v2641_v59 = vmul.f32 %v2509_v46, %v4393_v11  ;;  %v2642_v14 = vmul.f32 %v2509_v46, %v4391_v37  ;;  %v1534_v11 = vadd.f32 %v1533_v22, %v1369_v41  ;;  %v2356_v26 = vsub.f32 %v2272_v43, %v4292_v23 }
 0x43a   : > { %v2075_v61 = vsub.f32 1.5, %v2074_v36 }
 0x43c   : > { %v2076_v51 = vmul.f32 %v3269_v8, %v2075_v61  ;;  %v5033_v61 = vmul.f32 0.0051020407, %v5377_v25 }
 0x43e   : > { %v2080_v15 = vsel %vm2079_vm14, %v3269_v8, %v2076_v51  ;;  %v5378_v51 = vld [vmem:[#allocation38_spill] sm:$0xff]  ;;  %v1645_v41 = vmul.f32 %v5033_v61, %v5033_v61 }
 0x43f   : > { %v5015_v19 = vmul.f32 %v2203_v56, %v2080_v15  ;;  %v5379_v56 = vsub.f32 %v4920_v0, %v4915_v28 }
 0x440   : > { %1283 = vadd.xlane.f32.xlu1 %v1282_v58  ;;  %v2803_v33 = vpop.permute.xlu0 %2802 }
 0x441   : > { %v2935_v57 = vadd.f32 %v2803_v33, %v2641_v59  ;;  %v2936_v40 = vadd.f32 %v2803_v33, %v2642_v14  ;;  %v5020_v8 = vmul.f32 %v5015_v19, %v4975_v45  ;;  %v1745_v15 = vadd.f32 0.001, %v5379_v56 }
 0x443   : > { %3019 = vst [vmem:[%s4276_s10 + $0x190] sm:$0xff] %v2935_v57  ;;  %3270 = vrsqrt.f32 %v1745_v15  ;;  %vm2117_vm3 = vweird.f32 %v1745_v15 }
 0x444   : > { %3020 = vst.msk [vmem:[%s4276_s10 + $0x198] sm:$0xff] %vm1120_vm1, %v2936_v40 }
 0x448   : > { %1535 = vadd.xlane.f32.xlu1 %v1534_v11  ;;  %v2524_v37 = vpop.permute.xlu0 %2523 }
 0x449   : > { %v2647_v63 = vmul.f32 %v2524_v37, %v4512_v54  ;;  %v2648_v52 = vmul.f32 %v2524_v37, %v4507_v3  ;;  %v1603_v3 = vmul.f32 0.0051020407, %v5378_v51  ;;  %v3271_v11 = vpop.eup %3270 }
 0x44a   : > { %v2112_v43 = vmul.f32 %v3271_v11, %v1745_v15  ;;  %vm2118_vm4 = vweird.f32 %v3271_v11 }
 0x44b   : > { %v1687_v22 = vsub.f32 %v1603_v3, %v1645_v41  ;;  %vm5071_vm6 = vmor %vm2117_vm3, %vm2118_vm4 }
 0x44d   : > { %2762 = vperm.xlu2 %3203, %v2356_v26   ;;  %v5049_v40 = vadd.f32 0.001, %v1687_v22  ;;  %v1273_v26 = vsel %vm1120_vm1, %v4793_v31, 0.0 }
 0x44f   : > { %3272 = vrsqrt.f32 %v5049_v40  ;;  %vm1957_vm8 = vweird.f32 %v5049_v40 }
 0x450   : > { %v2818_v10 = vpop.permute.xlu0 %2817 }
 0x451   : > { %v2941_v36 = vadd.f32 %v2818_v10, %v2647_v63  ;;  %v2942_v46 = vadd.f32 %v2818_v10, %v2648_v52  ;;  %v2113_v10 = vmul.f32 %v3271_v11, %v2112_v43  ;;  %v2207_v43 = vld [vmem:[%s4004_s26 + $0x120] sm:$0xff] }
 0x453   : > { %3025 = vst [vmem:[%s4276_s10 + $0x1c0] sm:$0xff] %v2941_v36  ;;  %v1274_v36 = vadd.f32 %v1273_v26, %v4795_v30  ;;  %v2292_v26 = vld [vmem:[%s4012_s30 + $0x128] sm:$0xff] }
 0x454   : > { %3026 = vst.msk [vmem:[%s4276_s10 + $0x1c8] sm:$0xff] %vm1120_vm1, %v2942_v46  ;;  %v2282_v46 = vld [vmem:[%s4012_s30 + $0xd8] sm:$0xff] }
 0x455   : > { %v5060_v52 = vpop.eup %3272 }
 0x456   : > { %v1952_v25 = vmul.f32 %v5060_v52, %v5049_v40  ;;  %vm1958_vm7 = vweird.f32 %v5060_v52 }
 0x457   : > { %vm1959_vm9 = vmor %vm1957_vm8, %vm1958_vm7 }
 0x458   : > { %v2539_v45 = vpop.permute.xlu0 %2538 }
 0x459   : > { %v2653_v23 = vmul.f32 %v2539_v45, %v4613_v29  ;;  %v2654_v58 = vmul.f32 %v2539_v45, %v4611_v21  ;;  %v2279_v29 = vld [vmem:[%s4012_s30 + $0xc0] sm:$0xff] }
 0x45a   : > { %v2363_v57 = vsub.f32 %v2279_v29, %v4600_v53  ;;  %v5380_v53 = vsub.f32 %v4971_v16, %v4969_v17  ;;  %v1953_v16 = vmul.f32 %v5060_v52, %v1952_v25  ;;  %v5384_v25 = vld [vmem:[#allocation30_spill] sm:$0xff] }
 0x45c   : > { %v5058_v63 = vadd.f32 0.001, %v5380_v53  ;;  %v1954_v56 = vmul.f32 0.5, %v1953_v16  ;;  %v2191_v16 = vld [vmem:[%s4004_s26 + $0xa0] sm:$0xff] }
 0x45e   : > { %vm2147_vm0 = vweird.f32 %v5058_v63 }
 0x460   : > { %v1272_v54 = vpop.xlane.xlu1 %1271  ;;  %v2833_v5 = vpop.permute.xlu0 %2832 }
 0x461   : > { %2503 = vperm.xlu1 %3202, %v4596_v50   ;;  %v2947_v59 = vadd.f32 %v2833_v5, %v2653_v23  ;;  %v2948_v14 = vadd.f32 %v2833_v5, %v2654_v58  ;;  %v1578_v33 = vmul.f32 0.0051020407, %v1272_v54  ;;  %v2114_v58 = vmul.f32 0.5, %v2113_v10 }
 0x463   : > { %3031 = vst [vmem:[%s4276_s10 + $0x1f0] sm:$0xff] %v2947_v59  ;;  %v1662_v21 = vmul.f32 %v1578_v33, %v1578_v33  ;;  %v2115_v51 = vsub.f32 1.5, %v2114_v58 }
 0x464   : > { %3032 = vst.msk [vmem:[%s4276_s10 + $0x1f8] sm:$0xff] %vm1120_vm1, %v2948_v14  ;;  %v2208_v14 = vld [vmem:[%s4004_s26 + $0x128] sm:$0xff] }
 0x468   : > { %v1524_v50 = vpop.xlane.xlu1 %1523 }
 0x469   : > { %v1620_v28 = vmul.f32 0.0051020407, %v1524_v50  ;;  %2797 = vperm.xlu1 %3202, %v2363_v57   ;;  %v1955_v57 = vsub.f32 1.5, %v1954_v56 }
 0x46b   : > { %v1704_v0 = vsub.f32 %v1620_v28, %v1662_v21  ;;  %v2285_v28 = vld [vmem:[%s4012_s30 + $0xf0] sm:$0xff]  ;;  %v1956_v10 = vmul.f32 %v5060_v52, %v1955_v57 }
 0x46c   : > { %v2369_v53 = vsub.f32 %v2285_v28, %v4890_v4 }
 0x46d   : > { %v1746_v37 = vadd.f32 0.001, %v1704_v0 }
 0x46f   : > { %3274 = vrsqrt.f32 %v1746_v37  ;;  %vm2127_vm15 = vweird.f32 %v1746_v37 }
 0x470   : > { %3276 = vrsqrt.f32 %v5058_v63 }
 0x471   : > { %2518 = vperm.xlu1 %3202, %v4667_v60   ;;  %v2366_v60 = vsub.f32 %v2282_v46, %v4675_v20  ;;  %v2116_v20 = vmul.f32 %v3271_v11, %v2115_v51  ;;  %v5383_v46 = vld [vmem:[#allocation32_spill] sm:$0xff] }
 0x475   : > { %v3275_v45 = vpop.eup %3274 }
 0x476   : > { %v2122_v23 = vmul.f32 %v3275_v45, %v1746_v37  ;;  %1275 = vadd.xlane.f32.xlu2 %v1274_v36  ;;  %vm2128_vm2 = vweird.f32 %v3275_v45  ;;  %v3277_v3 = vpop.eup %3276  ;;  %v2120_v37 = vsel %vm5071_vm6, %v3271_v11, %v2116_v20 }
 0x477   : > { %vm2129_vm5 = vmor %vm2127_vm15, %vm2128_vm2  ;;  %v2142_v41 = vmul.f32 %v3277_v3, %v5058_v63  ;;  %vm2148_vm10 = vweird.f32 %v3277_v3 }
 0x478   : > { %v2123_v17 = vmul.f32 %v3275_v45, %v2122_v23  ;;  %vm2149_vm11 = vmor %vm2147_vm0, %vm2148_vm10 }
 0x479   : > { %2812 = vperm.xlu1 %3202, %v2366_v60   ;;  %v2143_v50 = vmul.f32 %v3277_v3, %v2142_v41  ;;  %v2291_v41 = vld [vmem:[%s4012_s30 + $0x120] sm:$0xff] }
 0x47a   : > { %v2124_v54 = vmul.f32 0.5, %v2123_v17  ;;  %v1960_v17 = vsel %vm1959_vm9, %v5060_v52, %v1956_v10  ;;  %v2210_v52 = vld [vmem:[%s4004_s26 + $0x138] sm:$0xff] }
 0x47b   : > { %v2144_v36 = vmul.f32 0.5, %v2143_v50  ;;  %v5094_v40 = vmul.f32 %v2191_v16, %v1960_v17 }
 0x47c   : > { %v2125_v5 = vsub.f32 1.5, %v2124_v54 }
 0x47d   : > { %v2145_v54 = vsub.f32 1.5, %v2144_v36 }
 0x47e   : > { %v2126_v59 = vmul.f32 %v3275_v45, %v2125_v5  ;;  %v2288_v5 = vld [vmem:[%s4012_s30 + $0x108] sm:$0xff] }
 0x480   : > { %v2489_v22 = vpop.permute.xlu1 %2488  ;;  %v2130_v21 = vsel %vm2129_vm5, %v3275_v45, %v2126_v59  ;;  %v1264_v59 = vpop.xlane.xlu2 %1263 }
 0x481   : > { %2533 = vperm.xlu1 %3202, %v4884_v9   ;;  %v2250_v15 = vmul.f32 %v2208_v14, %v2130_v21  ;;  %v2249_v9 = vmul.f32 %v2207_v43, %v2120_v37  ;;  %v2633_v45 = vmul.f32 %v2489_v22, %v5383_v46  ;;  %v2372_v14 = vsub.f32 %v2288_v5, %v4930_v34 }
 0x482   : > { %v1576_v21 = vmul.f32 0.0051020407, %v1264_v59  ;;  %v1366_v43 = vmul.f32 %v4793_v31, %v4793_v31  ;;  %v1365_v46 = vmul.f32 %v4795_v30, %v4795_v30  ;;  %v2206_v59 = vld [vmem:[%s4004_s26 + $0x118] sm:$0xff] }
 0x483   : > { %2568 = vperm.xlu0 %3201, %v2250_v15   ;;  %v2334_v0 = vmul.f32 %v2250_v15, %v1578_v33  ;;  %v2634_v33 = vmul.f32 %v2489_v22, %v5384_v25  ;;  %v2333_v58 = vmul.f32 %v2249_v9, %v4909_v48  ;;  %v2146_v48 = vmul.f32 %v3277_v3, %v2145_v54 }
 0x485   : > { %v2376_v23 = vsub.f32 %v2292_v26, %v2334_v0  ;;  %v2150_v51 = vsel %vm2149_vm11, %v3277_v3, %v2146_v48  ;;  %v2375_v22 = vsub.f32 %v2291_v41, %v2333_v58  ;;  %v5385_v26 = vld [vmem:[#allocation22_spill] sm:$0xff] }
 0x486   : > { %v2252_v56 = vmul.f32 %v2210_v52, %v2150_v51 }
 0x488   : > { %v2783_v11 = vpop.permute.xlu1 %2782  ;;  %v2336_v20 = vmul.f32 %v2252_v56, %v4964_v49  ;;  %v2469_v63 = vpop.permute.xlu2 %2468 }
 0x489   : > { %v2927_v4 = vadd.f32 %v2783_v11, %v2633_v45  ;;  %v2928_v60 = vadd.f32 %v2783_v11, %v2634_v33  ;;  %2827 = vperm.xlu1 %3202, %v2369_v53   ;;  %v2625_v53 = vmul.f32 %v2469_v63, %v5385_v26  ;;  %v2294_v45 = vld [vmem:[%s4012_s30 + $0x138] sm:$0xff]  ;;  %v1525_v33 = vsel %vm1120_vm1, %v1366_v43, 0.0 }
 0x48b   : > { %3011 = vst [vmem:[%s4276_s10 + $0x150] sm:$0xff] %v2927_v4  ;;  %2862 = vperm.xlu0 %3201, %v2376_v23   ;;  %v2378_v23 = vsub.f32 %v2294_v45, %v2336_v20  ;;  %v1526_v4 = vadd.f32 %v1525_v33, %v1365_v46  ;;  %v5136_v46 = vmul.f32 0.0051020407, %v4519_v12  ;;  %v1606_v45 = vmul.f32 0.0051020407, %v4549_v24  ;;  %v889_v24 = vpop.f32.mrf.mxu1 }
 0x48c   : > { %3012 = vst.msk [vmem:[%s4276_s10 + $0x158] sm:$0xff] %vm1120_vm1, %v2928_v60 }
 0x48d   : > { %v1648_v33 = vmul.f32 %v5136_v46, %v5136_v46 }
 0x48e   : > { %2483 = vperm.xlu2 %3203, %v5094_v40  }
 0x491   : > { %2548 = vperm.xlu1 %3202, %v4922_v6   ;;  %v1660_v6 = vmul.f32 %v1576_v21, %v1576_v21 }
 0x499   : > { %2842 = vperm.xlu1 %3202, %v2372_v14  }
 0x4a1   : > { %2563 = vperm.xlu1 %3202, %v2249_v9  }
 0x4a2   : > { %v2554_v29 = vpop.permute.xlu0 %2553 }
 0x4a3   : > { %v2659_v3 = vmul.f32 %v2554_v29, %v4704_v27  ;;  %v2660_v57 = vmul.f32 %v2554_v29, %v4697_v55  ;;  %v5386_v27 = vld [vmem:[#allocation21_spill] sm:$0xff] }
 0x4a4   : > { %v2626_v10 = vmul.f32 %v2469_v63, %v5386_v27 }
 0x4a8   : > { %v1516_v15 = vpop.xlane.xlu2 %1515 }
 0x4a9   : > { %2857 = vperm.xlu1 %3202, %v2375_v22   ;;  %v1618_v50 = vmul.f32 0.0051020407, %v1516_v15  ;;  %v2317_v15 = vmul.f32 %v5094_v40, %v5033_v61  ;;  %v2295_v61 = vld [vmem:[%s4012_s30 + $0x140] sm:$0xff]  ;;  %v5387_v40 = vld [vmem:[#allocation37_spill] sm:$0xff] }
 0x4aa   : > { %v2848_v34 = vpop.permute.xlu0 %2847 }
 0x4ab   : > { %v1702_v49 = vsub.f32 %v1618_v50, %v1660_v6  ;;  %v2953_v28 = vadd.f32 %v2848_v34, %v2659_v3  ;;  %v2954_v0 = vadd.f32 %v2848_v34, %v2660_v57  ;;  %v2275_v3 = vld [vmem:[%s4012_s30 + $0xa0] sm:$0xff] }
 0x4ac   : > { %v2359_v50 = vsub.f32 %v2275_v3, %v2317_v15 }
 0x4ad   : > { %v1744_v37 = vadd.f32 0.001, %v1702_v49  ;;  %3037 = vst [vmem:[%s4276_s10 + $0x220] sm:$0xff] %v2953_v28 }
 0x4ae   : > { %3038 = vst.msk [vmem:[%s4276_s10 + $0x228] sm:$0xff] %vm1120_vm1, %v2954_v0 }
 0x4af   : > { %3278 = vrsqrt.f32 %v1744_v37  ;;  %vm2107_vm13 = vweird.f32 %v1744_v37 }
 0x4b0   : > { %v2763_v55 = vpop.permute.xlu2 %2762 }
 0x4b1   : > { %2578 = vperm.xlu1 %3202, %v2252_v56   ;;  %v2919_v9 = vadd.f32 %v2763_v55, %v2625_v53  ;;  %v2920_v36 = vadd.f32 %v2763_v55, %v2626_v10  ;;  %v5388_v53 = vld [vmem:[#allocation36_spill] sm:$0xff] }
 0x4b3   : > { %v1284_v25 = vpop.xlane.xlu1 %1283  ;;  %3003 = vst [vmem:[%s4276_s10 + $0x110] sm:$0xff] %v2919_v9 }
 0x4b4   : > { %3004 = vst.msk [vmem:[%s4276_s10 + $0x118] sm:$0xff] %vm1120_vm1, %v2920_v36  ;;  %v1581_v58 = vmul.f32 0.0051020407, %v1284_v25 }
 0x4b5   : > { %v3279_v11 = vpop.eup %3278 }
 0x4b6   : > { %v2102_v60 = vmul.f32 %v3279_v11, %v1744_v37  ;;  %v1665_v16 = vmul.f32 %v1581_v58, %v1581_v58  ;;  %vm2108_vm12 = vweird.f32 %v3279_v11 }
 0x4b7   : > { %1527 = vadd.xlane.f32.xlu2 %v1526_v4  ;;  %vm2109_vm14 = vmor %vm2107_vm13, %vm2108_vm12 }
 0x4b8   : > { %v2103_v17 = vmul.f32 %v3279_v11, %v2102_v60  ;;  %v5390_v60 = vld [vmem:[#allocation39_spill] sm:$0xff] }
 0x4b9   : > { %2872 = vperm.xlu1 %3202, %v2378_v23   ;;  %v1690_v23 = vsub.f32 %v1606_v45, %v1648_v33 }
 0x4ba   : > { %v2104_v54 = vmul.f32 0.5, %v2103_v17 }
 0x4bb   : > { %v1536_v48 = vpop.xlane.xlu1 %1535 }
 0x4bc   : > { %v1623_v51 = vmul.f32 0.0051020407, %v1536_v48  ;;  %v2105_v52 = vsub.f32 1.5, %v2104_v54 }
 0x4be   : > { %v1707_v5 = vsub.f32 %v1623_v51, %v1665_v16  ;;  %v2106_v56 = vmul.f32 %v3279_v11, %v2105_v52  ;;  %v1003_v51 = vpop.f32.mrf.mxu2  ;;  %v1117_v52 = vpop.f32.mrf.mxu3 }
 0x4bf   : > { %v5146_v12 = vadd.f32 %v1117_v52, %v1003_v51 }
 0x4c0   : > { %v1749_v14 = vadd.f32 0.001, %v1707_v5  ;;  %v2110_v20 = vsel %vm2109_vm14, %v3279_v11, %v2106_v56  ;;  %v1732_v11 = vadd.f32 0.001, %v1690_v23  ;;  %v775_v5 = vpop.f32.mrf.mxu0 }
 0x4c1   : > { %v5120_v63 = vmul.f32 %v2206_v59, %v2110_v20  ;;  %v5148_v56 = vadd.f32 %v889_v24, %v775_v5  ;;  %v1285_v20 = vsel %vm1120_vm1, %v5146_v12, 0.0 }
 0x4c2   : > { %3280 = vrsqrt.f32 %v1749_v14  ;;  %vm2157_vm15 = vweird.f32 %v1749_v14  ;;  %vm1987_vm5 = vweird.f32 %v1732_v11 }
 0x4c3   : > { %v5123_v41 = vmul.f32 %v5120_v63, %v1576_v21  ;;  %v2211_v21 = vld [vmem:[%s4004_s26 + $0x140] sm:$0xff]  ;;  %3282 = vrsqrt.f32 %v1732_v11  ;;  %v1286_v15 = vadd.f32 %v1285_v20, %v5148_v56 }
 0x4c8   : > { %v3281_v29 = vpop.eup %3280 }
 0x4c9   : > { %v2152_v22 = vmul.f32 %v3281_v29, %v1749_v14  ;;  %vm2158_vm2 = vweird.f32 %v3281_v29  ;;  %v3283_v14 = vpop.eup %3282 }
 0x4ca   : > { %vm2159_vm3 = vmor %vm2157_vm15, %vm2158_vm2  ;;  %vm1988_vm4 = vweird.f32 %v3283_v14 }
 0x4cb   : > { %v2153_v6 = vmul.f32 %v3281_v29, %v2152_v22  ;;  %v1982_v22 = vmul.f32 %v3283_v14, %v1732_v11  ;;  %vm1989_vm6 = vmor %vm1987_vm5, %vm1988_vm4 }
 0x4cd   : > { %v2154_v57 = vmul.f32 0.5, %v2153_v6 }
 0x4cf   : > { %v2155_v34 = vsub.f32 1.5, %v2154_v57  ;;  %2777 = vperm.xlu2 %3203, %v2359_v50   ;;  %v1983_v57 = vmul.f32 %v3283_v14, %v1982_v22 }
 0x4d1   : > { %v2156_v49 = vmul.f32 %v3281_v29, %v2155_v34 }
 0x4d3   : > { %v2504_v28 = vpop.permute.xlu1 %2503  ;;  %v2160_v0 = vsel %vm2159_vm3, %v3281_v29, %v2156_v49 }
 0x4d4   : > { %v2253_v37 = vmul.f32 %v2211_v21, %v2160_v0  ;;  %v2639_v26 = vmul.f32 %v2504_v28, %v5387_v40  ;;  %v2640_v27 = vmul.f32 %v2504_v28, %v5388_v53 }
 0x4d6   : > { %2583 = vperm.xlu0 %3201, %v2253_v37   ;;  %v2337_v43 = vmul.f32 %v2253_v37, %v1581_v58  ;;  %v5389_v58 = vld [vmem:[#allocation40_spill] sm:$0xff] }
 0x4d8   : > { %v2379_v10 = vsub.f32 %v2295_v61, %v2337_v43  ;;  %v1984_v61 = vmul.f32 0.5, %v1983_v57  ;;  %v5396_v57 = vld [vmem:[#allocation26_spill] sm:$0xff] }
 0x4db   : > { %v2798_v55 = vpop.permute.xlu1 %2797 }
 0x4dc   : > { %v2933_v9 = vadd.f32 %v2798_v55, %v2639_v26  ;;  %v2934_v36 = vadd.f32 %v2798_v55, %v2640_v27  ;;  %v2194_v55 = vld [vmem:[%s4004_s26 + $0xb8] sm:$0xff] }
 0x4de   : > { %3017 = vst [vmem:[%s4276_s10 + $0x180] sm:$0xff] %v2933_v9  ;;  %2877 = vperm.xlu0 %3201, %v2379_v10  }
 0x4df   : > { %3018 = vst.msk [vmem:[%s4276_s10 + $0x188] sm:$0xff] %vm1120_vm1, %v2934_v36 }
 0x4e3   : > { %v2519_v25 = vpop.permute.xlu1 %2518 }
 0x4e4   : > { %v2645_v4 = vmul.f32 %v2519_v25, %v5389_v58  ;;  %v2646_v17 = vmul.f32 %v2519_v25, %v5390_v60  ;;  %v5391_v25 = vld [vmem:[#allocation3_spill] sm:$0xff] }
 0x4e9   : > { %v1276_v45 = vpop.xlane.xlu2 %1275 }
 0x4eb   : > { %v2813_v16 = vpop.permute.xlu1 %2812 }
 0x4ec   : > { %v2939_v54 = vadd.f32 %v2813_v16, %v2645_v4  ;;  %v2940_v48 = vadd.f32 %v2813_v16, %v2646_v17  ;;  %v1579_v17 = vmul.f32 0.0051020407, %v1276_v45  ;;  %v5393_v16 = vld [vmem:[#allocation6_spill] sm:$0xff] }
 0x4ee   : > { %3023 = vst [vmem:[%s4276_s10 + $0x1b0] sm:$0xff] %v2939_v54  ;;  %v1663_v5 = vmul.f32 %v1579_v17, %v1579_v17 }
 0x4ef   : > { %3024 = vst.msk [vmem:[%s4276_s10 + $0x1b8] sm:$0xff] %vm1120_vm1, %v2940_v48  ;;  %v5394_v48 = vld [vmem:[#allocation4_spill] sm:$0xff] }
 0x4f1   : > { %v2484_v4 = vpop.permute.xlu2 %2483 }
 0x4f3   : > { %v2534_v59 = vpop.permute.xlu1 %2533 }
 0x4f4   : > { %v2651_v6 = vmul.f32 %v2534_v59, %v4570_v47  ;;  %v2652_v3 = vmul.f32 %v2534_v59, %v4562_v44  ;;  %v1985_v47 = vsub.f32 1.5, %v1984_v61 }
 0x4f5   : > { %v2569_v29 = vpop.permute.xlu0 %2568 }
 0x4f6   : > { %v2665_v34 = vmul.f32 %v2569_v29, %v4791_v18  ;;  %v2666_v49 = vmul.f32 %v2569_v29, %v4780_v32  ;;  %v1986_v18 = vmul.f32 %v3283_v14, %v1985_v47 }
 0x4f8   : > { %1287 = vadd.xlane.f32.xlu2 %v1286_v15  ;;  %v1990_v10 = vsel %vm1989_vm6, %v3283_v14, %v1986_v18  ;;  %v1372_v15 = vmul.f32 %v5146_v12, %v5146_v12 }
 0x4f9   : > { %v2236_v9 = vmul.f32 %v2194_v55, %v1990_v10 }
 0x4fb   : > { %v2828_v50 = vpop.permute.xlu1 %2827  ;;  %v2320_v55 = vmul.f32 %v2236_v9, %v5136_v46  ;;  %v5398_v46 = vld [vmem:[#allocation8_spill] sm:$0xff] }
 0x4fc   : > { %v2945_v21 = vadd.f32 %v2828_v50, %v2651_v6  ;;  %v2946_v28 = vadd.f32 %v2828_v50, %v2652_v3  ;;  %v5395_v6 = vld [vmem:[#allocation25_spill] sm:$0xff]  ;;  %v2632_v50 = vmul.f32 %v2484_v4, %v5396_v57 }
 0x4fd   : > { %v2863_v0 = vpop.permute.xlu0 %2862  ;;  %v2631_v3 = vmul.f32 %v2484_v4, %v5395_v6  ;;  %v2287_v4 = vld [vmem:[%s4012_s30 + $0x100] sm:$0xff] }
 0x4fe   : > { %3029 = vst [vmem:[%s4276_s10 + $0x1e0] sm:$0xff] %v2945_v21  ;;  %v2959_v37 = vadd.f32 %v2863_v0, %v2665_v34  ;;  %v2960_v43 = vadd.f32 %v2863_v0, %v2666_v49  ;;  %v1537_v0 = vsel %vm1120_vm1, %v1372_v15, 0.0 }
 0x4ff   : > { %3030 = vst.msk [vmem:[%s4276_s10 + $0x1e8] sm:$0xff] %vm1120_vm1, %v2946_v28  ;;  %v1371_v28 = vmul.f32 %v5148_v56, %v5148_v56 }
 0x500   : > { %3043 = vst [vmem:[%s4276_s10 + $0x250] sm:$0xff] %v2959_v37 }
 0x501   : > { %3044 = vst.msk [vmem:[%s4276_s10 + $0x258] sm:$0xff] %vm1120_vm1, %v2960_v43  ;;  %v1538_v43 = vadd.f32 %v1537_v0, %v1371_v28  ;;  %v5401_v28 = vld [vmem:[#allocation42_spill] sm:$0xff] }
 0x503   : > { %v2549_v44 = vpop.permute.xlu1 %2548 }
 0x504   : > { %v2657_v32 = vmul.f32 %v2549_v44, %v4664_v62  ;;  %v2658_v40 = vmul.f32 %v2549_v44, %v4659_v35  ;;  %v5392_v62 = vld [vmem:[#allocation29_spill] sm:$0xff] }
 0x50b   : > { %v2843_v26 = vpop.permute.xlu1 %2842 }
 0x50c   : > { %v2951_v53 = vadd.f32 %v2843_v26, %v2657_v32  ;;  %v2952_v27 = vadd.f32 %v2843_v26, %v2658_v40  ;;  %v2209_v40 = vld [vmem:[%s4004_s26 + $0x130] sm:$0xff] }
 0x50e   : > { %3035 = vst [vmem:[%s4276_s10 + $0x210] sm:$0xff] %v2951_v53 }
 0x50f   : > { %3036 = vst.msk [vmem:[%s4276_s10 + $0x218] sm:$0xff] %vm1120_vm1, %v2952_v27 }
 0x510   : > { %2498 = vperm.xlu2 %3203, %v2236_v9  }
 0x513   : > { %v2564_v36 = vpop.permute.xlu1 %2563 }
 0x514   : > { %v2663_v33 = vmul.f32 %v2564_v36, %v5391_v25  ;;  %v2664_v23 = vmul.f32 %v2564_v36, %v5392_v62  ;;  %v2278_v36 = vld [vmem:[%s4012_s30 + $0xb8] sm:$0xff] }
 0x515   : > { %v2362_v62 = vsub.f32 %v2278_v36, %v2320_v55  ;;  %v5404_v36 = vld [vmem:[#allocation43_spill] sm:$0xff] }
 0x51b   : > { %v2858_v35 = vpop.permute.xlu1 %2857 }
 0x51c   : > { %v2957_v11 = vadd.f32 %v2858_v35, %v2663_v33  ;;  %v2958_v58 = vadd.f32 %v2858_v35, %v2664_v23 }
 0x51e   : > { %3041 = vst [vmem:[%s4276_s10 + $0x240] sm:$0xff] %v2957_v11  ;;  %v5397_v11 = vld [vmem:[#allocation7_spill] sm:$0xff] }
 0x51f   : > { %3042 = vst.msk [vmem:[%s4276_s10 + $0x248] sm:$0xff] %vm1120_vm1, %v2958_v58  ;;  %v2281_v58 = vld [vmem:[%s4012_s30 + $0xd0] sm:$0xff] }
 0x520   : > { %v2365_v9 = vsub.f32 %v2281_v58, %v5398_v46 }
 0x523   : > { %v2579_v60 = vpop.permute.xlu1 %2578 }
 0x524   : > { %v2669_v54 = vmul.f32 %v2579_v60, %v5393_v16  ;;  %v2670_v51 = vmul.f32 %v2579_v60, %v5394_v48  ;;  %v2371_v60 = vsub.f32 %v2287_v4, %v5020_v8  ;;  %v2293_v48 = vld [vmem:[%s4012_s30 + $0x130] sm:$0xff]  ;;  %v5405_v4 = vld [vmem:[#allocation2_spill] sm:$0xff] }
 0x52a   : > { %v1528_v52 = vpop.xlane.xlu2 %1527 }
 0x52b   : > { %v2873_v24 = vpop.permute.xlu1 %2872  ;;  %v1621_v59 = vmul.f32 0.0051020407, %v1528_v52 }
 0x52c   : > { %v2963_v14 = vadd.f32 %v2873_v24, %v2669_v54  ;;  %v2964_v20 = vadd.f32 %v2873_v24, %v2670_v51 }
 0x52d   : > { %v1705_v29 = vsub.f32 %v1621_v59, %v1663_v5  ;;  %v5399_v59 = vld [vmem:[#allocation34_spill] sm:$0xff] }
 0x52e   : > { %3047 = vst [vmem:[%s4276_s10 + $0x270] sm:$0xff] %v2963_v14  ;;  %v5400_v14 = vld [vmem:[#allocation33_spill] sm:$0xff] }
 0x52f   : > { %3048 = vst.msk [vmem:[%s4276_s10 + $0x278] sm:$0xff] %vm1120_vm1, %v2964_v20  ;;  %v1747_v22 = vadd.f32 0.001, %v1705_v29 }
 0x531   : > { %3284 = vrsqrt.f32 %v1747_v22  ;;  %vm2137_vm8 = vweird.f32 %v1747_v22 }
 0x532   : > { %v2778_v34 = vpop.permute.xlu2 %2777 }
 0x533   : > { %v2925_v49 = vadd.f32 %v2778_v34, %v2631_v3  ;;  %v2926_v21 = vadd.f32 %v2778_v34, %v2632_v50 }
 0x535   : > { %3009 = vst [vmem:[%s4276_s10 + $0x140] sm:$0xff] %v2925_v49 }
 0x536   : > { %3010 = vst.msk [vmem:[%s4276_s10 + $0x148] sm:$0xff] %vm1120_vm1, %v2926_v21  ;;  %v2212_v21 = vld [vmem:[%s4004_s26 + $0x148] sm:$0xff] }
 0x537   : > { %v3285_v37 = vpop.eup %3284 }
 0x538   : > { %v2132_v61 = vmul.f32 %v3285_v37, %v1747_v22  ;;  %vm2138_vm7 = vweird.f32 %v3285_v37 }
 0x539   : > { %1539 = vadd.xlane.f32.xlu2 %v1538_v43  ;;  %vm2139_vm9 = vmor %vm2137_vm8, %vm2138_vm7 }
 0x53a   : > { %v2133_v44 = vmul.f32 %v3285_v37, %v2132_v61 }
 0x53c   : > { %v2134_v47 = vmul.f32 0.5, %v2133_v44 }
 0x53e   : > { %v2135_v18 = vsub.f32 1.5, %v2134_v47 }
 0x540   : > { %v2136_v32 = vmul.f32 %v3285_v37, %v2135_v18 }
 0x542   : > { %v2140_v26 = vsel %vm2139_vm9, %v3285_v37, %v2136_v32  ;;  %v5402_v37 = vld [vmem:[#allocation41_spill] sm:$0xff] }
 0x543   : > { %v2251_v53 = vmul.f32 %v2209_v40, %v2140_v26  ;;  %v2296_v26 = vld [vmem:[%s4012_s30 + $0x148] sm:$0xff] }
 0x545   : > { %v2335_v27 = vmul.f32 %v2251_v53, %v1579_v17  ;;  %v2290_v17 = vld [vmem:[%s4012_s30 + $0x118] sm:$0xff] }
 0x546   : > { %v2374_v16 = vsub.f32 %v2290_v17, %v5123_v41 }
 0x548   : > { %v2584_v10 = vpop.permute.xlu0 %2583 }
 0x549   : > { %v2671_v45 = vmul.f32 %v2584_v10, %v5001_v13  ;;  %v2672_v25 = vmul.f32 %v2584_v10, %v4998_v1  ;;  %v2284_v1 = vld [vmem:[%s4012_s30 + $0xe8] sm:$0xff]  ;;  %v5403_v10 = vld [vmem:[#allocation44_spill] sm:$0xff] }
 0x54a   : > { %v2368_v13 = vsub.f32 %v2284_v1, %v4902_v7 }
 0x550   : > { %v2878_v33 = vpop.permute.xlu0 %2877 }
 0x551   : > { %v2965_v23 = vadd.f32 %v2878_v33, %v2671_v45  ;;  %v2966_v35 = vadd.f32 %v2878_v33, %v2672_v25  ;;  %2792 = vperm.xlu2 %3203, %v2362_v62  }
 0x553   : > { %3049 = vst [vmem:[%s4276_s10 + $0x280] sm:$0xff] %v2965_v23 }
 0x554   : > { %3050 = vst.msk [vmem:[%s4276_s10 + $0x288] sm:$0xff] %vm1120_vm1, %v2966_v35 }
 0x559   : > { %2513 = vperm.xlu2 %3203, %v5397_v11  }
 0x561   : > { %2807 = vperm.xlu2 %3203, %v2365_v9  }
 0x569   : > { %2528 = vperm.xlu2 %3203, %v4898_v39   ;;  %v2377_v39 = vsub.f32 %v2293_v48, %v2335_v27 }
 0x56b   : > { %v1288_v54 = vpop.xlane.xlu2 %1287 }
 0x56c   : > { %v1582_v51 = vmul.f32 0.0051020407, %v1288_v54 }
 0x56e   : > { %v1666_v52 = vmul.f32 %v1582_v51, %v1582_v51 }
 0x571   : > { %2822 = vperm.xlu2 %3203, %v2368_v13  }
 0x573   : > { %v2499_v7 = vpop.permute.xlu2 %2498 }
 0x574   : > { %v2638_v20 = vmul.f32 %v2499_v7, %v5400_v14 }
 0x579   : > { %2543 = vperm.xlu2 %3203, %v5015_v19  }
 0x581   : > { %2837 = vperm.xlu2 %3203, %v2371_v60  }
 0x589   : > { %2558 = vperm.xlu2 %3203, %v5120_v63   ;;  %v2637_v63 = vmul.f32 %v2499_v7, %v5399_v59 }
 0x591   : > { %2852 = vperm.xlu2 %3203, %v2374_v16  }
 0x599   : > { %2573 = vperm.xlu2 %3203, %v2251_v53  }
 0x5a1   : > { %2867 = vperm.xlu2 %3203, %v2377_v39  }
 0x5ac   : > { %v1540_v19 = vpop.xlane.xlu2 %1539 }
 0x5ad   : > { %v1624_v24 = vmul.f32 0.0051020407, %v1540_v19 }
 0x5af   : > { %v1708_v8 = vsub.f32 %v1624_v24, %v1666_v52 }
 0x5b1   : > { %v1750_v5 = vadd.f32 0.001, %v1708_v8 }
 0x5b3   : > { %3286 = vrsqrt.f32 %v1750_v5  ;;  %vm2167_vm10 = vweird.f32 %v1750_v5 }
 0x5b4   : > { %v2793_v41 = vpop.permute.xlu2 %2792 }
 0x5b5   : > { %v2931_v29 = vadd.f32 %v2793_v41, %v2637_v63  ;;  %v2932_v22 = vadd.f32 %v2793_v41, %v2638_v20 }
 0x5b7   : > { %3015 = vst [vmem:[%s4276_s10 + $0x170] sm:$0xff] %v2931_v29 }
 0x5b8   : > { %3016 = vst.msk [vmem:[%s4276_s10 + $0x178] sm:$0xff] %vm1120_vm1, %v2932_v22 }
 0x5b9   : > { %v3287_v15 = vpop.eup %3286 }
 0x5ba   : > { %v2162_v6 = vmul.f32 %v3287_v15, %v1750_v5  ;;  %vm2168_vm0 = vweird.f32 %v3287_v15 }
 0x5bb   : > { %vm2169_vm11 = vmor %vm2167_vm10, %vm2168_vm0 }
 0x5bc   : > { %v2163_v3 = vmul.f32 %v3287_v15, %v2162_v6  ;;  %v2514_v57 = vpop.permute.xlu2 %2513 }
 0x5bd   : > { %v2643_v0 = vmul.f32 %v2514_v57, %v5401_v28  ;;  %v2644_v43 = vmul.f32 %v2514_v57, %v5402_v37 }
 0x5be   : > { %v2164_v50 = vmul.f32 0.5, %v2163_v3 }
 0x5c0   : > { %v2165_v34 = vsub.f32 1.5, %v2164_v50 }
 0x5c2   : > { %v2166_v49 = vmul.f32 %v3287_v15, %v2165_v34 }
 0x5c4   : > { %v2808_v61 = vpop.permute.xlu2 %2807  ;;  %v2170_v44 = vsel %vm2169_vm11, %v3287_v15, %v2166_v49 }
 0x5c5   : > { %v2937_v47 = vadd.f32 %v2808_v61, %v2643_v0  ;;  %v2938_v18 = vadd.f32 %v2808_v61, %v2644_v43  ;;  %v2254_v32 = vmul.f32 %v2212_v21, %v2170_v44 }
 0x5c7   : > { %3021 = vst [vmem:[%s4276_s10 + $0x1a0] sm:$0xff] %v2937_v47  ;;  %2588 = vperm.xlu2 %3203, %v2254_v32   ;;  %v2338_v40 = vmul.f32 %v2254_v32, %v1582_v51 }
 0x5c8   : > { %3022 = vst.msk [vmem:[%s4276_s10 + $0x1a8] sm:$0xff] %vm1120_vm1, %v2938_v18 }
 0x5c9   : > { %v2380_v27 = vsub.f32 %v2296_v26, %v2338_v40 }
 0x5cc   : > { %v2529_v53 = vpop.permute.xlu2 %2528 }
 0x5cd   : > { %v2649_v55 = vmul.f32 %v2529_v53, %v5403_v10  ;;  %v2650_v45 = vmul.f32 %v2529_v53, %v5404_v36 }
 0x5cf   : > { %2882 = vperm.xlu2 %3203, %v2380_v27  }
 0x5d4   : > { %v2823_v25 = vpop.permute.xlu2 %2822 }
 0x5d5   : > { %v2943_v33 = vadd.f32 %v2823_v25, %v2649_v55  ;;  %v2944_v62 = vadd.f32 %v2823_v25, %v2650_v45 }
 0x5d7   : > { %3027 = vst [vmem:[%s4276_s10 + $0x1d0] sm:$0xff] %v2943_v33 }
 0x5d8   : > { %3028 = vst.msk [vmem:[%s4276_s10 + $0x1d8] sm:$0xff] %vm1120_vm1, %v2944_v62 }
 0x5dc   : > { %v2544_v23 = vpop.permute.xlu2 %2543 }
 0x5dd   : > { %v2655_v35 = vmul.f32 %v2544_v23, %v4618_v38  ;;  %v2656_v11 = vmul.f32 %v2544_v23, %v4616_v2 }
 0x5e4   : > { %v2838_v58 = vpop.permute.xlu2 %2837 }
 0x5e5   : > { %v2949_v46 = vadd.f32 %v2838_v58, %v2655_v35  ;;  %v2950_v9 = vadd.f32 %v2838_v58, %v2656_v11 }
 0x5e7   : > { %3033 = vst [vmem:[%s4276_s10 + $0x200] sm:$0xff] %v2949_v46 }
 0x5e8   : > { %3034 = vst.msk [vmem:[%s4276_s10 + $0x208] sm:$0xff] %vm1120_vm1, %v2950_v9 }
 0x5ec   : > { %v2559_v1 = vpop.permute.xlu2 %2558 }
 0x5ed   : > { %v2661_v13 = vmul.f32 %v2559_v1, %v4711_v42  ;;  %v2662_v60 = vmul.f32 %v2559_v1, %v5405_v4 }
 0x5f4   : > { %v2853_v17 = vpop.permute.xlu2 %2852 }
 0x5f5   : > { %v2955_v16 = vadd.f32 %v2853_v17, %v2661_v13  ;;  %v2956_v54 = vadd.f32 %v2853_v17, %v2662_v60 }
 0x5f7   : > { %3039 = vst [vmem:[%s4276_s10 + $0x230] sm:$0xff] %v2955_v16 }
 0x5f8   : > { %3040 = vst.msk [vmem:[%s4276_s10 + $0x238] sm:$0xff] %vm1120_vm1, %v2956_v54 }
 0x5fc   : > { %v2574_v2 = vpop.permute.xlu2 %2573 }
 0x5fd   : > { %v2667_v38 = vmul.f32 %v2574_v2, %v4795_v30  ;;  %v2668_v48 = vmul.f32 %v2574_v2, %v4793_v31 }
 0x604   : > { %v2868_v39 = vpop.permute.xlu2 %2867 }
 0x605   : > { %v2961_v7 = vadd.f32 %v2868_v39, %v2667_v38  ;;  %v2962_v51 = vadd.f32 %v2868_v39, %v2668_v48 }
 0x607   : > { %3045 = vst [vmem:[%s4276_s10 + $0x260] sm:$0xff] %v2961_v7 }
 0x608   : > { %3046 = vst.msk [vmem:[%s4276_s10 + $0x268] sm:$0xff] %vm1120_vm1, %v2962_v51 }
 0x621   : > { %v2589_v42 = vpop.permute.xlu2 %2588 }
 0x622   : > { %v2673_v19 = vmul.f32 %v2589_v42, %v5148_v56  ;;  %v2674_v52 = vmul.f32 %v2589_v42, %v5146_v12 }
 0x629   : > { %v2883_v24 = vpop.permute.xlu2 %2882 }
 0x62a   : > { %v2967_v8 = vadd.f32 %v2883_v24, %v2673_v19  ;;  %v2968_v5 = vadd.f32 %v2883_v24, %v2674_v52 }
 0x62c   : > { %3051 = vst [vmem:[%s4276_s10 + $0x290] sm:$0xff] %v2967_v8 }
 0x62d   : > { %3052 = vst.msk [vmem:[%s4276_s10 + $0x298] sm:$0xff] %vm1120_vm1, %v2968_v5 }
 0x62e PF: > { %s15_s18 = sadd.s32 1, %s3294_s18  }
 0x62f   : > { %p12_p4 = scmp.ge.s32.totalorder %s15_s18, 6  }
 0x631   :  { %14 = sbr.rel (!%p12_p4) target bundleno = 1 (0x1), region = 76 }

</bundles_post_ra>
